<compile_context>
chip_gen: v6e
topology: v6e:2x2x1
jax: 0.10.0
libtpu: 0.0.40
codegen_flags: <defaults>
</compile_context>

<pallas_src>
import functools

import jax
import jax.numpy as jnp
from jax import lax
from jax.experimental import pallas as pl
from jax.experimental.pallas import tpu as pltpu

LANE = 128  # TPU lane width; conv *output* channels padded to this (lane-dense vst)


def _round_up(x, m):
    return ((x + m - 1) // m) * m


def _vmem_limit_bytes():
    """Generation-aware scoped-VMEM limit: ~96 MiB on v5e/v6e (128 MiB phys),
    ~48 MiB on v7x (64 MiB phys)."""
    try:
        cap = pltpu.get_tpu_info().vmem_capacity_bytes
    except Exception:  # query unavailable -> conservative default
        cap = 64 * 1024 * 1024
    return int(min(100 * 1024 * 1024, cap * 3 // 4))


def _pick_row_tile(h, row_bytes, budget=8 * 1024 * 1024):
    """Largest divisor of h whose (double-buffered) block fits the budget."""
    th = max(1, min(h, budget // max(1, row_bytes)))
    while h % th:
        th -= 1
    return th


# -----------------------------------------------------------------------------
# Pallas kernels
# -----------------------------------------------------------------------------
def _conv3x3_stats_kernel(*refs, H, W, CIN, COUT_P, fuse_input_bn_relu, mxu_dtype):
    """(optional fused prev-layer BN affine + ReLU on the input) -> 3x3 conv
    (stride 1, pad 1) -> bias, plus per-image per-channel sum / sum-of-squares
    of the f32 conv output (for the BatchNorm that follows).

    Ref shapes (one image per grid step):
      x_ref    : (1, H, W, C_stored)  input tile (C_stored >= CIN)
      w_ref    : (9, CIN, COUT_P)     per-tap weights (only Cout zero-padded)
      b_ref    : (1, COUT_P)          bias (zero padded)
      sc_ref   : (1, C_prev)          folded BN scale of the previous layer
      sh_ref   : (1, C_prev)          folded BN shift of the previous layer
      y_ref    : (1, H, W, COUT_P)    conv output (lane-dense, COUT_P % 128 == 0)
      sum_ref  : (1, 1, COUT_P)       per-image channel sum of y (f32)
      ssq_ref  : (1, 1, COUT_P)       per-image channel sum of y*y (f32)
      xpad_ref : (H+2, W+2, CIN)      VMEM halo scratch (mxu dtype)
    """
    if fuse_input_bn_relu:
        (x_ref, w_ref, b_ref, sc_ref, sh_ref,
         y_ref, sum_ref, ssq_ref, xpad_ref) = refs
    else:
        (x_ref, w_ref, b_ref, y_ref, sum_ref, ssq_ref, xpad_ref) = refs

    # Input tile; drop the stored channel padding (keep the real CIN only).
    x = x_ref[0, :, :, :]                                    # (H, W, C_stored)
    if x.shape[-1] != CIN:
        x = x[:, :, :CIN]
    x = x.astype(jnp.float32)
    if fuse_input_bn_relu:
        # Previous layer's folded BN affine + ReLU -- elementwise math in f32
        # (only the MXU operands are cast to bf16 below).
        s = sc_ref[...][:, :CIN].reshape(1, 1, CIN)
        t = sh_ref[...][:, :CIN].reshape(1, 1, CIN)
        x = jnp.maximum(x * s + t, 0.0)
    x = x.astype(mxu_dtype)

    # 1-pixel halo held in VMEM.  Only the border is (re)zeroed each step; the
    # interior is fully overwritten just below.  NOTE: zeroing only under
    # pl.when(program_id(0) == 0) would not be megacore-safe (scratch is
    # per-TensorCore, and a core running the upper half of the batch never
    # executes program_id 0), so the cheap border refresh is done every step.
    zrow = jnp.zeros((1, W + 2, CIN), mxu_dtype)
    zcol = jnp.zeros((H + 2, 1, CIN), mxu_dtype)
    xpad_ref[0:1, :, :] = zrow
    xpad_ref[H + 1:H + 2, :, :] = zrow
    xpad_ref[:, 0:1, :] = zcol
    xpad_ref[:, W + 1:W + 2, :] = zcol
    xpad_ref[1:H + 1, 1:W + 1, :] = x

    # 3x3 conv = 9 accumulating MXU matmuls straight off the shifted windows
    # (no materialized im2col patch, K per tap = real CIN).  The
    # (H, W, CIN) -> (H*W, CIN) merge is layout-free when W is a multiple of
    # the sublane tile (8 for f32, 16 for bf16) -- true for UNet sizes.
    y = jnp.zeros((H * W, COUT_P), jnp.float32)
    for dh in range(3):
        for dw in range(3):
            lhs = xpad_ref[dh:dh + H, dw:dw + W, :].reshape(H * W, CIN)
            y = y + jnp.dot(lhs, w_ref[dh * 3 + dw],
                            preferred_element_type=jnp.float32)
    y = y + b_ref[...]

    # Per-image BN partial statistics straight off the f32 accumulator (the
    # tiny (N,1,C) partials are reduced in the wrapper; no extra HBM pass).
    sum_ref[...] = jnp.sum(y, axis=0, keepdims=True).reshape(1, 1, COUT_P)
    ssq_ref[...] = jnp.sum(y * y, axis=0, keepdims=True).reshape(1, 1, COUT_P)

    # Lane-dense store (COUT_P % 128 == 0); bf16 inter-layer activation when
    # enabled halves the dominant HBM stream.
    y_ref[...] = y.reshape(1, H, W, COUT_P).astype(y_ref.dtype)


def _bn_relu_kernel(x_ref, scale_ref, shift_ref, o_ref):
    """Folded BN affine + ReLU for the final layer (elementwise math in f32)."""
    c = x_ref.shape[-1]
    x = x_ref[...].astype(jnp.float32)
    s = scale_ref[...].reshape(1, 1, 1, c)
    t = shift_ref[...].reshape(1, 1, 1, c)
    o_ref[...] = jnp.maximum(x * s + t, 0.0).astype(o_ref.dtype)


# -----------------------------------------------------------------------------
# pallas_call wrappers
# -----------------------------------------------------------------------------
def _conv3x3_with_stats(x, w_hwio, b, scale=None, shift=None, *,
                        cin, cout_p, act_dtype, mxu_dtype):
    """x: (N, H, W, C_stored >= cin) -> (y, per-image ch_sum, per-image ch_ssq)."""
    N, H, W, c_stored = x.shape
    cout = w_hwio.shape[-1]
    fuse = scale is not None

    # Per-tap (CIN, COUT_P) weight matrices in the MXU dtype; only the output
    # channels are zero-padded (K stays 9*CIN, not 9*128).
    wtap = jnp.zeros((9, cin, cout_p), jnp.float32)
    wtap = wtap.at[:, :, :cout].set(
        w_hwio.reshape(9, cin, cout).astype(jnp.float32))
    wtap = wtap.astype(mxu_dtype)
    bvec = jnp.zeros((1, cout_p), jnp.float32).at[0, :cout].set(
        b.astype(jnp.float32))

    kernel = functools.partial(
        _conv3x3_stats_kernel, H=H, W=W, CIN=cin, COUT_P=cout_p,
        fuse_input_bn_relu=fuse, mxu_dtype=mxu_dtype)

    # NOTE: w/b/scale/shift index_maps are constant -> fetched once by the
    # pipeline; at bf16 and K=9*CIN they are a few KiB, so the idle second
    # pipeline buffer is negligible.
    in_specs = [
        pl.BlockSpec((1, H, W, c_stored), lambda n: (n, 0, 0, 0)),
        pl.BlockSpec((9, cin, cout_p), lambda n: (0, 0, 0)),
        pl.BlockSpec((1, cout_p), lambda n: (0, 0)),
    ]
    args = [x, wtap, bvec]
    if fuse:
        in_specs += [pl.BlockSpec((1, scale.shape[-1]), lambda n: (0, 0)),
                     pl.BlockSpec((1, shift.shape[-1]), lambda n: (0, 0))]
        args += [scale, shift]

    out_shape = (
        jax.ShapeDtypeStruct((N, H, W, cout_p), act_dtype),
        jax.ShapeDtypeStruct((N, 1, cout_p), jnp.float32),
        jax.ShapeDtypeStruct((N, 1, cout_p), jnp.float32),
    )
    out_specs = [
        pl.BlockSpec((1, H, W, cout_p), lambda n: (n, 0, 0, 0)),
        pl.BlockSpec((1, 1, cout_p), lambda n: (n, 0, 0)),
        pl.BlockSpec((1, 1, cout_p), lambda n: (n, 0, 0)),
    ]
    # TODO(synk): for large images add a row-tile grid axis with a 1-row halo
    # so the per-step y block stays within v7x's 64 MiB physical VMEM.
    return pl.pallas_call(
        kernel,
        out_shape=out_shape,
        grid_spec=pltpu.PrefetchScalarGridSpec(
            num_scalar_prefetch=0,
            grid=(N,),
            in_specs=in_specs,
            out_specs=out_specs,
            scratch_shapes=[pltpu.VMEM((H + 2, W + 2, cin), mxu_dtype)]),
        compiler_params=pltpu.CompilerParams(
            dimension_semantics=("parallel",),
            vmem_limit_bytes=_vmem_limit_bytes()),
    )(*args)


def _bn_relu_apply(x, scale, shift):
    """Final folded-BN affine + ReLU, tiled over batch and rows."""
    N, H, W, C = x.shape
    row_bytes = W * C * (x.dtype.itemsize + 4) * 2          # in + f32 out, x2 buffers
    th = _pick_row_tile(H, row_bytes)
    # TODO(synk): input_output_aliases would save an HBM allocation when the
    # input/output dtypes match (they differ here: bf16 in, f32 out).
    return pl.pallas_call(
        _bn_relu_kernel,
        out_shape=jax.ShapeDtypeStruct((N, H, W, C), jnp.float32),
        grid_spec=pltpu.PrefetchScalarGridSpec(
            num_scalar_prefetch=0,
            grid=(N, H // th),
            in_specs=[pl.BlockSpec((1, th, W, C), lambda n, r: (n, r, 0, 0)),
                      pl.BlockSpec((1, C), lambda n, r: (0, 0)),
                      pl.BlockSpec((1, C), lambda n, r: (0, 0))],
            out_specs=pl.BlockSpec((1, th, W, C), lambda n, r: (n, r, 0, 0))),
        compiler_params=pltpu.CompilerParams(
            dimension_semantics=("parallel", "parallel"),
            vmem_limit_bytes=_vmem_limit_bytes()),
    )(x, scale, shift)


# -----------------------------------------------------------------------------
# BN folding (tiny JAX glue, outside the hot path)
# -----------------------------------------------------------------------------
def _fold_bn(ch_sum, ch_ssq, gamma, beta, count, cout_p, eps=1e-5):
    """Training-mode BatchNorm (biased batch var) folded to scale/shift."""
    cout = gamma.shape[0]
    s = jnp.sum(ch_sum, axis=(0, 1))                     # (cout_p,)
    q = jnp.sum(ch_ssq, axis=(0, 1))                     # (cout_p,)
    mean = s / count
    # TODO(synk): E[x^2]-E[x]^2 in f32 cancels for very large N*H*W; switch to
    # a centered two-pass (or wider partial accumulation) before scaling up.
    var = jnp.maximum(q / count - mean * mean, 0.0)
    gp = jnp.zeros((cout_p,), jnp.float32).at[:cout].set(gamma)
    bp = jnp.zeros((cout_p,), jnp.float32).at[:cout].set(beta)
    scale = gp * lax.rsqrt(var + eps)
    shift = bp - mean * scale
    return scale.reshape(1, cout_p), shift.reshape(1, cout_p)


# -----------------------------------------------------------------------------
# Full forward (NCHW in / NCHW out, matching the PyTorch module)
# -----------------------------------------------------------------------------
@functools.partial(jax.jit, static_argnames=("use_bf16",))
def conv_block_forward(x_nchw, params, use_bf16=True):
    w1, b1, g1, be1, w2, b2, g2, be2 = params
    N, in_c, H, W = x_nchw.shape
    out_c = w1.shape[-1]
    cout_p = _round_up(out_c, LANE)           # lane-dense conv-output channels
    count = N * H * W                         # BN reduction count over (N,H,W)
    mxu_dtype = jnp.bfloat16 if use_bf16 else jnp.float32
    act_dtype = jnp.bfloat16 if use_bf16 else jnp.float32

    # One-time layout change NCHW -> NHWC; NHWC kept for the whole block.
    x = jnp.transpose(x_nchw, (0, 2, 3, 1)).astype(jnp.float32)

    # conv1 + bias (+ fused BN1 statistics)
    y1, s1, q1 = _conv3x3_with_stats(x, w1, b1, cin=in_c, cout_p=cout_p,
                                     act_dtype=act_dtype, mxu_dtype=mxu_dtype)
    scale1, shift1 = _fold_bn(s1, q1, g1, be1, count, cout_p)

    # BN1 affine + ReLU fused into conv2's input path; conv2 + bias + BN2 stats
    y2, s2, q2 = _conv3x3_with_stats(y1, w2, b2, scale1, shift1, cin=out_c,
                                     cout_p=cout_p, act_dtype=act_dtype,
                                     mxu_dtype=mxu_dtype)
    scale2, shift2 = _fold_bn(s2, q2, g2, be2, count, cout_p)

    # Final BN2 affine + ReLU (lane-dense elementwise kernel, f32 output)
    out = _bn_relu_apply(y2, scale2, shift2)

    # Drop channel padding, back to NCHW (one-time layout change).
    return jnp.transpose(out[..., :out_c], (0, 3, 1, 2))


# -----------------------------------------------------------------------------
# Pure-JAX reference (correctness check of the Pallas path)
# -----------------------------------------------------------------------------
def _ref_forward(x_nchw, params, eps=1e-5):
    w1, b1, g1, be1, w2, b2, g2, be2 = params

    def conv(x, w, b):  # NHWC, HWIO
        y = lax.conv_general_dilated(
            x, w, window_strides=(1, 1), padding="SAME",
            dimension_numbers=("NHWC", "HWIO", "NHWC"))
        return y + b.reshape(1, 1, 1, -1)

    def bn_relu(x, g, be):
        m = jnp.mean(x, axis=(0, 1, 2))
        v = jnp.mean(jnp.square(x - m.reshape(1, 1, 1, -1)), axis=(0, 1, 2))
        y = (x - m) / jnp.sqrt(v + eps) * g + be
        return jnp.maximum(y, 0.0)

    x = jnp.transpose(x_nchw, (0, 2, 3, 1))
    x = bn_relu(conv(x, w1, b1), g1, be1)
    x = bn_relu(conv(x, w2, b2), g2, be2)
    return jnp.transpose(x, (0, 3, 1, 2))


# -----------------------------------------------------------------------------
if __name__ == "__main__":
    N, in_c, out_c, S = 2, 4, 8, 16

    key = jax.random.PRNGKey(0)
    k = jax.random.split(key, 9)
    # Conv weights stored HWIO (equivalent to PyTorch OIHW transposed).
    w1 = jax.random.normal(k[0], (3, 3, in_c, out_c), jnp.float32) * 0.1
    b1 = jax.random.normal(k[1], (out_c,), jnp.float32) * 0.1
    g1 = 1.0 + 0.1 * jax.random.normal(k[2], (out_c,), jnp.float32)
    be1 = 0.1 * jax.random.normal(k[3], (out_c,), jnp.float32)
    w2 = jax.random.normal(k[4], (3, 3, out_c, out_c), jnp.float32) * 0.1
    b2 = jax.random.normal(k[5], (out_c,), jnp.float32) * 0.1
    g2 = 1.0 + 0.1 * jax.random.normal(k[6], (out_c,), jnp.float32)
    be2 = 0.1 * jax.random.normal(k[7], (out_c,), jnp.float32)
    params = (w1, b1, g1, be1, w2, b2, g2, be2)

    x = jax.random.normal(k[8], (N, in_c, S, S), jnp.float32)

    ref = _ref_forward(x, params)

    # 1) Structural correctness: all-f32 kernel path must match tightly.
    out_f32 = jax.block_until_ready(conv_block_forward(x, params, use_bf16=False))
    assert out_f32.shape == (N, out_c, S, S), out_f32.shape
    err_f32 = float(jnp.max(jnp.abs(out_f32 - ref)))
    assert err_f32 < 3e-4, err_f32

    # 2) Default fast path: bf16 MXU operands + bf16 inter-layer activations
    #    (standard TPU trade: ~1e-2 absolute error after BatchNorm).
    out = jax.block_until_ready(conv_block_forward(x, params))
    assert out.shape == (N, out_c, S, S), out.shape
    err_max = float(jnp.max(jnp.abs(out - ref)))
    err_mean = float(jnp.mean(jnp.abs(out - ref)))
    assert err_max < 1e-1, err_max
    assert err_mean < 3e-2, err_mean

    print("KERNEL_OK")
</pallas_src>

<mosaic_0001>
module attributes {stable_mosaic.version = 11 : i64} {
  func.func @_conv3x3_stats_kernel(%arg0: i32, %arg1: memref<1x16x16x4xf32, #tpu.memory_space<vmem>>, %arg2: memref<9x4x128xf32, #tpu.memory_space<vmem>>, %arg3: memref<1x128xf32, #tpu.memory_space<vmem>>, %arg4: memref<1x16x16x128xf32, #tpu.memory_space<vmem>>, %arg5: memref<1x1x128xf32, #tpu.memory_space<vmem>>, %arg6: memref<1x1x128xf32, #tpu.memory_space<vmem>>, %arg7: memref<18x18x4xf32, #tpu.memory_space<vmem>>) attributes {dimension_semantics = [#tpu.dimension_semantics<parallel>], iteration_bounds = array<i64: 2>, scalar_prefetch = 0 : i64, scratch_operands = 1 : i64, tpu.core_type = #tpu.core_type<tc>, window_params = [{transform_indices = @transform_0, window_bounds = array<i64: 1, 16, 16, 4>}, {pipeline_mode = #tpu.pipeline_mode<synchronous>, transform_indices = @transform_1, window_bounds = array<i64: 9, 4, 128>}, {pipeline_mode = #tpu.pipeline_mode<synchronous>, transform_indices = @transform_2, window_bounds = array<i64: 1, 128>}, {transform_indices = @transform_3, window_bounds = array<i64: 1, 16, 16, 128>}, {transform_indices = @transform_4, window_bounds = array<i64: 1, 1, 128>}, {transform_indices = @transform_5, window_bounds = array<i64: 1, 1, 128>}]} {
    %c0 = arith.constant 0 : index
    %c0_0 = arith.constant 0 : index
    %c0_1 = arith.constant 0 : index
    %c0_2 = arith.constant 0 : index
    %0 = vector.load %arg1[%c0, %c0_0, %c0_1, %c0_2] : memref<1x16x16x4xf32, #tpu.memory_space<vmem>>, vector<1x16x16x4xf32>
    %1 = vector.shape_cast %0 : vector<1x16x16x4xf32> to vector<16x16x4xf32>
    %cst = arith.constant 0.000000e+00 : f32
    %2 = vector.broadcast %cst : f32 to vector<1x18x4xf32>
    %cst_3 = arith.constant 0.000000e+00 : f32
    %3 = vector.broadcast %cst_3 : f32 to vector<18x1x4xf32>
    %c0_4 = arith.constant 0 : index
    %c0_5 = arith.constant 0 : index
    %c0_6 = arith.constant 0 : index
    %4 = vector.load %arg7[%c0_4, %c0_5, %c0_6] : memref<18x18x4xf32, #tpu.memory_space<vmem>>, vector<1x18x4xf32>
    tpu.vector_store %arg7[%c0_4, %c0_5, %c0_6], %2 {strides = array<i32>} : memref<18x18x4xf32, #tpu.memory_space<vmem>>, vector<1x18x4xf32>,
    %c17 = arith.constant 17 : index
    %c0_7 = arith.constant 0 : index
    %c0_8 = arith.constant 0 : index
    %5 = vector.load %arg7[%c17, %c0_7, %c0_8] : memref<18x18x4xf32, #tpu.memory_space<vmem>>, vector<1x18x4xf32>
    tpu.vector_store %arg7[%c17, %c0_7, %c0_8], %2 {strides = array<i32>} : memref<18x18x4xf32, #tpu.memory_space<vmem>>, vector<1x18x4xf32>,
    %c0_9 = arith.constant 0 : index
    %c0_10 = arith.constant 0 : index
    %c0_11 = arith.constant 0 : index
    %6 = vector.load %arg7[%c0_9, %c0_10, %c0_11] : memref<18x18x4xf32, #tpu.memory_space<vmem>>, vector<18x1x4xf32>
    tpu.vector_store %arg7[%c0_9, %c0_10, %c0_11], %3 {strides = array<i32>} : memref<18x18x4xf32, #tpu.memory_space<vmem>>, vector<18x1x4xf32>,
    %c0_12 = arith.constant 0 : index
    %c17_13 = arith.constant 17 : index
    %c0_14 = arith.constant 0 : index
    %7 = vector.load %arg7[%c0_12, %c17_13, %c0_14] : memref<18x18x4xf32, #tpu.memory_space<vmem>>, vector<18x1x4xf32>
    tpu.vector_store %arg7[%c0_12, %c17_13, %c0_14], %3 {strides = array<i32>} : memref<18x18x4xf32, #tpu.memory_space<vmem>>, vector<18x1x4xf32>,
    %c1 = arith.constant 1 : index
    %c1_15 = arith.constant 1 : index
    %c0_16 = arith.constant 0 : index
    %8 = vector.load %arg7[%c1, %c1_15, %c0_16] : memref<18x18x4xf32, #tpu.memory_space<vmem>>, vector<16x16x4xf32>
    tpu.vector_store %arg7[%c1, %c1_15, %c0_16], %1 {strides = array<i32>} : memref<18x18x4xf32, #tpu.memory_space<vmem>>, vector<16x16x4xf32>,
    %cst_17 = arith.constant 0.000000e+00 : f32
    %9 = vector.broadcast %cst_17 : f32 to vector<256x128xf32>
    %c0_18 = arith.constant 0 : index
    %c0_19 = arith.constant 0 : index
    %c0_20 = arith.constant 0 : index
    %10 = vector.load %arg7[%c0_18, %c0_19, %c0_20] : memref<18x18x4xf32, #tpu.memory_space<vmem>>, vector<16x16x4xf32>
    %11 = vector.shape_cast %10 : vector<16x16x4xf32> to vector<256x4xf32>
    %c0_21 = arith.constant 0 : index
    %c0_22 = arith.constant 0 : index
    %c0_23 = arith.constant 0 : index
    %12 = vector.load %arg2[%c0_21, %c0_22, %c0_23] : memref<9x4x128xf32, #tpu.memory_space<vmem>>, vector<1x4x128xf32>
    %13 = vector.shape_cast %12 : vector<1x4x128xf32> to vector<4x128xf32>
    %cst_24 = arith.constant dense<0.000000e+00> : vector<256x128xf32>
    %14 = tpu.matmul %11, %13, %cst_24 {dimension_numbers = #tpu.dot_dimension_numbers<[1], [0], [0], [1], [0, 0, 1, 1], [], []>} : vector<256x4xf32>, vector<4x128xf32>, vector<256x128xf32> -> vector<256x128xf32>
    %15 = arith.addf %9, %14 : vector<256x128xf32>
    %c0_25 = arith.constant 0 : index
    %c1_26 = arith.constant 1 : index
    %c0_27 = arith.constant 0 : index
    %16 = vector.load %arg7[%c0_25, %c1_26, %c0_27] : memref<18x18x4xf32, #tpu.memory_space<vmem>>, vector<16x16x4xf32>
    %17 = vector.shape_cast %16 : vector<16x16x4xf32> to vector<256x4xf32>
    %c1_28 = arith.constant 1 : index
    %c0_29 = arith.constant 0 : index
    %c0_30 = arith.constant 0 : index
    %18 = vector.load %arg2[%c1_28, %c0_29, %c0_30] : memref<9x4x128xf32, #tpu.memory_space<vmem>>, vector<1x4x128xf32>
    %19 = vector.shape_cast %18 : vector<1x4x128xf32> to vector<4x128xf32>
    %cst_31 = arith.constant dense<0.000000e+00> : vector<256x128xf32>
    %20 = tpu.matmul %17, %19, %cst_31 {dimension_numbers = #tpu.dot_dimension_numbers<[1], [0], [0], [1], [0, 0, 1, 1], [], []>} : vector<256x4xf32>, vector<4x128xf32>, vector<256x128xf32> -> vector<256x128xf32>
    %21 = arith.addf %15, %20 : vector<256x128xf32>
    %c0_32 = arith.constant 0 : index
    %c2 = arith.constant 2 : index
    %c0_33 = arith.constant 0 : index
    %22 = vector.load %arg7[%c0_32, %c2, %c0_33] : memref<18x18x4xf32, #tpu.memory_space<vmem>>, vector<16x16x4xf32>
    %23 = vector.shape_cast %22 : vector<16x16x4xf32> to vector<256x4xf32>
    %c2_34 = arith.constant 2 : index
    %c0_35 = arith.constant 0 : index
    %c0_36 = arith.constant 0 : index
    %24 = vector.load %arg2[%c2_34, %c0_35, %c0_36] : memref<9x4x128xf32, #tpu.memory_space<vmem>>, vector<1x4x128xf32>
    %25 = vector.shape_cast %24 : vector<1x4x128xf32> to vector<4x128xf32>
    %cst_37 = arith.constant dense<0.000000e+00> : vector<256x128xf32>
    %26 = tpu.matmul %23, %25, %cst_37 {dimension_numbers = #tpu.dot_dimension_numbers<[1], [0], [0], [1], [0, 0, 1, 1], [], []>} : vector<256x4xf32>, vector<4x128xf32>, vector<256x128xf32> -> vector<256x128xf32>
    %27 = arith.addf %21, %26 : vector<256x128xf32>
    %c1_38 = arith.constant 1 : index
    %c0_39 = arith.constant 0 : index
    %c0_40 = arith.constant 0 : index
    %28 = vector.load %arg7[%c1_38, %c0_39, %c0_40] : memref<18x18x4xf32, #tpu.memory_space<vmem>>, vector<16x16x4xf32>
    %29 = vector.shape_cast %28 : vector<16x16x4xf32> to vector<256x4xf32>
    %c3 = arith.constant 3 : index
    %c0_41 = arith.constant 0 : index
    %c0_42 = arith.constant 0 : index
    %30 = vector.load %arg2[%c3, %c0_41, %c0_42] : memref<9x4x128xf32, #tpu.memory_space<vmem>>, vector<1x4x128xf32>
    %31 = vector.shape_cast %30 : vector<1x4x128xf32> to vector<4x128xf32>
    %cst_43 = arith.constant dense<0.000000e+00> : vector<256x128xf32>
    %32 = tpu.matmul %29, %31, %cst_43 {dimension_numbers = #tpu.dot_dimension_numbers<[1], [0], [0], [1], [0, 0, 1, 1], [], []>} : vector<256x4xf32>, vector<4x128xf32>, vector<256x128xf32> -> vector<256x128xf32>
    %33 = arith.addf %27, %32 : vector<256x128xf32>
    %c1_44 = arith.constant 1 : index
    %c1_45 = arith.constant 1 : index
    %c0_46 = arith.constant 0 : index
    %34 = vector.load %arg7[%c1_44, %c1_45, %c0_46] : memref<18x18x4xf32, #tpu.memory_space<vmem>>, vector<16x16x4xf32>
    %35 = vector.shape_cast %34 : vector<16x16x4xf32> to vector<256x4xf32>
    %c4 = arith.constant 4 : index
    %c0_47 = arith.constant 0 : index
    %c0_48 = arith.constant 0 : index
    %36 = vector.load %arg2[%c4, %c0_47, %c0_48] : memref<9x4x128xf32, #tpu.memory_space<vmem>>, vector<1x4x128xf32>
    %37 = vector.shape_cast %36 : vector<1x4x128xf32> to vector<4x128xf32>
    %cst_49 = arith.constant dense<0.000000e+00> : vector<256x128xf32>
    %38 = tpu.matmul %35, %37, %cst_49 {dimension_numbers = #tpu.dot_dimension_numbers<[1], [0], [0], [1], [0, 0, 1, 1], [], []>} : vector<256x4xf32>, vector<4x128xf32>, vector<256x128xf32> -> vector<256x128xf32>
    %39 = arith.addf %33, %38 : vector<256x128xf32>
    %c1_50 = arith.constant 1 : index
    %c2_51 = arith.constant 2 : index
    %c0_52 = arith.constant 0 : index
    %40 = vector.load %arg7[%c1_50, %c2_51, %c0_52] : memref<18x18x4xf32, #tpu.memory_space<vmem>>, vector<16x16x4xf32>
    %41 = vector.shape_cast %40 : vector<16x16x4xf32> to vector<256x4xf32>
    %c5 = arith.constant 5 : index
    %c0_53 = arith.constant 0 : index
    %c0_54 = arith.constant 0 : index
    %42 = vector.load %arg2[%c5, %c0_53, %c0_54] : memref<9x4x128xf32, #tpu.memory_space<vmem>>, vector<1x4x128xf32>
    %43 = vector.shape_cast %42 : vector<1x4x128xf32> to vector<4x128xf32>
    %cst_55 = arith.constant dense<0.000000e+00> : vector<256x128xf32>
    %44 = tpu.matmul %41, %43, %cst_55 {dimension_numbers = #tpu.dot_dimension_numbers<[1], [0], [0], [1], [0, 0, 1, 1], [], []>} : vector<256x4xf32>, vector<4x128xf32>, vector<256x128xf32> -> vector<256x128xf32>
    %45 = arith.addf %39, %44 : vector<256x128xf32>
    %c2_56 = arith.constant 2 : index
    %c0_57 = arith.constant 0 : index
    %c0_58 = arith.constant 0 : index
    %46 = vector.load %arg7[%c2_56, %c0_57, %c0_58] : memref<18x18x4xf32, #tpu.memory_space<vmem>>, vector<16x16x4xf32>
    %47 = vector.shape_cast %46 : vector<16x16x4xf32> to vector<256x4xf32>
    %c6 = arith.constant 6 : index
    %c0_59 = arith.constant 0 : index
    %c0_60 = arith.constant 0 : index
    %48 = vector.load %arg2[%c6, %c0_59, %c0_60] : memref<9x4x128xf32, #tpu.memory_space<vmem>>, vector<1x4x128xf32>
    %49 = vector.shape_cast %48 : vector<1x4x128xf32> to vector<4x128xf32>
    %cst_61 = arith.constant dense<0.000000e+00> : vector<256x128xf32>
    %50 = tpu.matmul %47, %49, %cst_61 {dimension_numbers = #tpu.dot_dimension_numbers<[1], [0], [0], [1], [0, 0, 1, 1], [], []>} : vector<256x4xf32>, vector<4x128xf32>, vector<256x128xf32> -> vector<256x128xf32>
    %51 = arith.addf %45, %50 : vector<256x128xf32>
    %c2_62 = arith.constant 2 : index
    %c1_63 = arith.constant 1 : index
    %c0_64 = arith.constant 0 : index
    %52 = vector.load %arg7[%c2_62, %c1_63, %c0_64] : memref<18x18x4xf32, #tpu.memory_space<vmem>>, vector<16x16x4xf32>
    %53 = vector.shape_cast %52 : vector<16x16x4xf32> to vector<256x4xf32>
    %c7 = arith.constant 7 : index
    %c0_65 = arith.constant 0 : index
    %c0_66 = arith.constant 0 : index
    %54 = vector.load %arg2[%c7, %c0_65, %c0_66] : memref<9x4x128xf32, #tpu.memory_space<vmem>>, vector<1x4x128xf32>
    %55 = vector.shape_cast %54 : vector<1x4x128xf32> to vector<4x128xf32>
    %cst_67 = arith.constant dense<0.000000e+00> : vector<256x128xf32>
    %56 = tpu.matmul %53, %55, %cst_67 {dimension_numbers = #tpu.dot_dimension_numbers<[1], [0], [0], [1], [0, 0, 1, 1], [], []>} : vector<256x4xf32>, vector<4x128xf32>, vector<256x128xf32> -> vector<256x128xf32>
    %57 = arith.addf %51, %56 : vector<256x128xf32>
    %c2_68 = arith.constant 2 : index
    %c2_69 = arith.constant 2 : index
    %c0_70 = arith.constant 0 : index
    %58 = vector.load %arg7[%c2_68, %c2_69, %c0_70] : memref<18x18x4xf32, #tpu.memory_space<vmem>>, vector<16x16x4xf32>
    %59 = vector.shape_cast %58 : vector<16x16x4xf32> to vector<256x4xf32>
    %c8 = arith.constant 8 : index
    %c0_71 = arith.constant 0 : index
    %c0_72 = arith.constant 0 : index
    %60 = vector.load %arg2[%c8, %c0_71, %c0_72] : memref<9x4x128xf32, #tpu.memory_space<vmem>>, vector<1x4x128xf32>
    %61 = vector.shape_cast %60 : vector<1x4x128xf32> to vector<4x128xf32>
    %cst_73 = arith.constant dense<0.000000e+00> : vector<256x128xf32>
    %62 = tpu.matmul %59, %61, %cst_73 {dimension_numbers = #tpu.dot_dimension_numbers<[1], [0], [0], [1], [0, 0, 1, 1], [], []>} : vector<256x4xf32>, vector<4x128xf32>, vector<256x128xf32> -> vector<256x128xf32>
    %63 = arith.addf %57, %62 : vector<256x128xf32>
    %c0_74 = arith.constant 0 : index
    %c0_75 = arith.constant 0 : index
    %64 = vector.load %arg3[%c0_74, %c0_75] : memref<1x128xf32, #tpu.memory_space<vmem>>, vector<1x128xf32>
    %65 = vector.broadcast %64 : vector<1x128xf32> to vector<256x128xf32>
    %66 = arith.addf %63, %65 : vector<256x128xf32>
    %cst_76 = arith.constant dense<0.000000e+00> : vector<128xf32>
    %67 = vector.multi_reduction <add>, %66, %cst_76 [0] : vector<256x128xf32> to vector<128xf32>
    %68 = vector.shape_cast %67 : vector<128xf32> to vector<1x128xf32>
    %69 = vector.shape_cast %68 : vector<1x128xf32> to vector<1x1x128xf32>
    %c0_77 = arith.constant 0 : index
    %c0_78 = arith.constant 0 : index
    %c0_79 = arith.constant 0 : index
    %70 = vector.load %arg5[%c0_77, %c0_78, %c0_79] : memref<1x1x128xf32, #tpu.memory_space<vmem>>, vector<1x1x128xf32>
    tpu.vector_store %arg5[%c0_77, %c0_78, %c0_79], %69 {strides = array<i32>} : memref<1x1x128xf32, #tpu.memory_space<vmem>>, vector<1x1x128xf32>,
    %71 = arith.mulf %66, %66 : vector<256x128xf32>
    %cst_80 = arith.constant dense<0.000000e+00> : vector<128xf32>
    %72 = vector.multi_reduction <add>, %71, %cst_80 [0] : vector<256x128xf32> to vector<128xf32>
    %73 = vector.shape_cast %72 : vector<128xf32> to vector<1x128xf32>
    %74 = vector.shape_cast %73 : vector<1x128xf32> to vector<1x1x128xf32>
    %c0_81 = arith.constant 0 : index
    %c0_82 = arith.constant 0 : index
    %c0_83 = arith.constant 0 : index
    %75 = vector.load %arg6[%c0_81, %c0_82, %c0_83] : memref<1x1x128xf32, #tpu.memory_space<vmem>>, vector<1x1x128xf32>
    tpu.vector_store %arg6[%c0_81, %c0_82, %c0_83], %74 {strides = array<i32>} : memref<1x1x128xf32, #tpu.memory_space<vmem>>, vector<1x1x128xf32>,
    %76 = vector.shape_cast %66 : vector<256x128xf32> to vector<1x16x16x128xf32>
    %c0_84 = arith.constant 0 : index
    %c0_85 = arith.constant 0 : index
    %c0_86 = arith.constant 0 : index
    %c0_87 = arith.constant 0 : index
    %77 = vector.load %arg4[%c0_84, %c0_85, %c0_86, %c0_87] : memref<1x16x16x128xf32, #tpu.memory_space<vmem>>, vector<1x16x16x128xf32>
    tpu.vector_store %arg4[%c0_84, %c0_85, %c0_86, %c0_87], %76 {strides = array<i32>} : memref<1x16x16x128xf32, #tpu.memory_space<vmem>>, vector<1x16x16x128xf32>,
    return
  }
  func.func @transform_0(%arg0: i32) -> (i32, i32, i32, i32) {
    %c0_i32 = arith.constant 0 : i32
    %c0_i32_0 = arith.constant 0 : i32
    %c0_i32_1 = arith.constant 0 : i32
    %c0_i32_2 = arith.constant 0 : i32
    return %arg0, %c0_i32, %c0_i32_0, %c0_i32_1 : i32, i32, i32, i32
  }
  func.func @transform_1(%arg0: i32) -> (i32, i32, i32) {
    %c0_i32 = arith.constant 0 : i32
    %c0_i32_0 = arith.constant 0 : i32
    %c0_i32_1 = arith.constant 0 : i32
    %c0_i32_2 = arith.constant 0 : i32
    return %c0_i32, %c0_i32_0, %c0_i32_1 : i32, i32, i32
  }
  func.func @transform_2(%arg0: i32) -> (i32, i32) {
    %c0_i32 = arith.constant 0 : i32
    %c0_i32_0 = arith.constant 0 : i32
    %c0_i32_1 = arith.constant 0 : i32
    return %c0_i32, %c0_i32_0 : i32, i32
  }
  func.func @transform_3(%arg0: i32) -> (i32, i32, i32, i32) {
    %c0_i32 = arith.constant 0 : i32
    %c0_i32_0 = arith.constant 0 : i32
    %c0_i32_1 = arith.constant 0 : i32
    %c0_i32_2 = arith.constant 0 : i32
    return %arg0, %c0_i32, %c0_i32_0, %c0_i32_1 : i32, i32, i32, i32
  }
  func.func @transform_4(%arg0: i32) -> (i32, i32, i32) {
    %c0_i32 = arith.constant 0 : i32
    %c0_i32_0 = arith.constant 0 : i32
    %c0_i32_1 = arith.constant 0 : i32
    return %arg0, %c0_i32, %c0_i32_0 : i32, i32, i32
  }
  func.func @transform_5(%arg0: i32) -> (i32, i32, i32) {
    %c0_i32 = arith.constant 0 : i32
    %c0_i32_0 = arith.constant 0 : i32
    %c0_i32_1 = arith.constant 0 : i32
    return %arg0, %c0_i32, %c0_i32_0 : i32, i32, i32
  }
}

module attributes {stable_mosaic.version = 11 : i64} {
  func.func @_bn_relu_kernel(%arg0: i32, %arg1: i32, %arg2: memref<1x16x16x128xf32, #tpu.memory_space<vmem>>, %arg3: memref<1x128xf32, #tpu.memory_space<vmem>>, %arg4: memref<1x128xf32, #tpu.memory_space<vmem>>, %arg5: memref<1x16x16x128xf32, #tpu.memory_space<vmem>>) attributes {dimension_semantics = [#tpu.dimension_semantics<parallel>, #tpu.dimension_semantics<parallel>], iteration_bounds = array<i64: 2, 1>, scalar_prefetch = 0 : i64, scratch_operands = 0 : i64, tpu.core_type = #tpu.core_type<tc>, window_params = [{transform_indices = @transform_0, window_bounds = array<i64: 1, 16, 16, 128>}, {pipeline_mode = #tpu.pipeline_mode<synchronous>, transform_indices = @transform_1, window_bounds = array<i64: 1, 128>}, {pipeline_mode = #tpu.pipeline_mode<synchronous>, transform_indices = @transform_2, window_bounds = array<i64: 1, 128>}, {transform_indices = @transform_3, window_bounds = array<i64: 1, 16, 16, 128>}]} {
    %c0 = arith.constant 0 : index
    %c0_0 = arith.constant 0 : index
    %c0_1 = arith.constant 0 : index
    %c0_2 = arith.constant 0 : index
    %0 = vector.load %arg2[%c0, %c0_0, %c0_1, %c0_2] : memref<1x16x16x128xf32, #tpu.memory_space<vmem>>, vector<1x16x16x128xf32>
    %c0_3 = arith.constant 0 : index
    %c0_4 = arith.constant 0 : index
    %1 = vector.load %arg3[%c0_3, %c0_4] : memref<1x128xf32, #tpu.memory_space<vmem>>, vector<1x128xf32>
    %2 = vector.shape_cast %1 : vector<1x128xf32> to vector<1x1x1x128xf32>
    %c0_5 = arith.constant 0 : index
    %c0_6 = arith.constant 0 : index
    %3 = vector.load %arg4[%c0_5, %c0_6] : memref<1x128xf32, #tpu.memory_space<vmem>>, vector<1x128xf32>
    %4 = vector.shape_cast %3 : vector<1x128xf32> to vector<1x1x1x128xf32>
    %5 = vector.broadcast %2 : vector<1x1x1x128xf32> to vector<1x16x16x128xf32>
    %6 = arith.mulf %0, %5 : vector<1x16x16x128xf32>
    %7 = vector.broadcast %4 : vector<1x1x1x128xf32> to vector<1x16x16x128xf32>
    %8 = arith.addf %6, %7 : vector<1x16x16x128xf32>
    %cst = arith.constant 0.000000e+00 : f32
    %9 = vector.broadcast %cst : f32 to vector<1x16x16x128xf32>
    %10 = arith.maximumf %8, %9 : vector<1x16x16x128xf32>
    %c0_7 = arith.constant 0 : index
    %c0_8 = arith.constant 0 : index
    %c0_9 = arith.constant 0 : index
    %c0_10 = arith.constant 0 : index
    %11 = vector.load %arg5[%c0_7, %c0_8, %c0_9, %c0_10] : memref<1x16x16x128xf32, #tpu.memory_space<vmem>>, vector<1x16x16x128xf32>
    tpu.vector_store %arg5[%c0_7, %c0_8, %c0_9, %c0_10], %10 {strides = array<i32>} : memref<1x16x16x128xf32, #tpu.memory_space<vmem>>, vector<1x16x16x128xf32>,
    return
  }
  func.func @transform_0(%arg0: i32, %arg1: i32) -> (i32, i32, i32, i32) {
    %c0_i32 = arith.constant 0 : i32
    %c0_i32_0 = arith.constant 0 : i32
    %c0_i32_1 = arith.constant 0 : i32
    return %arg0, %arg1, %c0_i32, %c0_i32_0 : i32, i32, i32, i32
  }
  func.func @transform_1(%arg0: i32, %arg1: i32) -> (i32, i32) {
    %c0_i32 = arith.constant 0 : i32
    %c0_i32_0 = arith.constant 0 : i32
    %c0_i32_1 = arith.constant 0 : i32
    return %c0_i32, %c0_i32_0 : i32, i32
  }
  func.func @transform_2(%arg0: i32, %arg1: i32) -> (i32, i32) {
    %c0_i32 = arith.constant 0 : i32
    %c0_i32_0 = arith.constant 0 : i32
    %c0_i32_1 = arith.constant 0 : i32
    return %c0_i32, %c0_i32_0 : i32, i32
  }
  func.func @transform_3(%arg0: i32, %arg1: i32) -> (i32, i32, i32, i32) {
    %c0_i32 = arith.constant 0 : i32
    %c0_i32_0 = arith.constant 0 : i32
    %c0_i32_1 = arith.constant 0 : i32
    return %arg0, %arg1, %c0_i32, %c0_i32_0 : i32, i32, i32, i32
  }
}

module attributes {stable_mosaic.version = 11 : i64} {
  func.func @_conv3x3_stats_kernel(%arg0: i32, %arg1: memref<1x16x16x128xf32, #tpu.memory_space<vmem>>, %arg2: memref<9x8x128xf32, #tpu.memory_space<vmem>>, %arg3: memref<1x128xf32, #tpu.memory_space<vmem>>, %arg4: memref<1x128xf32, #tpu.memory_space<vmem>>, %arg5: memref<1x128xf32, #tpu.memory_space<vmem>>, %arg6: memref<1x16x16x128xf32, #tpu.memory_space<vmem>>, %arg7: memref<1x1x128xf32, #tpu.memory_space<vmem>>, %arg8: memref<1x1x128xf32, #tpu.memory_space<vmem>>, %arg9: memref<18x18x8xf32, #tpu.memory_space<vmem>>) attributes {dimension_semantics = [#tpu.dimension_semantics<parallel>], iteration_bounds = array<i64: 2>, scalar_prefetch = 0 : i64, scratch_operands = 1 : i64, tpu.core_type = #tpu.core_type<tc>, window_params = [{transform_indices = @transform_0, window_bounds = array<i64: 1, 16, 16, 128>}, {pipeline_mode = #tpu.pipeline_mode<synchronous>, transform_indices = @transform_1, window_bounds = array<i64: 9, 8, 128>}, {pipeline_mode = #tpu.pipeline_mode<synchronous>, transform_indices = @transform_2, window_bounds = array<i64: 1, 128>}, {pipeline_mode = #tpu.pipeline_mode<synchronous>, transform_indices = @transform_3, window_bounds = array<i64: 1, 128>}, {pipeline_mode = #tpu.pipeline_mode<synchronous>, transform_indices = @transform_4, window_bounds = array<i64: 1, 128>}, {transform_indices = @transform_5, window_bounds = array<i64: 1, 16, 16, 128>}, {transform_indices = @transform_6, window_bounds = array<i64: 1, 1, 128>}, {transform_indices = @transform_7, window_bounds = array<i64: 1, 1, 128>}]} {
    %c0 = arith.constant 0 : index
    %c0_0 = arith.constant 0 : index
    %c0_1 = arith.constant 0 : index
    %c0_2 = arith.constant 0 : index
    %0 = vector.load %arg1[%c0, %c0_0, %c0_1, %c0_2] : memref<1x16x16x128xf32, #tpu.memory_space<vmem>>, vector<1x16x16x128xf32>
    %1 = vector.shape_cast %0 : vector<1x16x16x128xf32> to vector<16x16x128xf32>
    %2 = vector.extract_strided_slice %1 {offsets = [0, 0, 0], sizes = [16, 16, 8], strides = [1, 1, 1]} : vector<16x16x128xf32> to vector<16x16x8xf32>
    %c0_3 = arith.constant 0 : index
    %c0_4 = arith.constant 0 : index
    %3 = vector.load %arg4[%c0_3, %c0_4] : memref<1x128xf32, #tpu.memory_space<vmem>>, vector<1x128xf32>
    %4 = vector.extract_strided_slice %3 {offsets = [0, 0], sizes = [1, 8], strides = [1, 1]} : vector<1x128xf32> to vector<1x8xf32>
    %5 = vector.shape_cast %4 : vector<1x8xf32> to vector<1x1x8xf32>
    %c0_5 = arith.constant 0 : index
    %c0_6 = arith.constant 0 : index
    %6 = vector.load %arg5[%c0_5, %c0_6] : memref<1x128xf32, #tpu.memory_space<vmem>>, vector<1x128xf32>
    %7 = vector.extract_strided_slice %6 {offsets = [0, 0], sizes = [1, 8], strides = [1, 1]} : vector<1x128xf32> to vector<1x8xf32>
    %8 = vector.shape_cast %7 : vector<1x8xf32> to vector<1x1x8xf32>
    %9 = vector.broadcast %5 : vector<1x1x8xf32> to vector<16x16x8xf32>
    %10 = arith.mulf %2, %9 : vector<16x16x8xf32>
    %11 = vector.broadcast %8 : vector<1x1x8xf32> to vector<16x16x8xf32>
    %12 = arith.addf %10, %11 : vector<16x16x8xf32>
    %cst = arith.constant 0.000000e+00 : f32
    %13 = vector.broadcast %cst : f32 to vector<16x16x8xf32>
    %14 = arith.maximumf %12, %13 : vector<16x16x8xf32>
    %cst_7 = arith.constant 0.000000e+00 : f32
    %15 = vector.broadcast %cst_7 : f32 to vector<1x18x8xf32>
    %cst_8 = arith.constant 0.000000e+00 : f32
    %16 = vector.broadcast %cst_8 : f32 to vector<18x1x8xf32>
    %c0_9 = arith.constant 0 : index
    %c0_10 = arith.constant 0 : index
    %c0_11 = arith.constant 0 : index
    %17 = vector.load %arg9[%c0_9, %c0_10, %c0_11] : memref<18x18x8xf32, #tpu.memory_space<vmem>>, vector<1x18x8xf32>
    tpu.vector_store %arg9[%c0_9, %c0_10, %c0_11], %15 {strides = array<i32>} : memref<18x18x8xf32, #tpu.memory_space<vmem>>, vector<1x18x8xf32>,
    %c17 = arith.constant 17 : index
    %c0_12 = arith.constant 0 : index
    %c0_13 = arith.constant 0 : index
    %18 = vector.load %arg9[%c17, %c0_12, %c0_13] : memref<18x18x8xf32, #tpu.memory_space<vmem>>, vector<1x18x8xf32>
    tpu.vector_store %arg9[%c17, %c0_12, %c0_13], %15 {strides = array<i32>} : memref<18x18x8xf32, #tpu.memory_space<vmem>>, vector<1x18x8xf32>,
    %c0_14 = arith.constant 0 : index
    %c0_15 = arith.constant 0 : index
    %c0_16 = arith.constant 0 : index
    %19 = vector.load %arg9[%c0_14, %c0_15, %c0_16] : memref<18x18x8xf32, #tpu.memory_space<vmem>>, vector<18x1x8xf32>
    tpu.vector_store %arg9[%c0_14, %c0_15, %c0_16], %16 {strides = array<i32>} : memref<18x18x8xf32, #tpu.memory_space<vmem>>, vector<18x1x8xf32>,
    %c0_17 = arith.constant 0 : index
    %c17_18 = arith.constant 17 : index
    %c0_19 = arith.constant 0 : index
    %20 = vector.load %arg9[%c0_17, %c17_18, %c0_19] : memref<18x18x8xf32, #tpu.memory_space<vmem>>, vector<18x1x8xf32>
    tpu.vector_store %arg9[%c0_17, %c17_18, %c0_19], %16 {strides = array<i32>} : memref<18x18x8xf32, #tpu.memory_space<vmem>>, vector<18x1x8xf32>,
    %c1 = arith.constant 1 : index
    %c1_20 = arith.constant 1 : index
    %c0_21 = arith.constant 0 : index
    %21 = vector.load %arg9[%c1, %c1_20, %c0_21] : memref<18x18x8xf32, #tpu.memory_space<vmem>>, vector<16x16x8xf32>
    tpu.vector_store %arg9[%c1, %c1_20, %c0_21], %14 {strides = array<i32>} : memref<18x18x8xf32, #tpu.memory_space<vmem>>, vector<16x16x8xf32>,
    %cst_22 = arith.constant 0.000000e+00 : f32
    %22 = vector.broadcast %cst_22 : f32 to vector<256x128xf32>
    %c0_23 = arith.constant 0 : index
    %c0_24 = arith.constant 0 : index
    %c0_25 = arith.constant 0 : index
    %23 = vector.load %arg9[%c0_23, %c0_24, %c0_25] : memref<18x18x8xf32, #tpu.memory_space<vmem>>, vector<16x16x8xf32>
    %24 = vector.shape_cast %23 : vector<16x16x8xf32> to vector<256x8xf32>
    %c0_26 = arith.constant 0 : index
    %c0_27 = arith.constant 0 : index
    %c0_28 = arith.constant 0 : index
    %25 = vector.load %arg2[%c0_26, %c0_27, %c0_28] : memref<9x8x128xf32, #tpu.memory_space<vmem>>, vector<1x8x128xf32>
    %26 = vector.shape_cast %25 : vector<1x8x128xf32> to vector<8x128xf32>
    %cst_29 = arith.constant dense<0.000000e+00> : vector<256x128xf32>
    %27 = tpu.matmul %24, %26, %cst_29 {dimension_numbers = #tpu.dot_dimension_numbers<[1], [0], [0], [1], [0, 0, 1, 1], [], []>} : vector<256x8xf32>, vector<8x128xf32>, vector<256x128xf32> -> vector<256x128xf32>
    %28 = arith.addf %22, %27 : vector<256x128xf32>
    %c0_30 = arith.constant 0 : index
    %c1_31 = arith.constant 1 : index
    %c0_32 = arith.constant 0 : index
    %29 = vector.load %arg9[%c0_30, %c1_31, %c0_32] : memref<18x18x8xf32, #tpu.memory_space<vmem>>, vector<16x16x8xf32>
    %30 = vector.shape_cast %29 : vector<16x16x8xf32> to vector<256x8xf32>
    %c1_33 = arith.constant 1 : index
    %c0_34 = arith.constant 0 : index
    %c0_35 = arith.constant 0 : index
    %31 = vector.load %arg2[%c1_33, %c0_34, %c0_35] : memref<9x8x128xf32, #tpu.memory_space<vmem>>, vector<1x8x128xf32>
    %32 = vector.shape_cast %31 : vector<1x8x128xf32> to vector<8x128xf32>
    %cst_36 = arith.constant dense<0.000000e+00> : vector<256x128xf32>
    %33 = tpu.matmul %30, %32, %cst_36 {dimension_numbers = #tpu.dot_dimension_numbers<[1], [0], [0], [1], [0, 0, 1, 1], [], []>} : vector<256x8xf32>, vector<8x128xf32>, vector<256x128xf32> -> vector<256x128xf32>
    %34 = arith.addf %28, %33 : vector<256x128xf32>
    %c0_37 = arith.constant 0 : index
    %c2 = arith.constant 2 : index
    %c0_38 = arith.constant 0 : index
    %35 = vector.load %arg9[%c0_37, %c2, %c0_38] : memref<18x18x8xf32, #tpu.memory_space<vmem>>, vector<16x16x8xf32>
    %36 = vector.shape_cast %35 : vector<16x16x8xf32> to vector<256x8xf32>
    %c2_39 = arith.constant 2 : index
    %c0_40 = arith.constant 0 : index
    %c0_41 = arith.constant 0 : index
    %37 = vector.load %arg2[%c2_39, %c0_40, %c0_41] : memref<9x8x128xf32, #tpu.memory_space<vmem>>, vector<1x8x128xf32>
    %38 = vector.shape_cast %37 : vector<1x8x128xf32> to vector<8x128xf32>
    %cst_42 = arith.constant dense<0.000000e+00> : vector<256x128xf32>
    %39 = tpu.matmul %36, %38, %cst_42 {dimension_numbers = #tpu.dot_dimension_numbers<[1], [0], [0], [1], [0, 0, 1, 1], [], []>} : vector<256x8xf32>, vector<8x128xf32>, vector<256x128xf32> -> vector<256x128xf32>
    %40 = arith.addf %34, %39 : vector<256x128xf32>
    %c1_43 = arith.constant 1 : index
    %c0_44 = arith.constant 0 : index
    %c0_45 = arith.constant 0 : index
    %41 = vector.load %arg9[%c1_43, %c0_44, %c0_45] : memref<18x18x8xf32, #tpu.memory_space<vmem>>, vector<16x16x8xf32>
    %42 = vector.shape_cast %41 : vector<16x16x8xf32> to vector<256x8xf32>
    %c3 = arith.constant 3 : index
    %c0_46 = arith.constant 0 : index
    %c0_47 = arith.constant 0 : index
    %43 = vector.load %arg2[%c3, %c0_46, %c0_47] : memref<9x8x128xf32, #tpu.memory_space<vmem>>, vector<1x8x128xf32>
    %44 = vector.shape_cast %43 : vector<1x8x128xf32> to vector<8x128xf32>
    %cst_48 = arith.constant dense<0.000000e+00> : vector<256x128xf32>
    %45 = tpu.matmul %42, %44, %cst_48 {dimension_numbers = #tpu.dot_dimension_numbers<[1], [0], [0], [1], [0, 0, 1, 1], [], []>} : vector<256x8xf32>, vector<8x128xf32>, vector<256x128xf32> -> vector<256x128xf32>
    %46 = arith.addf %40, %45 : vector<256x128xf32>
    %c1_49 = arith.constant 1 : index
    %c1_50 = arith.constant 1 : index
    %c0_51 = arith.constant 0 : index
    %47 = vector.load %arg9[%c1_49, %c1_50, %c0_51] : memref<18x18x8xf32, #tpu.memory_space<vmem>>, vector<16x16x8xf32>
    %48 = vector.shape_cast %47 : vector<16x16x8xf32> to vector<256x8xf32>
    %c4 = arith.constant 4 : index
    %c0_52 = arith.constant 0 : index
    %c0_53 = arith.constant 0 : index
    %49 = vector.load %arg2[%c4, %c0_52, %c0_53] : memref<9x8x128xf32, #tpu.memory_space<vmem>>, vector<1x8x128xf32>
    %50 = vector.shape_cast %49 : vector<1x8x128xf32> to vector<8x128xf32>
    %cst_54 = arith.constant dense<0.000000e+00> : vector<256x128xf32>
    %51 = tpu.matmul %48, %50, %cst_54 {dimension_numbers = #tpu.dot_dimension_numbers<[1], [0], [0], [1], [0, 0, 1, 1], [], []>} : vector<256x8xf32>, vector<8x128xf32>, vector<256x128xf32> -> vector<256x128xf32>
    %52 = arith.addf %46, %51 : vector<256x128xf32>
    %c1_55 = arith.constant 1 : index
    %c2_56 = arith.constant 2 : index
    %c0_57 = arith.constant 0 : index
    %53 = vector.load %arg9[%c1_55, %c2_56, %c0_57] : memref<18x18x8xf32, #tpu.memory_space<vmem>>, vector<16x16x8xf32>
    %54 = vector.shape_cast %53 : vector<16x16x8xf32> to vector<256x8xf32>
    %c5 = arith.constant 5 : index
    %c0_58 = arith.constant 0 : index
    %c0_59 = arith.constant 0 : index
    %55 = vector.load %arg2[%c5, %c0_58, %c0_59] : memref<9x8x128xf32, #tpu.memory_space<vmem>>, vector<1x8x128xf32>
    %56 = vector.shape_cast %55 : vector<1x8x128xf32> to vector<8x128xf32>
    %cst_60 = arith.constant dense<0.000000e+00> : vector<256x128xf32>
    %57 = tpu.matmul %54, %56, %cst_60 {dimension_numbers = #tpu.dot_dimension_numbers<[1], [0], [0], [1], [0, 0, 1, 1], [], []>} : vector<256x8xf32>, vector<8x128xf32>, vector<256x128xf32> -> vector<256x128xf32>
    %58 = arith.addf %52, %57 : vector<256x128xf32>
    %c2_61 = arith.constant 2 : index
    %c0_62 = arith.constant 0 : index
    %c0_63 = arith.constant 0 : index
    %59 = vector.load %arg9[%c2_61, %c0_62, %c0_63] : memref<18x18x8xf32, #tpu.memory_space<vmem>>, vector<16x16x8xf32>
    %60 = vector.shape_cast %59 : vector<16x16x8xf32> to vector<256x8xf32>
    %c6 = arith.constant 6 : index
    %c0_64 = arith.constant 0 : index
    %c0_65 = arith.constant 0 : index
    %61 = vector.load %arg2[%c6, %c0_64, %c0_65] : memref<9x8x128xf32, #tpu.memory_space<vmem>>, vector<1x8x128xf32>
    %62 = vector.shape_cast %61 : vector<1x8x128xf32> to vector<8x128xf32>
    %cst_66 = arith.constant dense<0.000000e+00> : vector<256x128xf32>
    %63 = tpu.matmul %60, %62, %cst_66 {dimension_numbers = #tpu.dot_dimension_numbers<[1], [0], [0], [1], [0, 0, 1, 1], [], []>} : vector<256x8xf32>, vector<8x128xf32>, vector<256x128xf32> -> vector<256x128xf32>
    %64 = arith.addf %58, %63 : vector<256x128xf32>
    %c2_67 = arith.constant 2 : index
    %c1_68 = arith.constant 1 : index
    %c0_69 = arith.constant 0 : index
    %65 = vector.load %arg9[%c2_67, %c1_68, %c0_69] : memref<18x18x8xf32, #tpu.memory_space<vmem>>, vector<16x16x8xf32>
    %66 = vector.shape_cast %65 : vector<16x16x8xf32> to vector<256x8xf32>
    %c7 = arith.constant 7 : index
    %c0_70 = arith.constant 0 : index
    %c0_71 = arith.constant 0 : index
    %67 = vector.load %arg2[%c7, %c0_70, %c0_71] : memref<9x8x128xf32, #tpu.memory_space<vmem>>, vector<1x8x128xf32>
    %68 = vector.shape_cast %67 : vector<1x8x128xf32> to vector<8x128xf32>
    %cst_72 = arith.constant dense<0.000000e+00> : vector<256x128xf32>
    %69 = tpu.matmul %66, %68, %cst_72 {dimension_numbers = #tpu.dot_dimension_numbers<[1], [0], [0], [1], [0, 0, 1, 1], [], []>} : vector<256x8xf32>, vector<8x128xf32>, vector<256x128xf32> -> vector<256x128xf32>
    %70 = arith.addf %64, %69 : vector<256x128xf32>
    %c2_73 = arith.constant 2 : index
    %c2_74 = arith.constant 2 : index
    %c0_75 = arith.constant 0 : index
    %71 = vector.load %arg9[%c2_73, %c2_74, %c0_75] : memref<18x18x8xf32, #tpu.memory_space<vmem>>, vector<16x16x8xf32>
    %72 = vector.shape_cast %71 : vector<16x16x8xf32> to vector<256x8xf32>
    %c8 = arith.constant 8 : index
    %c0_76 = arith.constant 0 : index
    %c0_77 = arith.constant 0 : index
    %73 = vector.load %arg2[%c8, %c0_76, %c0_77] : memref<9x8x128xf32, #tpu.memory_space<vmem>>, vector<1x8x128xf32>
    %74 = vector.shape_cast %73 : vector<1x8x128xf32> to vector<8x128xf32>
    %cst_78 = arith.constant dense<0.000000e+00> : vector<256x128xf32>
    %75 = tpu.matmul %72, %74, %cst_78 {dimension_numbers = #tpu.dot_dimension_numbers<[1], [0], [0], [1], [0, 0, 1, 1], [], []>} : vector<256x8xf32>, vector<8x128xf32>, vector<256x128xf32> -> vector<256x128xf32>
    %76 = arith.addf %70, %75 : vector<256x128xf32>
    %c0_79 = arith.constant 0 : index
    %c0_80 = arith.constant 0 : index
    %77 = vector.load %arg3[%c0_79, %c0_80] : memref<1x128xf32, #tpu.memory_space<vmem>>, vector<1x128xf32>
    %78 = vector.broadcast %77 : vector<1x128xf32> to vector<256x128xf32>
    %79 = arith.addf %76, %78 : vector<256x128xf32>
    %cst_81 = arith.constant dense<0.000000e+00> : vector<128xf32>
    %80 = vector.multi_reduction <add>, %79, %cst_81 [0] : vector<256x128xf32> to vector<128xf32>
    %81 = vector.shape_cast %80 : vector<128xf32> to vector<1x128xf32>
    %82 = vector.shape_cast %81 : vector<1x128xf32> to vector<1x1x128xf32>
    %c0_82 = arith.constant 0 : index
    %c0_83 = arith.constant 0 : index
    %c0_84 = arith.constant 0 : index
    %83 = vector.load %arg7[%c0_82, %c0_83, %c0_84] : memref<1x1x128xf32, #tpu.memory_space<vmem>>, vector<1x1x128xf32>
    tpu.vector_store %arg7[%c0_82, %c0_83, %c0_84], %82 {strides = array<i32>} : memref<1x1x128xf32, #tpu.memory_space<vmem>>, vector<1x1x128xf32>,
    %84 = arith.mulf %79, %79 : vector<256x128xf32>
    %cst_85 = arith.constant dense<0.000000e+00> : vector<128xf32>
    %85 = vector.multi_reduction <add>, %84, %cst_85 [0] : vector<256x128xf32> to vector<128xf32>
    %86 = vector.shape_cast %85 : vector<128xf32> to vector<1x128xf32>
    %87 = vector.shape_cast %86 : vector<1x128xf32> to vector<1x1x128xf32>
    %c0_86 = arith.constant 0 : index
    %c0_87 = arith.constant 0 : index
    %c0_88 = arith.constant 0 : index
    %88 = vector.load %arg8[%c0_86, %c0_87, %c0_88] : memref<1x1x128xf32, #tpu.memory_space<vmem>>, vector<1x1x128xf32>
    tpu.vector_store %arg8[%c0_86, %c0_87, %c0_88], %87 {strides = array<i32>} : memref<1x1x128xf32, #tpu.memory_space<vmem>>, vector<1x1x128xf32>,
    %89 = vector.shape_cast %79 : vector<256x128xf32> to vector<1x16x16x128xf32>
    %c0_89 = arith.constant 0 : index
    %c0_90 = arith.constant 0 : index
    %c0_91 = arith.constant 0 : index
    %c0_92 = arith.constant 0 : index
    %90 = vector.load %arg6[%c0_89, %c0_90, %c0_91, %c0_92] : memref<1x16x16x128xf32, #tpu.memory_space<vmem>>, vector<1x16x16x128xf32>
    tpu.vector_store %arg6[%c0_89, %c0_90, %c0_91, %c0_92], %89 {strides = array<i32>} : memref<1x16x16x128xf32, #tpu.memory_space<vmem>>, vector<1x16x16x128xf32>,
    return
  }
  func.func @transform_0(%arg0: i32) -> (i32, i32, i32, i32) {
    %c0_i32 = arith.constant 0 : i32
    %c0_i32_0 = arith.constant 0 : i32
    %c0_i32_1 = arith.constant 0 : i32
    %c0_i32_2 = arith.constant 0 : i32
    return %arg0, %c0_i32, %c0_i32_0, %c0_i32_1 : i32, i32, i32, i32
  }
  func.func @transform_1(%arg0: i32) -> (i32, i32, i32) {
    %c0_i32 = arith.constant 0 : i32
    %c0_i32_0 = arith.constant 0 : i32
    %c0_i32_1 = arith.constant 0 : i32
    %c0_i32_2 = arith.constant 0 : i32
    return %c0_i32, %c0_i32_0, %c0_i32_1 : i32, i32, i32
  }
  func.func @transform_2(%arg0: i32) -> (i32, i32) {
    %c0_i32 = arith.constant 0 : i32
    %c0_i32_0 = arith.constant 0 : i32
    %c0_i32_1 = arith.constant 0 : i32
    return %c0_i32, %c0_i32_0 : i32, i32
  }
  func.func @transform_3(%arg0: i32) -> (i32, i32) {
    %c0_i32 = arith.constant 0 : i32
    %c0_i32_0 = arith.constant 0 : i32
    %c0_i32_1 = arith.constant 0 : i32
    return %c0_i32, %c0_i32_0 : i32, i32
  }
  func.func @transform_4(%arg0: i32) -> (i32, i32) {
    %c0_i32 = arith.constant 0 : i32
    %c0_i32_0 = arith.constant 0 : i32
    %c0_i32_1 = arith.constant 0 : i32
    return %c0_i32, %c0_i32_0 : i32, i32
  }
  func.func @transform_5(%arg0: i32) -> (i32, i32, i32, i32) {
    %c0_i32 = arith.constant 0 : i32
    %c0_i32_0 = arith.constant 0 : i32
    %c0_i32_1 = arith.constant 0 : i32
    %c0_i32_2 = arith.constant 0 : i32
    return %arg0, %c0_i32, %c0_i32_0, %c0_i32_1 : i32, i32, i32, i32
  }
  func.func @transform_6(%arg0: i32) -> (i32, i32, i32) {
    %c0_i32 = arith.constant 0 : i32
    %c0_i32_0 = arith.constant 0 : i32
    %c0_i32_1 = arith.constant 0 : i32
    return %arg0, %c0_i32, %c0_i32_0 : i32, i32, i32
  }
  func.func @transform_7(%arg0: i32) -> (i32, i32, i32) {
    %c0_i32 = arith.constant 0 : i32
    %c0_i32_0 = arith.constant 0 : i32
    %c0_i32_1 = arith.constant 0 : i32
    return %arg0, %c0_i32, %c0_i32_0 : i32, i32, i32
  }
}

</mosaic_0001>

<bundles_post_ra>
// kernel: conv_block_forward.5
= control target key start
LH: loop header
LB: loop body
LE: loop exit
PB: predicated region body
PF: predicated region fallthrough
CT: control target
= control target key end

     0   :  { %s568_s12 = smov 0   ;;  %s570_s13 = smov 0   ;;  %s743_s0 = inlined_call_operand.vmem [shape: f32[2,16,16,128], index: 0, kind: input, shape index: {}]   ;;  %s744_s1 = inlined_call_operand.vmem [shape: f32[1,128], index: 1, kind: input, shape index: {}]   ;;  %s745_s2 = inlined_call_operand.vmem [shape: f32[1,128], index: 2, kind: input, shape index: {}]   ;;  %s746_s3 = inlined_call_operand.vmem [shape: f32[2,16,16,128], index: 3, kind: output, shape index: {}]  }
   0x1   :  { %s572_s14 = smov 0  }
   0x2 LB: > { %s25_s15 = sadd.s32 1, %s542_s13  ;;  %p489_p0 = scmp.ge.s32.totalorder %s546_s14, 1  ;;  %s546_s14 = sphi %s572_s14, %s13_s14   ;;  %s542_s13 = sphi %s570_s13, %s748_s13   ;;  %s538_s12 = sphi %s568_s12, %s747_s12  }
   0x3   : > { %p27_p1 = scmp.ge.s32.totalorder %s25_s15, 2  ;;  %p159_p2 = scmp.lt.s32.totalorder %s546_s14, 3 }
   0x5   : > { %s750_s15 = smov (%p27_p1, %s25_s15), 0  ;;  %p160_p3 = pnand %p489_p0, %p159_p2 }
   0x6   : > { %p194_p4 = scmp.lt.s32.totalorder (!%p160_p3), %s538_s12, 1 }
   0x7   : > { %163 = sbr.rel (%p160_p3) target bundleno = 45 (0x2d), region = 32 }
   0xc   : > { %s752_s12 = smov (!%p194_p4, %s538_s12), 1  ;;  %v589_v0 = vld [vmem:[%s744_s1] ss:$0 sm:$0xff] }
   0xd   : > { %s498_s16 = sshll.u32 %s752_s12, 8  ;;  %v599_v1 = vld [vmem:[%s745_s2] ss:$0 sm:$0xff] }
   0xe   : > { %s594_s21 = scalar_lea.vmem %s743_s0, %s498_s16  ;;  %s622_s26 = scalar_lea.vmem %s746_s3, %s498_s16 }
   0xf   : > { %v215_v2 = vld [vmem:[%s594_s21] sm:$0xff]  ;;  %v216_v3 = vld [vmem:[%s594_s21 + $0x8] sm:$0xff]  ;;  %v217_v4 = vld [vmem:[%s594_s21 + $0x10] sm:$0xff] }
  0x10   : > { %v255_v5 = vmul.f32 %v589_v0, %v215_v2  ;;  %v256_v6 = vmul.f32 %v589_v0, %v216_v3  ;;  %v257_v7 = vmul.f32 %v589_v0, %v217_v4  ;;  %v218_v8 = vld [vmem:[%s594_s21 + $0x18] sm:$0xff]  ;;  %v219_v9 = vld [vmem:[%s594_s21 + $0x20] sm:$0xff]  ;;  %v220_v10 = vld [vmem:[%s594_s21 + $0x28] sm:$0xff] }
  0x11   : > { %v258_v11 = vmul.f32 %v589_v0, %v218_v8  ;;  %v259_v12 = vmul.f32 %v589_v0, %v219_v9  ;;  %v260_v13 = vmul.f32 %v589_v0, %v220_v10  ;;  %v221_v14 = vld [vmem:[%s594_s21 + $0x30] sm:$0xff]  ;;  %v222_v15 = vld [vmem:[%s594_s21 + $0x38] sm:$0xff]  ;;  %v223_v24 = vld [vmem:[%s594_s21 + $0x40] sm:$0xff] }
  0x12   : > { %v293_v16 = vadd.f32 %v599_v1, %v255_v5  ;;  %v294_v17 = vadd.f32 %v599_v1, %v256_v6  ;;  %v295_v18 = vadd.f32 %v599_v1, %v257_v7  ;;  %v261_v19 = vmul.f32 %v589_v0, %v221_v14  ;;  %v224_v25 = vld [vmem:[%s594_s21 + $0x48] sm:$0xff]  ;;  %v225_v26 = vld [vmem:[%s594_s21 + $0x50] sm:$0xff]  ;;  %v226_v31 = vld [vmem:[%s594_s21 + $0x58] sm:$0xff] }
  0x13   : > { %v296_v20 = vadd.f32 %v599_v1, %v258_v11  ;;  %v297_v21 = vadd.f32 %v599_v1, %v259_v12  ;;  %v298_v22 = vadd.f32 %v599_v1, %v260_v13  ;;  %v262_v23 = vmul.f32 %v589_v0, %v222_v15  ;;  %v227_v32 = vld [vmem:[%s594_s21 + $0x60] sm:$0xff]  ;;  %v228_v33 = vld [vmem:[%s594_s21 + $0x68] sm:$0xff]  ;;  %v229_v38 = vld [vmem:[%s594_s21 + $0x70] sm:$0xff] }
  0x14   : > { %v325_v27 = vmax.f32 %v293_v16, 0.0  ;;  %v326_v28 = vmax.f32 %v294_v17, 0.0  ;;  %v327_v29 = vmax.f32 %v295_v18, 0.0  ;;  %v299_v30 = vadd.f32 %v599_v1, %v261_v19  ;;  %v230_v43 = vld [vmem:[%s594_s21 + $0x78] sm:$0xff]  ;;  %v231_v56 = vld [vmem:[%s594_s21 + $0x80] sm:$0xff]  ;;  %v232_v57 = vld [vmem:[%s594_s21 + $0x88] sm:$0xff] }
  0x15   : > { %v328_v34 = vmax.f32 %v296_v20, 0.0  ;;  %v329_v35 = vmax.f32 %v297_v21, 0.0  ;;  %v330_v36 = vmax.f32 %v298_v22, 0.0  ;;  %v300_v37 = vadd.f32 %v599_v1, %v262_v23  ;;  %v233_v58 = vld [vmem:[%s594_s21 + $0x90] sm:$0xff]  ;;  %v234_v63 = vld [vmem:[%s594_s21 + $0x98] sm:$0xff]  ;;  %v235_v2 = vld [vmem:[%s594_s21 + $0xa0] sm:$0xff] }
  0x16   : > { %357 = vst [vmem:[%s622_s26] sm:$0xff] %v325_v27  ;;  %358 = vst [vmem:[%s622_s26 + $0x8] sm:$0xff] %v326_v28  ;;  %v331_v39 = vmax.f32 %v299_v30, 0.0  ;;  %v263_v40 = vmul.f32 %v589_v0, %v223_v24  ;;  %v264_v41 = vmul.f32 %v589_v0, %v224_v25  ;;  %v265_v42 = vmul.f32 %v589_v0, %v225_v26  ;;  %v236_v3 = vld [vmem:[%s594_s21 + $0xa8] sm:$0xff]  ;;  %v237_v8 = vld [vmem:[%s594_s21 + $0xb0] sm:$0xff] }
  0x17   : > { %359 = vst [vmem:[%s622_s26 + $0x10] sm:$0xff] %v327_v29  ;;  %360 = vst [vmem:[%s622_s26 + $0x18] sm:$0xff] %v328_v34  ;;  %v332_v44 = vmax.f32 %v300_v37, 0.0  ;;  %v266_v45 = vmul.f32 %v589_v0, %v226_v31  ;;  %v267_v46 = vmul.f32 %v589_v0, %v227_v32  ;;  %v268_v47 = vmul.f32 %v589_v0, %v228_v33  ;;  %v238_v13 = vld [vmem:[%s594_s21 + $0xb8] sm:$0xff]  ;;  %v239_v26 = vld [vmem:[%s594_s21 + $0xc0] sm:$0xff] }
  0x18   : > { %361 = vst [vmem:[%s622_s26 + $0x20] sm:$0xff] %v329_v35  ;;  %362 = vst [vmem:[%s622_s26 + $0x28] sm:$0xff] %v330_v36  ;;  %v301_v48 = vadd.f32 %v599_v1, %v263_v40  ;;  %v302_v49 = vadd.f32 %v599_v1, %v264_v41  ;;  %v303_v50 = vadd.f32 %v599_v1, %v265_v42  ;;  %v240_v27 = vld [vmem:[%s594_s21 + $0xc8] sm:$0xff]  ;;  %v241_v28 = vld [vmem:[%s594_s21 + $0xd0] sm:$0xff] }
  0x19   : > { %363 = vst [vmem:[%s622_s26 + $0x30] sm:$0xff] %v331_v39  ;;  %v269_v51 = vmul.f32 %v589_v0, %v229_v38  ;;  %364 = vst [vmem:[%s622_s26 + $0x38] sm:$0xff] %v332_v44  ;;  %v304_v52 = vadd.f32 %v599_v1, %v266_v45  ;;  %v305_v53 = vadd.f32 %v599_v1, %v267_v46  ;;  %v242_v33 = vld [vmem:[%s594_s21 + $0xd8] sm:$0xff]  ;;  %v243_v34 = vld [vmem:[%s594_s21 + $0xe0] sm:$0xff] }
  0x1a   : > { %v306_v54 = vadd.f32 %v599_v1, %v268_v47  ;;  %v270_v55 = vmul.f32 %v589_v0, %v230_v43  ;;  %v333_v59 = vmax.f32 %v301_v48, 0.0  ;;  %v334_v60 = vmax.f32 %v302_v49, 0.0  ;;  %v244_v35 = vld [vmem:[%s594_s21 + $0xe8] sm:$0xff]  ;;  %v245_v40 = vld [vmem:[%s594_s21 + $0xf0] sm:$0xff]  ;;  %v246_v45 = vld [vmem:[%s594_s21 + $0xf8] sm:$0xff] }
  0x1b   : > { %v335_v61 = vmax.f32 %v303_v50, 0.0  ;;  %v307_v62 = vadd.f32 %v599_v1, %v269_v51  ;;  %v336_v4 = vmax.f32 %v304_v52, 0.0  ;;  %v337_v5 = vmax.f32 %v305_v53, 0.0 }
  0x1c   : > { %v338_v6 = vmax.f32 %v306_v54, 0.0  ;;  %v308_v7 = vadd.f32 %v599_v1, %v270_v55  ;;  %365 = vst [vmem:[%s622_s26 + $0x40] sm:$0xff] %v333_v59  ;;  %366 = vst [vmem:[%s622_s26 + $0x48] sm:$0xff] %v334_v60  ;;  %v271_v10 = vmul.f32 %v589_v0, %v231_v56  ;;  %v272_v11 = vmul.f32 %v589_v0, %v232_v57 }
  0x1d   : > { %367 = vst [vmem:[%s622_s26 + $0x50] sm:$0xff] %v335_v61  ;;  %v339_v9 = vmax.f32 %v307_v62, 0.0  ;;  %v273_v12 = vmul.f32 %v589_v0, %v233_v58  ;;  %368 = vst [vmem:[%s622_s26 + $0x58] sm:$0xff] %v336_v4  ;;  %v274_v15 = vmul.f32 %v589_v0, %v234_v63  ;;  %v275_v16 = vmul.f32 %v589_v0, %v235_v2 }
  0x1e   : > { %369 = vst [vmem:[%s622_s26 + $0x60] sm:$0xff] %v337_v5  ;;  %370 = vst [vmem:[%s622_s26 + $0x68] sm:$0xff] %v338_v6  ;;  %v340_v14 = vmax.f32 %v308_v7, 0.0  ;;  %v276_v17 = vmul.f32 %v589_v0, %v236_v3  ;;  %v309_v18 = vadd.f32 %v599_v1, %v271_v10  ;;  %v310_v19 = vadd.f32 %v599_v1, %v272_v11 }
  0x1f   : > { %371 = vst [vmem:[%s622_s26 + $0x70] sm:$0xff] %v339_v9  ;;  %v311_v20 = vadd.f32 %v599_v1, %v273_v12  ;;  %v277_v21 = vmul.f32 %v589_v0, %v237_v8  ;;  %v312_v22 = vadd.f32 %v599_v1, %v274_v15  ;;  %v313_v23 = vadd.f32 %v599_v1, %v275_v16 }
  0x20   : > { %372 = vst [vmem:[%s622_s26 + $0x78] sm:$0xff] %v340_v14  ;;  %v314_v24 = vadd.f32 %v599_v1, %v276_v17  ;;  %v278_v25 = vmul.f32 %v589_v0, %v238_v13  ;;  %v341_v29 = vmax.f32 %v309_v18, 0.0  ;;  %v342_v30 = vmax.f32 %v310_v19, 0.0 }
  0x21   : > { %v343_v31 = vmax.f32 %v311_v20, 0.0  ;;  %v315_v32 = vadd.f32 %v599_v1, %v277_v21  ;;  %v344_v36 = vmax.f32 %v312_v22, 0.0  ;;  %v345_v37 = vmax.f32 %v313_v23, 0.0 }
  0x22   : > { %v346_v38 = vmax.f32 %v314_v24, 0.0  ;;  %v316_v39 = vadd.f32 %v599_v1, %v278_v25  ;;  %373 = vst [vmem:[%s622_s26 + $0x80] sm:$0xff] %v341_v29  ;;  %374 = vst [vmem:[%s622_s26 + $0x88] sm:$0xff] %v342_v30  ;;  %v279_v42 = vmul.f32 %v589_v0, %v239_v26  ;;  %v280_v43 = vmul.f32 %v589_v0, %v240_v27 }
  0x23   : > { %375 = vst [vmem:[%s622_s26 + $0x90] sm:$0xff] %v343_v31  ;;  %v347_v41 = vmax.f32 %v315_v32, 0.0  ;;  %v281_v44 = vmul.f32 %v589_v0, %v241_v28  ;;  %376 = vst [vmem:[%s622_s26 + $0x98] sm:$0xff] %v344_v36  ;;  %v282_v47 = vmul.f32 %v589_v0, %v242_v33  ;;  %v283_v48 = vmul.f32 %v589_v0, %v243_v34 }
  0x24   : > { %377 = vst [vmem:[%s622_s26 + $0xa0] sm:$0xff] %v345_v37  ;;  %378 = vst [vmem:[%s622_s26 + $0xa8] sm:$0xff] %v346_v38  ;;  %v348_v46 = vmax.f32 %v316_v39, 0.0  ;;  %v284_v49 = vmul.f32 %v589_v0, %v244_v35  ;;  %v317_v50 = vadd.f32 %v599_v1, %v279_v42  ;;  %v318_v51 = vadd.f32 %v599_v1, %v280_v43 }
  0x25   : > { %379 = vst [vmem:[%s622_s26 + $0xb0] sm:$0xff] %v347_v41  ;;  %v319_v52 = vadd.f32 %v599_v1, %v281_v44  ;;  %v285_v53 = vmul.f32 %v589_v0, %v245_v40  ;;  %v320_v54 = vadd.f32 %v599_v1, %v282_v47  ;;  %v321_v55 = vadd.f32 %v599_v1, %v283_v48 }
  0x26   : > { %380 = vst [vmem:[%s622_s26 + $0xb8] sm:$0xff] %v348_v46  ;;  %v322_v56 = vadd.f32 %v599_v1, %v284_v49  ;;  %v286_v57 = vmul.f32 %v589_v0, %v246_v45  ;;  %v349_v58 = vmax.f32 %v317_v50, 0.0  ;;  %v350_v59 = vmax.f32 %v318_v51, 0.0 }
  0x27   : > { %v351_v60 = vmax.f32 %v319_v52, 0.0  ;;  %v323_v61 = vadd.f32 %v599_v1, %v285_v53  ;;  %v352_v62 = vmax.f32 %v320_v54, 0.0  ;;  %v353_v63 = vmax.f32 %v321_v55, 0.0 }
  0x28   : > { %v354_v2 = vmax.f32 %v322_v56, 0.0  ;;  %v324_v3 = vadd.f32 %v599_v1, %v286_v57  ;;  %381 = vst [vmem:[%s622_s26 + $0xc0] sm:$0xff] %v349_v58  ;;  %382 = vst [vmem:[%s622_s26 + $0xc8] sm:$0xff] %v350_v59 }
  0x29   : > { %383 = vst [vmem:[%s622_s26 + $0xd0] sm:$0xff] %v351_v60  ;;  %v355_v4 = vmax.f32 %v323_v61, 0.0  ;;  %384 = vst [vmem:[%s622_s26 + $0xd8] sm:$0xff] %v352_v62 }
  0x2a   : > { %385 = vst [vmem:[%s622_s26 + $0xe0] sm:$0xff] %v353_v63  ;;  %386 = vst [vmem:[%s622_s26 + $0xe8] sm:$0xff] %v354_v2  ;;  %v356_v0 = vmax.f32 %v324_v3, 0.0 }
  0x2b   : > { %387 = vst [vmem:[%s622_s26 + $0xf0] sm:$0xff] %v355_v4 }
  0x2c   : > { %388 = vst [vmem:[%s622_s26 + $0xf8] sm:$0xff] %v356_v0 }
  0x2d PF: > { %s13_s14 = sadd.s32 1, %s546_s14   ;;  %s747_s12 = smov %s542_s13 }
  0x2e   : > { %p10_p5 = scmp.ge.s32.totalorder %s13_s14, 4   ;;  %s748_s13 = smov %s750_s15 }
  0x30   :  { %12 = sbr.rel (!%p10_p5) target bundleno = 2 (0x2), region = 62 }

// kernel: conv_block_forward.3
= control target key start
LH: loop header
LB: loop body
LE: loop exit
PB: predicated region body
PF: predicated region fallthrough
CT: control target
= control target key end

     0   :  { %s5200_s18 = smov 0   ;;  %s6693_s0 = inlined_call_operand.vmem [shape: f32[2,16,16,4], index: 0, kind: input, shape index: {}]   ;;  %s6694_s1 = inlined_call_operand.vmem [shape: f32[9,4,128], index: 1, kind: input, shape index: {}]   ;;  %s6695_s2 = inlined_call_operand.vmem [shape: f32[1,128], index: 2, kind: input, shape index: {}]   ;;  %s6696_s3 = inlined_call_operand.vmem [shape: f32[2,16,16,128], index: 3, kind: output, shape index: {0}]   ;;  %s6697_s4 = inlined_call_operand.vmem [shape: f32[2,1,128], index: 4, kind: output, shape index: {1}]   ;;  %s6698_s5 = inlined_call_operand.vmem [shape: f32[2,1,128], index: 5, kind: output, shape index: {2}]  }
   0x1 LB: > { %s4084_s19 = sadd.s32 4294967295, %s5167_s18   ;;  %p4088_p0 = scmp.ge.s32.totalorder %s5167_s18, 1  ;;  %s5167_s18 = sphi %s5200_s18, %s16_s18  }
   0x2   : > { %p192_p1 = scmp.lt.s32.totalorder %s5167_s18, 3 }
   0x4   : > { %p193_p2 = pnand %p4088_p0, %p192_p1 }
   0x6   : > { %196 = sbr.rel (%p193_p2) target bundleno = 547 (0x223), region = 32 }
   0xb   : > { %v4093_v0 = vld [vmem:[%s6694_s1 + $0x4] sm:$0xf]  ;;  %vm516_vm0 = vcmask 1043456   ;;  %vm274_vm1 = vcmask 31744   ;;  %p5211_p3 = scmp.lt.s32.totalorder %s4084_s19, 1  ;;  %v5169_v1 = vmov 0.0  }
   0xc   : > { %5150 = vmatprep.subr.msk.mxu1 %vm516_vm0, %v4093_v0  ;;  %4700 = vmatprep.subr.msk.mxu0 %vm516_vm0, %v4093_v0  ;;  %275 = vst.msk [vmem:[#allocation2] sm:$0xff] %vm274_vm1, %v5169_v1  ;;  %276 = vst.msk [vmem:[#allocation2 + $0x8] sm:$0xff] %vm274_vm1, %v5169_v1  ;;  %v5224_v2 = vld [vmem:[%s6694_s1] sm:$0xf]  ;;  %vm277_vm2 = vcmask 25600   ;;  %vm283_vm3 = vcmask 24576  }
   0xd   : > { %280 = vst.msk [vmem:[#allocation2 + $0x198] sm:$0xff] %vm274_vm1, %v5169_v1  ;;  %281 = vst.msk [vmem:[#allocation2 + $0x1a0] sm:$0xff] %vm274_vm1, %v5169_v1  ;;  %v5229_v3 = vld [vmem:[%s6694_s1 + $0x8] sm:$0xf]  ;;  %5151 = vmatpush3.msk.msra.mxu1 %vm516_vm0, %v4093_v0  ;;  %4701 = vmatpush3.msk.msra.mxu0 %vm516_vm0, %v4093_v0  ;;  %s6917_s19 = smov (!%p5211_p3, %s4084_s19), 1 }
   0xe   : > { %278 = vst.msk [vmem:[#allocation2 + $0x10] sm:$0x3] %vm277_vm2, %v5169_v1  ;;  %282 = vst.msk [vmem:[#allocation2 + $0x1a8] sm:$0x3] %vm277_vm2, %v5169_v1  ;;  %4750 = vmatprep.subr.msk.mxu1 %vm516_vm0, %v5224_v2  ;;  %4800 = vmatprep.subr.msk.mxu0 %vm516_vm0, %v5229_v3  ;;  %s4401_s27 = sshll.u32 %s6917_s19, 8 }
   0xf   : > { %284 = vst.msk [vmem:[#allocation2] sm:$0x1] %vm283_vm3, %v5169_v1  ;;  %285 = vst.msk [vmem:[#allocation2 + $0x18] sm:$0x1] %vm283_vm3, %v5169_v1  ;;  %s5283_s30 = scalar_lea.vmem %s6693_s0, %s4401_s27  ;;  %v5297_v10 = vld [vmem:[%s6694_s1 + $0x10] sm:$0xf]  ;;  %s6535_s24 = scalar_lea.vmem %s6696_s3, %s4401_s27 }
  0x10   : > { %286 = vst.msk [vmem:[#allocation2 + $0x30] sm:$0x1] %vm283_vm3, %v5169_v1  ;;  %287 = vst.msk [vmem:[#allocation2 + $0x48] sm:$0x1] %vm283_vm3, %v5169_v1  ;;  %v256_v4 = vld [vmem:[%s5283_s30 + $0x70] sm:$0xff]  ;;  %v257_v5 = vld [vmem:[%s5283_s30 + $0x78] sm:$0xff]  ;;  %s238_s27 = scalar_lea.vmem %s6697_s4, %s6917_s19 }
  0x11   : > { %288 = vst.msk [vmem:[#allocation2 + $0x60] sm:$0x1] %vm283_vm3, %v5169_v1  ;;  %289 = vst.msk [vmem:[#allocation2 + $0x78] sm:$0x1] %vm283_vm3, %v5169_v1  ;;  %v242_v6 = vld [vmem:[%s5283_s30] sm:$0xff]  ;;  %v243_v8 = vld [vmem:[%s5283_s30 + $0x8] sm:$0xff] }
  0x12   : > { %290 = vst.msk [vmem:[#allocation2 + $0x90] sm:$0x1] %vm283_vm3, %v5169_v1  ;;  %291 = vst.msk [vmem:[#allocation2 + $0xa8] sm:$0x1] %vm283_vm3, %v5169_v1  ;;  %v258_v7 = vld [vmem:[%s5283_s30 + $0x80] sm:$0xff]  ;;  %v259_v9 = vld [vmem:[%s5283_s30 + $0x88] sm:$0xff] }
  0x13   : > { %292 = vst.msk [vmem:[#allocation2 + $0xc0] sm:$0x1] %vm283_vm3, %v5169_v1  ;;  %293 = vst.msk [vmem:[#allocation2 + $0xd8] sm:$0x1] %vm283_vm3, %v5169_v1  ;;  %v386_v11 = vld [vmem:[#allocation2 + $0x1] sm:$0xff]  ;;  %v244_v12 = vld [vmem:[%s5283_s30 + $0x10] sm:$0xff] }
  0x14   : > { %294 = vst.msk [vmem:[#allocation2 + $0xf0] sm:$0x1] %vm283_vm3, %v5169_v1  ;;  %295 = vst.msk [vmem:[#allocation2 + $0x108] sm:$0x1] %vm283_vm3, %v5169_v1  ;;  %v260_v13 = vld [vmem:[%s5283_s30 + $0x90] sm:$0xff]  ;;  %4702 = vmatprep.mubr.msk.f32.mxu0 %vm274_vm1, %v386_v11  ;;  %v245_v15 = vld [vmem:[%s5283_s30 + $0x18] sm:$0xff] }
  0x15   : > { %296 = vst.msk [vmem:[#allocation2 + $0x120] sm:$0x1] %vm283_vm3, %v5169_v1  ;;  %297 = vst.msk [vmem:[#allocation2 + $0x138] sm:$0x1] %vm283_vm3, %v5169_v1  ;;  %v387_v14 = vld [vmem:[#allocation2 + $0x9] sm:$0xff]  ;;  %v261_v16 = vld [vmem:[%s5283_s30 + $0x98] sm:$0xff] }
  0x16   : > { %298 = vst.msk [vmem:[#allocation2 + $0x150] sm:$0x1] %vm283_vm3, %v5169_v1  ;;  %299 = vst.msk [vmem:[#allocation2 + $0x168] sm:$0x1] %vm283_vm3, %v5169_v1  ;;  %4703 = vmatmul.mubr.msk.f32.vlgmr.msra.gmra.mxu0 %vm274_vm1, %v387_v14  ;;  %v246_v17 = vld [vmem:[%s5283_s30 + $0x20] sm:$0xff]  ;;  %v247_v19 = vld [vmem:[%s5283_s30 + $0x28] sm:$0xff] }
  0x17   : > { %300 = vst.msk [vmem:[#allocation2 + $0x180] sm:$0x1] %vm283_vm3, %v5169_v1  ;;  %301 = vst.msk [vmem:[#allocation2 + $0x198] sm:$0x1] %vm283_vm3, %v5169_v1  ;;  %v262_v18 = vld [vmem:[%s5283_s30 + $0xa0] sm:$0xff]  ;;  %4801 = vmatpush3.msk.msra.mxu0 %vm516_vm0, %v5229_v3  ;;  %v263_v20 = vld [vmem:[%s5283_s30 + $0xa8] sm:$0xff] }
  0x18   : > { %303 = vst.msk [vmem:[#allocation2 + $0x29] sm:$0x1] %vm283_vm3, %v5169_v1  ;;  %304 = vst.msk [vmem:[#allocation2 + $0x41] sm:$0x1] %vm283_vm3, %v5169_v1  ;;  %v248_v21 = vld [vmem:[%s5283_s30 + $0x30] sm:$0xff]  ;;  %v249_v23 = vld [vmem:[%s5283_s30 + $0x38] sm:$0xff]  ;;  %4900 = vmatprep.subr.msk.mxu0 %vm516_vm0, %v5297_v10 }
  0x19   : > { %305 = vst.msk [vmem:[#allocation2 + $0x59] sm:$0x1] %vm283_vm3, %v5169_v1  ;;  %306 = vst.msk [vmem:[#allocation2 + $0x71] sm:$0x1] %vm283_vm3, %v5169_v1  ;;  %v264_v22 = vld [vmem:[%s5283_s30 + $0xb0] sm:$0xff]  ;;  %v265_v24 = vld [vmem:[%s5283_s30 + $0xb8] sm:$0xff] }
  0x1a   : > { %307 = vst.msk [vmem:[#allocation2 + $0x89] sm:$0x1] %vm283_vm3, %v5169_v1  ;;  %308 = vst.msk [vmem:[#allocation2 + $0xa1] sm:$0x1] %vm283_vm3, %v5169_v1  ;;  %v250_v25 = vld [vmem:[%s5283_s30 + $0x40] sm:$0xff]  ;;  %v251_v27 = vld [vmem:[%s5283_s30 + $0x48] sm:$0xff] }
  0x1b   : > { %309 = vst.msk [vmem:[#allocation2 + $0xb9] sm:$0x1] %vm283_vm3, %v5169_v1  ;;  %310 = vst.msk [vmem:[#allocation2 + $0xd1] sm:$0x1] %vm283_vm3, %v5169_v1  ;;  %v266_v26 = vld [vmem:[%s5283_s30 + $0xc0] sm:$0xff]  ;;  %v267_v28 = vld [vmem:[%s5283_s30 + $0xc8] sm:$0xff] }
  0x1c   : > { %311 = vst.msk [vmem:[#allocation2 + $0xe9] sm:$0x1] %vm283_vm3, %v5169_v1  ;;  %312 = vst.msk [vmem:[#allocation2 + $0x101] sm:$0x1] %vm283_vm3, %v5169_v1  ;;  %v5357_v34 = vld [vmem:[%s6694_s1 + $0xc] sm:$0xf] }
  0x1d   : > { %313 = vst.msk [vmem:[#allocation2 + $0x119] sm:$0x1] %vm283_vm3, %v5169_v1  ;;  %314 = vst.msk [vmem:[#allocation2 + $0x131] sm:$0x1] %vm283_vm3, %v5169_v1  ;;  %v252_v36 = vld [vmem:[%s5283_s30 + $0x50] sm:$0xff]  ;;  %v253_v46 = vld [vmem:[%s5283_s30 + $0x58] sm:$0xff] }
  0x1e   : > { %315 = vst.msk [vmem:[#allocation2 + $0x149] sm:$0x1] %vm283_vm3, %v5169_v1  ;;  %316 = vst.msk [vmem:[#allocation2 + $0x161] sm:$0x1] %vm283_vm3, %v5169_v1  ;;  %v268_v39 = vld [vmem:[%s5283_s30 + $0xd0] sm:$0xff]  ;;  %v269_v47 = vld [vmem:[%s5283_s30 + $0xd8] sm:$0xff] }
  0x1f   : > { %317 = vst.msk [vmem:[#allocation2 + $0x179] sm:$0x1] %vm283_vm3, %v5169_v1  ;;  %318 = vst.msk [vmem:[#allocation2 + $0x191] sm:$0x1] %vm283_vm3, %v5169_v1  ;;  %v254_v48 = vld [vmem:[%s5283_s30 + $0x60] sm:$0xff]  ;;  %v255_v50 = vld [vmem:[%s5283_s30 + $0x68] sm:$0xff] }
  0x20   : > { %302 = vst.msk [vmem:[#allocation2 + $0x11] sm:$0x1] %vm283_vm3, %v5169_v1  ;;  %319 = vst.msk [vmem:[#allocation2 + $0x1a9] sm:$0x1] %vm283_vm3, %v5169_v1  ;;  %v270_v49 = vld [vmem:[%s5283_s30 + $0xe0] sm:$0xff]  ;;  %v271_v51 = vld [vmem:[%s5283_s30 + $0xe8] sm:$0xff] }
  0x21   : > { %335 = vst.msk [vmem:[#allocation2 + $0xc1] sm:$0xff] %vm274_vm1, %v256_v4  ;;  %336 = vst.msk [vmem:[#allocation2 + $0xc9] sm:$0xff] %vm274_vm1, %v257_v5  ;;  %v1069_v3 = vld [vmem:[#allocation2 + $0x2] sm:$0xff]  ;;  %v5510_v14 = vld [vmem:[%s6694_s1 + $0x14] sm:$0xf] }
  0x22   : > { %321 = vst.msk [vmem:[#allocation2 + $0x19] sm:$0xff] %vm274_vm1, %v242_v6  ;;  %337 = vst.msk [vmem:[#allocation2 + $0xd9] sm:$0xff] %vm274_vm1, %v258_v7  ;;  %v353_v6 = vld [vmem:[#allocation2] sm:$0xff] }
  0x23   : > { %322 = vst.msk [vmem:[#allocation2 + $0x21] sm:$0xff] %vm274_vm1, %v243_v8  ;;  %338 = vst.msk [vmem:[#allocation2 + $0xe1] sm:$0xff] %vm274_vm1, %v259_v9  ;;  %v5489_v8 = vld [vmem:[%s6694_s1 + $0x18] sm:$0xf]  ;;  %v354_v9 = vld [vmem:[#allocation2 + $0x8] sm:$0xff] }
  0x24   : > { %323 = vst.msk [vmem:[#allocation2 + $0x31] sm:$0xff] %vm274_vm1, %v244_v12  ;;  %339 = vst.msk [vmem:[#allocation2 + $0xf1] sm:$0xff] %vm274_vm1, %v260_v13 }
  0x25   : > { %324 = vst.msk [vmem:[#allocation2 + $0x39] sm:$0xff] %vm274_vm1, %v245_v15  ;;  %340 = vst.msk [vmem:[#allocation2 + $0xf9] sm:$0xff] %vm274_vm1, %v261_v16  ;;  %v273_v15 = vld [vmem:[%s5283_s30 + $0xf8] sm:$0xff] }
  0x26   : > { %325 = vst.msk [vmem:[#allocation2 + $0x49] sm:$0xff] %vm274_vm1, %v246_v17  ;;  %341 = vst.msk [vmem:[#allocation2 + $0x109] sm:$0xff] %vm274_vm1, %v262_v18 }
  0x27   : > { %326 = vst.msk [vmem:[#allocation2 + $0x51] sm:$0xff] %vm274_vm1, %v247_v19  ;;  %342 = vst.msk [vmem:[#allocation2 + $0x111] sm:$0xff] %vm274_vm1, %v263_v20  ;;  %v1070_v5 = vld [vmem:[#allocation2 + $0xa] sm:$0xff] }
  0x28   : > { %327 = vst.msk [vmem:[#allocation2 + $0x61] sm:$0xff] %vm274_vm1, %v248_v21  ;;  %343 = vst.msk [vmem:[#allocation2 + $0x121] sm:$0xff] %vm274_vm1, %v264_v22  ;;  %v5337_v29 = vld [vmem:[#allocation2 + $0xc1] sm:$0xff]  ;;  %v5339_v30 = vld [vmem:[#allocation2 + $0xc9] sm:$0xff] }
  0x29   : > { %328 = vst.msk [vmem:[#allocation2 + $0x69] sm:$0xff] %vm274_vm1, %v249_v23  ;;  %344 = vst.msk [vmem:[#allocation2 + $0x129] sm:$0xff] %vm274_vm1, %v265_v24  ;;  %v5341_v31 = vld [vmem:[#allocation2 + $0x19] sm:$0xff]  ;;  %4726 = vmatprep.mubr.msk.f32.mxu1 %vm274_vm1, %v5337_v29 }
  0x2a   : > { %329 = vst.msk [vmem:[#allocation2 + $0x79] sm:$0xff] %vm274_vm1, %v250_v25  ;;  %345 = vst.msk [vmem:[#allocation2 + $0x139] sm:$0xff] %vm274_vm1, %v266_v26  ;;  %4705 = vmatprep.mubr.msk.f32.mxu0 %vm274_vm1, %v5341_v31  ;;  %v5350_v32 = vld [vmem:[#allocation2 + $0xd9] sm:$0xff]  ;;  %v5352_v33 = vld [vmem:[#allocation2 + $0x21] sm:$0xff]  ;;  %4727 = vmatmul.mubr.msk.f32.vlgmr.msra.gmra.mxu1 %vm274_vm1, %v5339_v30 }
  0x2b   : > { %330 = vst.msk [vmem:[#allocation2 + $0x81] sm:$0xff] %vm274_vm1, %v251_v27  ;;  %346 = vst.msk [vmem:[#allocation2 + $0x141] sm:$0xff] %vm274_vm1, %v267_v28  ;;  %4706 = vmatmul.mubr.msk.f32.gmra.mxu0 %vm274_vm1, %v5352_v33  ;;  %v5363_v35 = vld [vmem:[#allocation2 + $0x31] sm:$0xff]  ;;  %4751 = vmatpush3.msk.msra.mxu1 %vm516_vm0, %v5224_v2  ;;  %v5370_v37 = vld [vmem:[#allocation2 + $0xe1] sm:$0xff] }
  0x2c   : > { %4729 = vmatprep.mubr.msk.f32.mxu1 %vm274_vm1, %v5350_v32  ;;  %v5372_v38 = vld [vmem:[#allocation2 + $0x39] sm:$0xff]  ;;  %331 = vst.msk [vmem:[#allocation2 + $0x91] sm:$0xff] %vm274_vm1, %v252_v36  ;;  %4708 = vmatprep.mubr.msk.f32.mxu0 %vm274_vm1, %v5363_v35  ;;  %v5378_v40 = vld [vmem:[#allocation2 + $0xf1] sm:$0xff]  ;;  %347 = vst.msk [vmem:[#allocation2 + $0x151] sm:$0xff] %vm274_vm1, %v268_v39 }
  0x2d   : > { %v5380_v41 = vld [vmem:[#allocation2 + $0x49] sm:$0xff]  ;;  %4850 = vmatprep.subr.msk.mxu1 %vm516_vm0, %v5357_v34  ;;  %v5389_v42 = vld [vmem:[#allocation2 + $0xf9] sm:$0xff]  ;;  %332 = vst.msk [vmem:[#allocation2 + $0x99] sm:$0xff] %vm274_vm1, %v253_v46  ;;  %348 = vst.msk [vmem:[#allocation2 + $0x159] sm:$0xff] %vm274_vm1, %v269_v47 }
  0x2e   : > { %4730 = vmatmul.mubr.msk.f32.gmra.mxu1 %vm274_vm1, %v5370_v37  ;;  %v5395_v43 = vld [vmem:[#allocation2 + $0x109] sm:$0xff]  ;;  %v5397_v44 = vld [vmem:[#allocation2 + $0x51] sm:$0xff]  ;;  %333 = vst.msk [vmem:[#allocation2 + $0xa9] sm:$0xff] %vm274_vm1, %v254_v48  ;;  %349 = vst.msk [vmem:[#allocation2 + $0x169] sm:$0xff] %vm274_vm1, %v270_v49 }
  0x2f   : > { %4709 = vmatmul.mubr.msk.f32.gmra.mxu0 %vm274_vm1, %v5372_v38  ;;  %4732 = vmatprep.mubr.msk.f32.mxu1 %vm274_vm1, %v5378_v40  ;;  %v5399_v45 = vld [vmem:[#allocation2 + $0x61] sm:$0xff]  ;;  %334 = vst.msk [vmem:[#allocation2 + $0xb1] sm:$0xff] %vm274_vm1, %v255_v50  ;;  %350 = vst.msk [vmem:[#allocation2 + $0x171] sm:$0xff] %vm274_vm1, %v271_v51  ;;  %v5419_v52 = vld [vmem:[#allocation2 + $0x111] sm:$0xff] }
  0x30   : > { %4711 = vmatprep.mubr.msk.f32.mxu0 %vm274_vm1, %v5380_v41  ;;  %v5423_v53 = vld [vmem:[#allocation2 + $0x69] sm:$0xff]  ;;  %v5425_v54 = vld [vmem:[#allocation2 + $0x121] sm:$0xff]  ;;  %v5499_v12 = vld [vmem:[#allocation2 + $0x18] sm:$0xff]  ;;  %352 = vst.msk [vmem:[#allocation2 + $0x189] sm:$0xff] %vm274_vm1, %v273_v15 }
  0x31   : > { %v5427_v55 = vld [vmem:[#allocation2 + $0x79] sm:$0xff]  ;;  %v5435_v56 = vld [vmem:[#allocation2 + $0x129] sm:$0xff] }
  0x32   : > { %4733 = vmatmul.mubr.msk.f32.gmra.mxu1 %vm274_vm1, %v5389_v42  ;;  %v5439_v57 = vld [vmem:[#allocation2 + $0x81] sm:$0xff]  ;;  %v5441_v58 = vld [vmem:[#allocation2 + $0x139] sm:$0xff]  ;;  %v5527_v18 = vld [vmem:[#allocation2 + $0x30] sm:$0xff] }
  0x33   : > { %4712 = vmatmul.mubr.msk.f32.gmra.mxu0 %vm274_vm1, %v5397_v44  ;;  %4735 = vmatprep.mubr.msk.f32.mxu1 %vm274_vm1, %v5395_v43  ;;  %v5443_v59 = vld [vmem:[#allocation2 + $0x91] sm:$0xff]  ;;  %v5451_v60 = vld [vmem:[#allocation2 + $0x141] sm:$0xff] }
  0x34   : > { %4714 = vmatprep.mubr.msk.f32.mxu0 %vm274_vm1, %v5399_v45  ;;  %v5455_v61 = vld [vmem:[#allocation2 + $0x99] sm:$0xff]  ;;  %v5457_v62 = vld [vmem:[#allocation2 + $0x151] sm:$0xff]  ;;  %v5497_v11 = vld [vmem:[#allocation2 + $0x22] sm:$0xff] }
  0x35   : > { %v5459_v63 = vld [vmem:[#allocation2 + $0xa9] sm:$0xff]  ;;  %v5467_v0 = vld [vmem:[#allocation2 + $0x159] sm:$0xff]  ;;  %6757 = vst [vmem:[#allocation4_spill] sm:$0xff] %v5497_v11 }
  0x36   : > { %4736 = vmatmul.mubr.msk.f32.gmra.mxu1 %vm274_vm1, %v5419_v52  ;;  %v5471_v1 = vld [vmem:[#allocation2 + $0xb1] sm:$0xff]  ;;  %v5473_v2 = vld [vmem:[#allocation2 + $0x169] sm:$0xff]  ;;  %v5484_v7 = vld [vmem:[#allocation2 + $0x1a] sm:$0xff] }
  0x37   : > { %4715 = vmatmul.mubr.msk.f32.gmra.mxu0 %vm274_vm1, %v5423_v53  ;;  %4738 = vmatprep.mubr.msk.f32.mxu1 %vm274_vm1, %v5425_v54  ;;  %v5481_v4 = vld [vmem:[#allocation2 + $0x171] sm:$0xff]  ;;  %6756 = vst [vmem:[#allocation3_spill] sm:$0xff] %v5484_v7  ;;  %v5521_v16 = vld [vmem:[#allocation2 + $0x20] sm:$0xff]  ;;  %v5547_v22 = vld [vmem:[#allocation2 + $0x48] sm:$0xff] }
  0x38   : > { %4717 = vmatprep.mubr.msk.f32.mxu0 %vm274_vm1, %v5427_v55  ;;  %v5505_v13 = vld [vmem:[#allocation2 + $0x32] sm:$0xff]  ;;  %v5523_v17 = vld [vmem:[#allocation2 + $0x3a] sm:$0xff]  ;;  %v5531_v19 = vld [vmem:[#allocation2 + $0x4a] sm:$0xff] }
  0x39   : > { %6758 = vst [vmem:[#allocation5_spill] sm:$0xff] %v5505_v13  ;;  %6759 = vst [vmem:[#allocation6_spill] sm:$0xff] %v5523_v17  ;;  %v5541_v20 = vld [vmem:[#allocation2 + $0x38] sm:$0xff]  ;;  %v5549_v23 = vld [vmem:[#allocation2 + $0x62] sm:$0xff] }
  0x3a   : > { %4739 = vmatmul.mubr.msk.f32.gmra.mxu1 %vm274_vm1, %v5435_v56  ;;  %6760 = vst [vmem:[#allocation7_spill] sm:$0xff] %v5531_v19  ;;  %v5545_v21 = vld [vmem:[#allocation2 + $0x52] sm:$0xff]  ;;  %6762 = vst [vmem:[#allocation9_spill] sm:$0xff] %v5549_v23  ;;  %v5561_v25 = vld [vmem:[#allocation2 + $0x6a] sm:$0xff] }
  0x3b   : > { %4718 = vmatmul.mubr.msk.f32.gmra.mxu0 %vm274_vm1, %v5439_v57  ;;  %4741 = vmatprep.mubr.msk.f32.mxu1 %vm274_vm1, %v5441_v58  ;;  %6761 = vst [vmem:[#allocation8_spill] sm:$0xff] %v5545_v21  ;;  %v5557_v24 = vld [vmem:[#allocation2 + $0x50] sm:$0xff]  ;;  %6763 = vst [vmem:[#allocation10_spill] sm:$0xff] %v5561_v25  ;;  %v5563_v26 = vld [vmem:[#allocation2 + $0x60] sm:$0xff] }
  0x3c   : > { %4720 = vmatprep.mubr.msk.f32.mxu0 %vm274_vm1, %v5443_v59  ;;  %v5565_v27 = vld [vmem:[#allocation2 + $0x7a] sm:$0xff]  ;;  %v5573_v28 = vld [vmem:[#allocation2 + $0x68] sm:$0xff]  ;;  %v5581_v39 = vld [vmem:[#allocation2 + $0x92] sm:$0xff] }
  0x3d   : > { %6764 = vst [vmem:[#allocation11_spill] sm:$0xff] %v5565_v27  ;;  %v5579_v36 = vld [vmem:[#allocation2 + $0x78] sm:$0xff]  ;;  %6766 = vst [vmem:[#allocation13_spill] sm:$0xff] %v5581_v39  ;;  %v5589_v46 = vld [vmem:[#allocation2 + $0x80] sm:$0xff] }
  0x3e   : > { %4742 = vmatmul.mubr.msk.f32.gmra.mxu1 %vm274_vm1, %v5451_v60  ;;  %v5593_v47 = vld [vmem:[#allocation2 + $0x9a] sm:$0xff]  ;;  %v5595_v48 = vld [vmem:[#allocation2 + $0x90] sm:$0xff] }
  0x3f   : > { %4721 = vmatmul.mubr.msk.f32.gmra.mxu0 %vm274_vm1, %v5455_v61  ;;  %4744 = vmatprep.mubr.msk.f32.mxu1 %vm274_vm1, %v5457_v62  ;;  %6767 = vst [vmem:[#allocation14_spill] sm:$0xff] %v5593_v47  ;;  %v5597_v49 = vld [vmem:[#allocation2 + $0xaa] sm:$0xff]  ;;  %v5605_v50 = vld [vmem:[#allocation2 + $0x98] sm:$0xff] }
  0x40   : > { %4723 = vmatprep.mubr.msk.f32.mxu0 %vm274_vm1, %v5459_v63  ;;  %6768 = vst [vmem:[#allocation15_spill] sm:$0xff] %v5597_v49  ;;  %v5609_v51 = vld [vmem:[#allocation2 + $0xb2] sm:$0xff]  ;;  %v5629_v15 = vld [vmem:[#allocation2 + $0xda] sm:$0xff] }
  0x41   : > { %6769 = vst [vmem:[#allocation16_spill] sm:$0xff] %v5609_v51  ;;  %6772 = vst [vmem:[#allocation19_spill] sm:$0xff] %v5629_v15 }
  0x42   : > { %4745 = vmatmul.mubr.msk.f32.gmra.mxu1 %vm274_vm1, %v5467_v0 }
  0x43   : > { %4724 = vmatmul.mubr.msk.f32.gmra.mxu0 %vm274_vm1, %v5471_v1  ;;  %4747 = vmatprep.mubr.msk.f32.mxu1 %vm274_vm1, %v5473_v2 }
  0x44   : > { %4802 = vmatprep.mubr.msk.f32.mxu0 %vm274_vm1, %v1069_v3  ;;  %v5611_v3 = vld [vmem:[#allocation2 + $0xa8] sm:$0xff] }
  0x46   : > { %4748 = vmatmul.mubr.msk.f32.gmra.mxu1 %vm274_vm1, %v5481_v4 }
  0x47   : > { %4803 = vmatmul.mubr.msk.f32.vlgmr.msra.gmra.mxu0 %vm274_vm1, %v1070_v5  ;;  %4752 = vmatprep.mubr.msk.f32.mxu1 %vm274_vm1, %v353_v6  ;;  %v5613_v5 = vld [vmem:[#allocation2 + $0xc2] sm:$0xff]  ;;  %v5621_v6 = vld [vmem:[#allocation2 + $0xb0] sm:$0xff] }
  0x48   : > { %4901 = vmatpush3.msk.msra.mxu0 %vm516_vm0, %v5297_v10  ;;  %4805 = vmatprep.mubr.msk.f32.mxu0 %vm274_vm1, %v5484_v7  ;;  %v272_v10 = vld [vmem:[%s5283_s30 + $0xf0] sm:$0xff]  ;;  %6770 = vst [vmem:[#allocation17_spill] sm:$0xff] %v5613_v5  ;;  %v5739_v7 = vld [vmem:[#allocation2 + $0x168] sm:$0xff]  ;;  %s241_s30 = scalar_lea.vmem %s6698_s5, %s6917_s19 }
  0x49   : > { %5000 = vmatprep.subr.msk.mxu0 %vm516_vm0, %v5489_v8  ;;  %351 = vst.msk [vmem:[#allocation2 + $0x181] sm:$0xff] %vm274_vm1, %v272_v10  ;;  %v5627_v10 = vld [vmem:[#allocation2 + $0xc0] sm:$0xff] }
  0x4a   : > { %4753 = vmatmul.mubr.msk.f32.vlgmr.msra.gmra.mxu1 %vm274_vm1, %v354_v9  ;;  %v5625_v9 = vld [vmem:[#allocation2 + $0xca] sm:$0xff] }
  0x4b   : > { %4806 = vmatmul.mubr.msk.f32.gmra.mxu0 %vm274_vm1, %v5497_v11  ;;  %4851 = vmatpush3.msk.msra.mxu1 %vm516_vm0, %v5357_v34  ;;  %v5577_v34 = vld [vmem:[#allocation2 + $0x82] sm:$0xff]  ;;  %6771 = vst [vmem:[#allocation18_spill] sm:$0xff] %v5625_v9  ;;  %v5725_v11 = vld [vmem:[#allocation2 + $0x16a] sm:$0xff] }
  0x4c   : > { %4755 = vmatprep.mubr.msk.f32.mxu1 %vm274_vm1, %v5499_v12  ;;  %4808 = vmatprep.mubr.msk.f32.mxu0 %vm274_vm1, %v5505_v13  ;;  %6765 = vst [vmem:[#allocation12_spill] sm:$0xff] %v5577_v34  ;;  %v5723_v13 = vld [vmem:[#allocation2 + $0x150] sm:$0xff]  ;;  %6784 = vst [vmem:[#allocation31_spill] sm:$0xff] %v5725_v11 }
  0x4d   : > { %4950 = vmatprep.subr.msk.mxu1 %vm516_vm0, %v5510_v14 }
  0x4e   : > { %4756 = vmatmul.mubr.msk.f32.gmra.mxu1 %vm274_vm1, %v5521_v16 }
  0x4f   : > { %4809 = vmatmul.mubr.msk.f32.gmra.mxu0 %vm274_vm1, %v5523_v17  ;;  %4758 = vmatprep.mubr.msk.f32.mxu1 %vm274_vm1, %v5527_v18  ;;  %v5709_v17 = vld [vmem:[#allocation2 + $0x152] sm:$0xff] }
  0x50   : > { %4811 = vmatprep.mubr.msk.f32.mxu0 %vm274_vm1, %v5531_v19  ;;  %v5707_v19 = vld [vmem:[#allocation2 + $0x138] sm:$0xff]  ;;  %6782 = vst [vmem:[#allocation29_spill] sm:$0xff] %v5709_v17 }
  0x52   : > { %4759 = vmatmul.mubr.msk.f32.gmra.mxu1 %vm274_vm1, %v5541_v20 }
  0x53   : > { %4812 = vmatmul.mubr.msk.f32.gmra.mxu0 %vm274_vm1, %v5545_v21  ;;  %4761 = vmatprep.mubr.msk.f32.mxu1 %vm274_vm1, %v5547_v22  ;;  %v5693_v21 = vld [vmem:[#allocation2 + $0x13a] sm:$0xff] }
  0x54   : > { %4814 = vmatprep.mubr.msk.f32.mxu0 %vm274_vm1, %v5549_v23  ;;  %v5691_v23 = vld [vmem:[#allocation2 + $0x120] sm:$0xff]  ;;  %6780 = vst [vmem:[#allocation27_spill] sm:$0xff] %v5693_v21 }
  0x56   : > { %4762 = vmatmul.mubr.msk.f32.gmra.mxu1 %vm274_vm1, %v5557_v24 }
  0x57   : > { %4815 = vmatmul.mubr.msk.f32.gmra.mxu0 %vm274_vm1, %v5561_v25  ;;  %4764 = vmatprep.mubr.msk.f32.mxu1 %vm274_vm1, %v5563_v26  ;;  %v5677_v25 = vld [vmem:[#allocation2 + $0x122] sm:$0xff] }
  0x58   : > { %4817 = vmatprep.mubr.msk.f32.mxu0 %vm274_vm1, %v5565_v27  ;;  %v5675_v27 = vld [vmem:[#allocation2 + $0x108] sm:$0xff]  ;;  %6778 = vst [vmem:[#allocation25_spill] sm:$0xff] %v5677_v25 }
  0x5a   : > { %4765 = vmatmul.mubr.msk.f32.gmra.mxu1 %vm274_vm1, %v5573_v28 }
  0x5b   : > { %4818 = vmatmul.mubr.msk.f32.gmra.mxu0 %vm274_vm1, %v5577_v34  ;;  %4767 = vmatprep.mubr.msk.f32.mxu1 %vm274_vm1, %v5579_v36  ;;  %v5661_v34 = vld [vmem:[#allocation2 + $0x10a] sm:$0xff] }
  0x5c   : > { %4820 = vmatprep.mubr.msk.f32.mxu0 %vm274_vm1, %v5581_v39  ;;  %v5659_v39 = vld [vmem:[#allocation2 + $0xf0] sm:$0xff]  ;;  %6776 = vst [vmem:[#allocation23_spill] sm:$0xff] %v5661_v34 }
  0x5e   : > { %4768 = vmatmul.mubr.msk.f32.gmra.mxu1 %vm274_vm1, %v5589_v46 }
  0x5f   : > { %4821 = vmatmul.mubr.msk.f32.gmra.mxu0 %vm274_vm1, %v5593_v47  ;;  %4770 = vmatprep.mubr.msk.f32.mxu1 %vm274_vm1, %v5595_v48  ;;  %v5645_v47 = vld [vmem:[#allocation2 + $0xf2] sm:$0xff] }
  0x60   : > { %4823 = vmatprep.mubr.msk.f32.mxu0 %vm274_vm1, %v5597_v49  ;;  %v5643_v49 = vld [vmem:[#allocation2 + $0xd8] sm:$0xff]  ;;  %6774 = vst [vmem:[#allocation21_spill] sm:$0xff] %v5645_v47 }
  0x62   : > { %4771 = vmatmul.mubr.msk.f32.gmra.mxu1 %vm274_vm1, %v5605_v50 }
  0x63   : > { %4824 = vmatmul.mubr.msk.f32.gmra.mxu0 %vm274_vm1, %v5609_v51  ;;  %4773 = vmatprep.mubr.msk.f32.mxu1 %vm274_vm1, %v5611_v3  ;;  %v5637_v51 = vld [vmem:[#allocation2 + $0xc8] sm:$0xff] }
  0x64   : > { %4826 = vmatprep.mubr.msk.f32.mxu0 %vm274_vm1, %v5613_v5  ;;  %v5641_v5 = vld [vmem:[#allocation2 + $0xe2] sm:$0xff] }
  0x65   : > { %6773 = vst [vmem:[#allocation20_spill] sm:$0xff] %v5641_v5 }
  0x66   : > { %4774 = vmatmul.mubr.msk.f32.gmra.mxu1 %vm274_vm1, %v5621_v6 }
  0x67   : > { %4827 = vmatmul.mubr.msk.f32.gmra.mxu0 %vm274_vm1, %v5625_v9  ;;  %4776 = vmatprep.mubr.msk.f32.mxu1 %vm274_vm1, %v5627_v10  ;;  %v5653_v9 = vld [vmem:[#allocation2 + $0xe0] sm:$0xff] }
  0x68   : > { %4829 = vmatprep.mubr.msk.f32.mxu0 %vm274_vm1, %v5629_v15  ;;  %v5657_v15 = vld [vmem:[#allocation2 + $0xfa] sm:$0xff] }
  0x69   : > { %6775 = vst [vmem:[#allocation22_spill] sm:$0xff] %v5657_v15 }
  0x6a   : > { %4777 = vmatmul.mubr.msk.f32.gmra.mxu1 %vm274_vm1, %v5637_v51 }
  0x6b   : > { %4830 = vmatmul.mubr.msk.f32.gmra.mxu0 %vm274_vm1, %v5641_v5  ;;  %4779 = vmatprep.mubr.msk.f32.mxu1 %vm274_vm1, %v5643_v49  ;;  %v5669_v5 = vld [vmem:[#allocation2 + $0xf8] sm:$0xff] }
  0x6c   : > { %4832 = vmatprep.mubr.msk.f32.mxu0 %vm274_vm1, %v5645_v47  ;;  %v5673_v47 = vld [vmem:[#allocation2 + $0x112] sm:$0xff] }
  0x6d   : > { %6777 = vst [vmem:[#allocation24_spill] sm:$0xff] %v5673_v47 }
  0x6e   : > { %4780 = vmatmul.mubr.msk.f32.gmra.mxu1 %vm274_vm1, %v5653_v9 }
  0x6f   : > { %4833 = vmatmul.mubr.msk.f32.gmra.mxu0 %vm274_vm1, %v5657_v15  ;;  %4782 = vmatprep.mubr.msk.f32.mxu1 %vm274_vm1, %v5659_v39  ;;  %v5685_v15 = vld [vmem:[#allocation2 + $0x110] sm:$0xff] }
  0x70   : > { %4835 = vmatprep.mubr.msk.f32.mxu0 %vm274_vm1, %v5661_v34  ;;  %v5689_v34 = vld [vmem:[#allocation2 + $0x12a] sm:$0xff] }
  0x71   : > { %6779 = vst [vmem:[#allocation26_spill] sm:$0xff] %v5689_v34 }
  0x72   : > { %4783 = vmatmul.mubr.msk.f32.gmra.mxu1 %vm274_vm1, %v5669_v5 }
  0x73   : > { %4836 = vmatmul.mubr.msk.f32.gmra.mxu0 %vm274_vm1, %v5673_v47  ;;  %4785 = vmatprep.mubr.msk.f32.mxu1 %vm274_vm1, %v5675_v27  ;;  %v5701_v47 = vld [vmem:[#allocation2 + $0x128] sm:$0xff] }
  0x74   : > { %4838 = vmatprep.mubr.msk.f32.mxu0 %vm274_vm1, %v5677_v25  ;;  %v5705_v25 = vld [vmem:[#allocation2 + $0x142] sm:$0xff] }
  0x75   : > { %6781 = vst [vmem:[#allocation28_spill] sm:$0xff] %v5705_v25 }
  0x76   : > { %4786 = vmatmul.mubr.msk.f32.gmra.mxu1 %vm274_vm1, %v5685_v15 }
  0x77   : > { %4839 = vmatmul.mubr.msk.f32.gmra.mxu0 %vm274_vm1, %v5689_v34  ;;  %4788 = vmatprep.mubr.msk.f32.mxu1 %vm274_vm1, %v5691_v23  ;;  %v5717_v34 = vld [vmem:[#allocation2 + $0x140] sm:$0xff] }
  0x78   : > { %4841 = vmatprep.mubr.msk.f32.mxu0 %vm274_vm1, %v5693_v21  ;;  %v5721_v21 = vld [vmem:[#allocation2 + $0x15a] sm:$0xff] }
  0x79   : > { %6783 = vst [vmem:[#allocation30_spill] sm:$0xff] %v5721_v21 }
  0x7a   : > { %4789 = vmatmul.mubr.msk.f32.gmra.mxu1 %vm274_vm1, %v5701_v47 }
  0x7b   : > { %4842 = vmatmul.mubr.msk.f32.gmra.mxu0 %vm274_vm1, %v5705_v25  ;;  %4791 = vmatprep.mubr.msk.f32.mxu1 %vm274_vm1, %v5707_v19  ;;  %v5733_v25 = vld [vmem:[#allocation2 + $0x158] sm:$0xff] }
  0x7c   : > { %4844 = vmatprep.mubr.msk.f32.mxu0 %vm274_vm1, %v5709_v17  ;;  %v5737_v17 = vld [vmem:[#allocation2 + $0x172] sm:$0xff] }
  0x7e   : > { %4792 = vmatmul.mubr.msk.f32.gmra.mxu1 %vm274_vm1, %v5717_v34 }
  0x7f   : > { %4845 = vmatmul.mubr.msk.f32.gmra.mxu0 %vm274_vm1, %v5721_v21  ;;  %4794 = vmatprep.mubr.msk.f32.mxu1 %vm274_vm1, %v5723_v13  ;;  %v5747_v21 = vld [vmem:[#allocation2 + $0x170] sm:$0xff] }
  0x80   : > { %4847 = vmatprep.mubr.msk.f32.mxu0 %vm274_vm1, %v5725_v11  ;;  %v5754_v11 = vld [vmem:[%s6694_s1 + $0x20] sm:$0xf] }
  0x82   : > { %4795 = vmatmul.mubr.msk.f32.gmra.mxu1 %vm274_vm1, %v5733_v25 }
  0x83   : > { %4848 = vmatmul.mubr.msk.f32.gmra.mxu0 %vm274_vm1, %v5737_v17  ;;  %4797 = vmatprep.mubr.msk.f32.mxu1 %vm274_vm1, %v5739_v7 }
  0x84   : > { %4902 = vmatprep.mubr.msk.f32.mxu0 %vm274_vm1, %v5341_v31  ;;  %v5771_v31 = vld [vmem:[%s6694_s1 + $0x1c] sm:$0xf] }
  0x86   : > { %4798 = vmatmul.mubr.msk.f32.gmra.mxu1 %vm274_vm1, %v5747_v21 }
  0x87   : > { %4903 = vmatmul.mubr.msk.f32.vlgmr.msra.gmra.mxu0 %vm274_vm1, %v5352_v33  ;;  %4852 = vmatprep.mubr.msk.f32.mxu1 %vm274_vm1, %v5499_v12  ;;  %v5901_v33 = vld [vmem:[#allocation2 + $0x188] sm:$0xff] }
  0x88   : > { %5001 = vmatpush3.msk.msra.mxu0 %vm516_vm0, %v5489_v8  ;;  %4905 = vmatprep.mubr.msk.f32.mxu0 %vm274_vm1, %v5363_v35  ;;  %v6787_v35 = vld [vmem:[#allocation3_spill] sm:$0xff] }
  0x89   : > { %5100 = vmatprep.subr.msk.mxu0 %vm516_vm0, %v5754_v11 }
  0x8a   : > { %4853 = vmatmul.mubr.msk.f32.vlgmr.msra.gmra.mxu1 %vm274_vm1, %v5521_v16 }
  0x8b   : > { %4906 = vmatmul.mubr.msk.f32.gmra.mxu0 %vm274_vm1, %v5372_v38  ;;  %4951 = vmatpush3.msk.msra.mxu1 %vm516_vm0, %v5510_v14  ;;  %v6789_v38 = vld [vmem:[#allocation5_spill] sm:$0xff]  ;;  %v6807_v14 = vld [vmem:[#allocation23_spill] sm:$0xff] }
  0x8c   : > { %4855 = vmatprep.mubr.msk.f32.mxu1 %vm274_vm1, %v5527_v18  ;;  %4908 = vmatprep.mubr.msk.f32.mxu0 %vm274_vm1, %v5380_v41  ;;  %v6791_v41 = vld [vmem:[#allocation7_spill] sm:$0xff] }
  0x8d   : > { %5050 = vmatprep.subr.msk.mxu1 %vm516_vm0, %v5771_v31 }
  0x8e   : > { %4856 = vmatmul.mubr.msk.f32.gmra.mxu1 %vm274_vm1, %v5541_v20 }
  0x8f   : > { %4909 = vmatmul.mubr.msk.f32.gmra.mxu0 %vm274_vm1, %v5397_v44  ;;  %4858 = vmatprep.mubr.msk.f32.mxu1 %vm274_vm1, %v5547_v22  ;;  %v6794_v44 = vld [vmem:[#allocation10_spill] sm:$0xff] }
  0x90   : > { %4911 = vmatprep.mubr.msk.f32.mxu0 %vm274_vm1, %v5399_v45  ;;  %v6795_v45 = vld [vmem:[#allocation11_spill] sm:$0xff] }
  0x92   : > { %4859 = vmatmul.mubr.msk.f32.gmra.mxu1 %vm274_vm1, %v5557_v24 }
  0x93   : > { %4912 = vmatmul.mubr.msk.f32.gmra.mxu0 %vm274_vm1, %v5423_v53  ;;  %4861 = vmatprep.mubr.msk.f32.mxu1 %vm274_vm1, %v5563_v26  ;;  %v6797_v53 = vld [vmem:[#allocation13_spill] sm:$0xff] }
  0x94   : > { %4914 = vmatprep.mubr.msk.f32.mxu0 %vm274_vm1, %v5427_v55  ;;  %v6799_v55 = vld [vmem:[#allocation15_spill] sm:$0xff] }
  0x96   : > { %4862 = vmatmul.mubr.msk.f32.gmra.mxu1 %vm274_vm1, %v5573_v28 }
  0x97   : > { %4915 = vmatmul.mubr.msk.f32.gmra.mxu0 %vm274_vm1, %v5439_v57  ;;  %4864 = vmatprep.mubr.msk.f32.mxu1 %vm274_vm1, %v5579_v36  ;;  %v6801_v57 = vld [vmem:[#allocation17_spill] sm:$0xff] }
  0x98   : > { %4917 = vmatprep.mubr.msk.f32.mxu0 %vm274_vm1, %v5443_v59  ;;  %v6802_v59 = vld [vmem:[#allocation18_spill] sm:$0xff] }
  0x9a   : > { %4865 = vmatmul.mubr.msk.f32.gmra.mxu1 %vm274_vm1, %v5589_v46 }
  0x9b   : > { %4918 = vmatmul.mubr.msk.f32.gmra.mxu0 %vm274_vm1, %v5455_v61  ;;  %4867 = vmatprep.mubr.msk.f32.mxu1 %vm274_vm1, %v5595_v48  ;;  %v6803_v61 = vld [vmem:[#allocation19_spill] sm:$0xff] }
  0x9c   : > { %4920 = vmatprep.mubr.msk.f32.mxu0 %vm274_vm1, %v5459_v63  ;;  %v6804_v63 = vld [vmem:[#allocation20_spill] sm:$0xff] }
  0x9e   : > { %4868 = vmatmul.mubr.msk.f32.gmra.mxu1 %vm274_vm1, %v5605_v50 }
  0x9f   : > { %4921 = vmatmul.mubr.msk.f32.gmra.mxu0 %vm274_vm1, %v5471_v1  ;;  %4870 = vmatprep.mubr.msk.f32.mxu1 %vm274_vm1, %v5611_v3  ;;  %v6805_v1 = vld [vmem:[#allocation21_spill] sm:$0xff] }
  0xa0   : > { %4923 = vmatprep.mubr.msk.f32.mxu0 %vm274_vm1, %v5337_v29  ;;  %v5881_v29 = vld [vmem:[#allocation2 + $0x181] sm:$0xff] }
  0xa1   : > { %6785 = vst [vmem:[#allocation32_spill] sm:$0xff] %v5881_v29 }
  0xa2   : > { %4871 = vmatmul.mubr.msk.f32.gmra.mxu1 %vm274_vm1, %v5621_v6 }
  0xa3   : > { %4924 = vmatmul.mubr.msk.f32.gmra.mxu0 %vm274_vm1, %v5339_v30  ;;  %4873 = vmatprep.mubr.msk.f32.mxu1 %vm274_vm1, %v5627_v10  ;;  %v5891_v30 = vld [vmem:[#allocation2 + $0x189] sm:$0xff] }
  0xa4   : > { %4926 = vmatprep.mubr.msk.f32.mxu0 %vm274_vm1, %v5350_v32  ;;  %6786 = vst [vmem:[#allocation33_spill] sm:$0xff] %v5891_v30  ;;  %v5893_v32 = vld [vmem:[#allocation2 + $0x180] sm:$0xff] }
  0xa6   : > { %4874 = vmatmul.mubr.msk.f32.gmra.mxu1 %vm274_vm1, %v5637_v51 }
  0xa7   : > { %4927 = vmatmul.mubr.msk.f32.gmra.mxu0 %vm274_vm1, %v5370_v37  ;;  %4876 = vmatprep.mubr.msk.f32.mxu1 %vm274_vm1, %v5643_v49  ;;  %v6788_v37 = vld [vmem:[#allocation4_spill] sm:$0xff] }
  0xa8   : > { %4929 = vmatprep.mubr.msk.f32.mxu0 %vm274_vm1, %v5378_v40  ;;  %v6790_v40 = vld [vmem:[#allocation6_spill] sm:$0xff] }
  0xaa   : > { %4877 = vmatmul.mubr.msk.f32.gmra.mxu1 %vm274_vm1, %v5653_v9 }
  0xab   : > { %4930 = vmatmul.mubr.msk.f32.gmra.mxu0 %vm274_vm1, %v5389_v42  ;;  %4879 = vmatprep.mubr.msk.f32.mxu1 %vm274_vm1, %v5659_v39  ;;  %v6792_v42 = vld [vmem:[#allocation8_spill] sm:$0xff] }
  0xac   : > { %4932 = vmatprep.mubr.msk.f32.mxu0 %vm274_vm1, %v5395_v43  ;;  %v6793_v43 = vld [vmem:[#allocation9_spill] sm:$0xff] }
  0xae   : > { %4880 = vmatmul.mubr.msk.f32.gmra.mxu1 %vm274_vm1, %v5669_v5 }
  0xaf   : > { %4933 = vmatmul.mubr.msk.f32.gmra.mxu0 %vm274_vm1, %v5419_v52  ;;  %4882 = vmatprep.mubr.msk.f32.mxu1 %vm274_vm1, %v5675_v27  ;;  %v6796_v52 = vld [vmem:[#allocation12_spill] sm:$0xff] }
  0xb0   : > { %4935 = vmatprep.mubr.msk.f32.mxu0 %vm274_vm1, %v5425_v54  ;;  %v6798_v54 = vld [vmem:[#allocation14_spill] sm:$0xff] }
  0xb2   : > { %4883 = vmatmul.mubr.msk.f32.gmra.mxu1 %vm274_vm1, %v5685_v15 }
  0xb3   : > { %4936 = vmatmul.mubr.msk.f32.gmra.mxu0 %vm274_vm1, %v5435_v56  ;;  %4885 = vmatprep.mubr.msk.f32.mxu1 %vm274_vm1, %v5691_v23  ;;  %v6800_v56 = vld [vmem:[#allocation16_spill] sm:$0xff] }
  0xb4   : > { %4938 = vmatprep.mubr.msk.f32.mxu0 %vm274_vm1, %v5441_v58 }
  0xb6   : > { %4886 = vmatmul.mubr.msk.f32.gmra.mxu1 %vm274_vm1, %v5701_v47 }
  0xb7   : > { %4939 = vmatmul.mubr.msk.f32.gmra.mxu0 %vm274_vm1, %v5451_v60  ;;  %4888 = vmatprep.mubr.msk.f32.mxu1 %vm274_vm1, %v5707_v19 }
  0xb8   : > { %4941 = vmatprep.mubr.msk.f32.mxu0 %vm274_vm1, %v5457_v62 }
  0xba   : > { %4889 = vmatmul.mubr.msk.f32.gmra.mxu1 %vm274_vm1, %v5717_v34 }
  0xbb   : > { %4942 = vmatmul.mubr.msk.f32.gmra.mxu0 %vm274_vm1, %v5467_v0  ;;  %4891 = vmatprep.mubr.msk.f32.mxu1 %vm274_vm1, %v5723_v13 }
  0xbc   : > { %4944 = vmatprep.mubr.msk.f32.mxu0 %vm274_vm1, %v5473_v2 }
  0xbe   : > { %4892 = vmatmul.mubr.msk.f32.gmra.mxu1 %vm274_vm1, %v5733_v25 }
  0xbf   : > { %4945 = vmatmul.mubr.msk.f32.gmra.mxu0 %vm274_vm1, %v5481_v4  ;;  %4894 = vmatprep.mubr.msk.f32.mxu1 %vm274_vm1, %v5739_v7 }
  0xc0   : > { %4947 = vmatprep.mubr.msk.f32.mxu0 %vm274_vm1, %v5881_v29 }
  0xc2   : > { %4895 = vmatmul.mubr.msk.f32.gmra.mxu1 %vm274_vm1, %v5747_v21 }
  0xc3   : > { %4948 = vmatmul.mubr.msk.f32.gmra.mxu0 %vm274_vm1, %v5891_v30  ;;  %4897 = vmatprep.mubr.msk.f32.mxu1 %vm274_vm1, %v5893_v32 }
  0xc4   : > { %5002 = vmatprep.mubr.msk.f32.mxu0 %vm274_vm1, %v5527_v18 }
  0xc6   : > { %4898 = vmatmul.mubr.msk.f32.gmra.mxu1 %vm274_vm1, %v5901_v33 }
  0xc7   : > { %5003 = vmatmul.mubr.msk.f32.vlgmr.msra.gmra.mxu0 %vm274_vm1, %v5541_v20  ;;  %4952 = vmatprep.mubr.msk.f32.mxu1 %vm274_vm1, %v6787_v35 }
  0xc8   : > { %5101 = vmatpush3.msk.msra.mxu0 %vm516_vm0, %v5754_v11  ;;  %5005 = vmatprep.mubr.msk.f32.mxu0 %vm274_vm1, %v5547_v22  ;;  %v6806_v11 = vld [vmem:[#allocation22_spill] sm:$0xff]  ;;  %v6808_v22 = vld [vmem:[#allocation24_spill] sm:$0xff] }
  0xca   : > { %4953 = vmatmul.mubr.msk.f32.vlgmr.msra.gmra.mxu1 %vm274_vm1, %v6788_v37 }
  0xcb   : > { %5006 = vmatmul.mubr.msk.f32.gmra.mxu0 %vm274_vm1, %v5557_v24  ;;  %5051 = vmatpush3.msk.msra.mxu1 %vm516_vm0, %v5771_v31  ;;  %v6809_v24 = vld [vmem:[#allocation25_spill] sm:$0xff] }
  0xcc   : > { %4955 = vmatprep.mubr.msk.f32.mxu1 %vm274_vm1, %v6789_v38  ;;  %5008 = vmatprep.mubr.msk.f32.mxu0 %vm274_vm1, %v5563_v26 }
  0xce   : > { %4956 = vmatmul.mubr.msk.f32.gmra.mxu1 %vm274_vm1, %v6790_v40 }
  0xcf   : > { %5009 = vmatmul.mubr.msk.f32.gmra.mxu0 %vm274_vm1, %v5573_v28  ;;  %4958 = vmatprep.mubr.msk.f32.mxu1 %vm274_vm1, %v6791_v41  ;;  %v6810_v28 = vld [vmem:[#allocation26_spill] sm:$0xff] }
  0xd0   : > { %5011 = vmatprep.mubr.msk.f32.mxu0 %vm274_vm1, %v5579_v36 }
  0xd2   : > { %4959 = vmatmul.mubr.msk.f32.gmra.mxu1 %vm274_vm1, %v6792_v42 }
  0xd3   : > { %5012 = vmatmul.mubr.msk.f32.gmra.mxu0 %vm274_vm1, %v5589_v46  ;;  %4961 = vmatprep.mubr.msk.f32.mxu1 %vm274_vm1, %v6793_v43 }
  0xd4   : > { %5014 = vmatprep.mubr.msk.f32.mxu0 %vm274_vm1, %v5595_v48 }
  0xd6   : > { %4962 = vmatmul.mubr.msk.f32.gmra.mxu1 %vm274_vm1, %v6794_v44  ;;  %v5973_v58 = vpop.f32.mrf.mxu0 }
  0xd7   : > { %5015 = vmatmul.mubr.msk.f32.gmra.mxu0 %vm274_vm1, %v5605_v50  ;;  %4964 = vmatprep.mubr.msk.f32.mxu1 %vm274_vm1, %v6795_v45  ;;  %v2660_v50 = vld [vmem:[#allocation2 + $0x198] sm:$0xff] }
  0xd8   : > { %5017 = vmatprep.mubr.msk.f32.mxu0 %vm274_vm1, %v5611_v3  ;;  %v5979_v60 = vpop.f32.mrf.mxu0  ;;  %v6815_v3 = vld [vmem:[#allocation30_spill] sm:$0xff] }
  0xda   : > { %4965 = vmatmul.mubr.msk.f32.gmra.mxu1 %vm274_vm1, %v6796_v52 }
  0xdb   : > { %5018 = vmatmul.mubr.msk.f32.gmra.mxu0 %vm274_vm1, %v5621_v6  ;;  %4967 = vmatprep.mubr.msk.f32.mxu1 %vm274_vm1, %v6797_v53  ;;  %v2661_v6 = vld [vmem:[#allocation2 + $0x1a0] sm:$0xff] }
  0xdc   : > { %5020 = vmatprep.mubr.msk.f32.mxu0 %vm274_vm1, %v5627_v10 }
  0xde   : > { %4968 = vmatmul.mubr.msk.f32.gmra.mxu1 %vm274_vm1, %v6798_v54 }
  0xdf   : > { %5021 = vmatmul.mubr.msk.f32.gmra.mxu0 %vm274_vm1, %v5637_v51  ;;  %4970 = vmatprep.mubr.msk.f32.mxu1 %vm274_vm1, %v6799_v55 }
  0xe0   : > { %5023 = vmatprep.mubr.msk.f32.mxu0 %vm274_vm1, %v5643_v49 }
  0xe2   : > { %4971 = vmatmul.mubr.msk.f32.gmra.mxu1 %vm274_vm1, %v6800_v56 }
  0xe3   : > { %5024 = vmatmul.mubr.msk.f32.gmra.mxu0 %vm274_vm1, %v5653_v9  ;;  %4973 = vmatprep.mubr.msk.f32.mxu1 %vm274_vm1, %v6801_v57 }
  0xe4   : > { %5026 = vmatprep.mubr.msk.f32.mxu0 %vm274_vm1, %v5659_v39 }
  0xe6   : > { %4974 = vmatmul.mubr.msk.f32.gmra.mxu1 %vm274_vm1, %v6802_v59 }
  0xe7   : > { %5027 = vmatmul.mubr.msk.f32.gmra.mxu0 %vm274_vm1, %v5669_v5  ;;  %4976 = vmatprep.mubr.msk.f32.mxu1 %vm274_vm1, %v6803_v61 }
  0xe8   : > { %5029 = vmatprep.mubr.msk.f32.mxu0 %vm274_vm1, %v5675_v27 }
  0xea   : > { %v5985_v62 = vpop.f32.mrf.mxu1  ;;  %4977 = vmatmul.mubr.msk.f32.gmra.mxu1 %vm274_vm1, %v6804_v63 }
  0xeb   : > { %v5989_v0 = vpop.f32.mrf.mxu0  ;;  %5030 = vmatmul.mubr.msk.f32.gmra.mxu0 %vm274_vm1, %v5685_v15  ;;  %4979 = vmatprep.mubr.msk.f32.mxu1 %vm274_vm1, %v6805_v1  ;;  %v6080_v15 = vld [vmem:[#allocation2 + $0x182] sm:$0xff] }
  0xec   : > { %5032 = vmatprep.mubr.msk.f32.mxu0 %vm274_vm1, %v5691_v23  ;;  %v5997_v2 = vpop.f32.mrf.mxu1 }
  0xed   : > { %v5999_v4 = vpop.f32.mrf.mxu0 }
  0xee   : > { %v6001_v8 = vpop.f32.mrf.mxu1  ;;  %4980 = vmatmul.mubr.msk.f32.gmra.mxu1 %vm274_vm1, %v6806_v11 }
  0xef   : > { %v6005_v12 = vpop.f32.mrf.mxu0  ;;  %5033 = vmatmul.mubr.msk.f32.gmra.mxu0 %vm274_vm1, %v5701_v47  ;;  %4982 = vmatprep.mubr.msk.f32.mxu1 %vm274_vm1, %v6807_v14  ;;  %v6812_v47 = vld [vmem:[#allocation28_spill] sm:$0xff] }
  0xf0   : > { %5035 = vmatprep.mubr.msk.f32.mxu0 %vm274_vm1, %v5707_v19  ;;  %v6013_v16 = vpop.f32.mrf.mxu1 }
  0xf1   : > { %v6015_v18 = vpop.f32.mrf.mxu0 }
  0xf2   : > { %v6017_v20 = vpop.f32.mrf.mxu1  ;;  %4983 = vmatmul.mubr.msk.f32.gmra.mxu1 %vm274_vm1, %v6808_v22 }
  0xf3   : > { %v6021_v23 = vpop.f32.mrf.mxu0  ;;  %5036 = vmatmul.mubr.msk.f32.gmra.mxu0 %vm274_vm1, %v5717_v34  ;;  %4985 = vmatprep.mubr.msk.f32.mxu1 %vm274_vm1, %v6809_v24  ;;  %v6811_v34 = vld [vmem:[#allocation27_spill] sm:$0xff] }
  0xf4   : > { %5038 = vmatprep.mubr.msk.f32.mxu0 %vm274_vm1, %v5723_v13  ;;  %v6029_v19 = vpop.f32.mrf.mxu1 }
  0xf5   : > { %v6031_v26 = vpop.f32.mrf.mxu0 }
  0xf6   : > { %v6033_v27 = vpop.f32.mrf.mxu1  ;;  %4986 = vmatmul.mubr.msk.f32.gmra.mxu1 %vm274_vm1, %v6810_v28 }
  0xf7   : > { %v6037_v36 = vpop.f32.mrf.mxu0  ;;  %5039 = vmatmul.mubr.msk.f32.gmra.mxu0 %vm274_vm1, %v5733_v25  ;;  %4988 = vmatprep.mubr.msk.f32.mxu1 %vm274_vm1, %v6811_v34  ;;  %v6813_v25 = vld [vmem:[#allocation29_spill] sm:$0xff] }
  0xf8   : > { %5041 = vmatprep.mubr.msk.f32.mxu0 %vm274_vm1, %v5739_v7  ;;  %v6045_v13 = vpop.f32.mrf.mxu1 }
  0xf9   : > { %v6047_v39 = vpop.f32.mrf.mxu0 }
  0xfa   : > { %v6049_v46 = vpop.f32.mrf.mxu1  ;;  %4989 = vmatmul.mubr.msk.f32.gmra.mxu1 %vm274_vm1, %v6812_v47 }
  0xfb   : > { %v6053_v48 = vpop.f32.mrf.mxu0  ;;  %5042 = vmatmul.mubr.msk.f32.gmra.mxu0 %vm274_vm1, %v5747_v21  ;;  %4991 = vmatprep.mubr.msk.f32.mxu1 %vm274_vm1, %v6813_v25  ;;  %v6816_v21 = vld [vmem:[#allocation31_spill] sm:$0xff] }
  0xfc   : > { %5044 = vmatprep.mubr.msk.f32.mxu0 %vm274_vm1, %v5893_v32  ;;  %v6061_v7 = vpop.f32.mrf.mxu1 }
  0xfd   : > { %v6063_v49 = vpop.f32.mrf.mxu0 }
  0xfe   : > { %v6065_v51 = vpop.f32.mrf.mxu1  ;;  %4992 = vmatmul.mubr.msk.f32.gmra.mxu1 %vm274_vm1, %v6815_v3 }
  0xff   : > { %6814 = vst [vmem:[#allocation3_spill] sm:$0xff] %v6065_v51  ;;  %v6069_v5 = vpop.f32.mrf.mxu0  ;;  %5045 = vmatmul.mubr.msk.f32.gmra.mxu0 %vm274_vm1, %v5901_v33  ;;  %4994 = vmatprep.mubr.msk.f32.mxu1 %vm274_vm1, %v6816_v21  ;;  %v6091_v33 = vld [vmem:[#allocation2 + $0x18a] sm:$0xff]  ;;  %v3021_v21 = vld [vmem:[#allocation2 + $0x39] sm:$0xff] }
 0x100   : > { %5047 = vmatprep.mubr.msk.f32.mxu0 %vm274_vm1, %v2660_v50  ;;  %v6076_v9 = vpop.f32.mrf.mxu1  ;;  %v3020_v50 = vld [vmem:[#allocation2 + $0x31] sm:$0xff] }
 0x101   : > { %6817 = vst [vmem:[#allocation4_spill] sm:$0xff] %v6076_v9  ;;  %v6078_v10 = vpop.f32.mrf.mxu0 }
 0x102   : > { %v6082_v31 = vpop.f32.mrf.mxu1  ;;  %4995 = vmatmul.mubr.msk.f32.gmra.mxu1 %vm274_vm1, %v5737_v17 }
 0x103   : > { %6818 = vst [vmem:[#allocation5_spill] sm:$0xff] %v6082_v31  ;;  %v6086_v32 = vpop.f32.mrf.mxu0  ;;  %5048 = vmatmul.mubr.msk.f32.gmra.mxu0 %vm274_vm1, %v2661_v6  ;;  %4997 = vmatprep.mubr.msk.f32.mxu1 %vm274_vm1, %v6080_v15 }
 0x104   : > { %5102 = vmatprep.mubr.msk.f32.mxu0 %vm274_vm1, %v6789_v38  ;;  %v6095_v35 = vpop.f32.mrf.mxu1 }
 0x105   : > { %6819 = vst [vmem:[#allocation6_spill] sm:$0xff] %v6095_v35  ;;  %v6097_v37 = vpop.f32.mrf.mxu0  ;;  %v3022_v35 = vld [vmem:[#allocation2 + $0x49] sm:$0xff] }
 0x106   : > { %v6099_v3 = vpop.f32.mrf.mxu1  ;;  %4998 = vmatmul.mubr.msk.f32.gmra.mxu1 %vm274_vm1, %v6091_v33 }
 0x107   : > { %6820 = vst [vmem:[#allocation7_spill] sm:$0xff] %v6099_v3  ;;  %v4804_v17 = vpop.f32.mrf.mxu0  ;;  %5103 = vmatmul.mubr.msk.f32.vlgmr.msra.gmra.mxu0 %vm274_vm1, %v6790_v40  ;;  %5052 = vmatprep.mubr.msk.f32.mxu1 %vm274_vm1, %v3020_v50  ;;  %v3023_v40 = vld [vmem:[#allocation2 + $0x51] sm:$0xff] }
 0x108   : > { %5105 = vmatprep.mubr.msk.f32.mxu0 %vm274_vm1, %v6791_v41  ;;  %v6108_v38 = vpop.f32.mrf.mxu1 }
 0x109   : > { %6821 = vst [vmem:[#allocation8_spill] sm:$0xff] %v6108_v38  ;;  %v1268_v6 = vpop.f32.mrf.mxu0  ;;  %v3024_v38 = vld [vmem:[#allocation2 + $0x61] sm:$0xff] }
 0x10a   : > { %v4754_v31 = vpop.f32.mrf.mxu1  ;;  %5053 = vmatmul.mubr.msk.f32.vlgmr.msra.gmra.mxu1 %vm274_vm1, %v3021_v21 }
 0x10b   : > { %v4807_v3 = vpop.f32.mrf.mxu0  ;;  %5106 = vmatmul.mubr.msk.f32.gmra.mxu0 %vm274_vm1, %v6792_v42  ;;  %v916_v30 = vadd.f32 %v4754_v31, %v5973_v58  ;;  %5055 = vmatprep.mubr.msk.f32.mxu1 %vm274_vm1, %v3022_v35 }
 0x10c   : > { %5108 = vmatprep.mubr.msk.f32.mxu0 %vm274_vm1, %v6793_v43  ;;  %v910_v41 = vpop.f32.mrf.mxu1  ;;  %v3025_v43 = vld [vmem:[#allocation2 + $0x69] sm:$0xff] }
 0x10d   : > { %v1278_v50 = vpop.f32.mrf.mxu0  ;;  %v6117_v9 = vadd.f32 %v4804_v17, %v916_v30  ;;  %v911_v29 = vadd.f32 %v910_v41, %v5979_v60  ;;  %v3026_v60 = vld [vmem:[#allocation2 + $0x79] sm:$0xff] }
 0x10e   : > { %v4757_v21 = vpop.f32.mrf.mxu1  ;;  %5056 = vmatmul.mubr.msk.f32.gmra.mxu1 %vm274_vm1, %v3023_v40 }
 0x10f   : > { %v4810_v51 = vpop.f32.mrf.mxu0  ;;  %5109 = vmatmul.mubr.msk.f32.gmra.mxu0 %vm274_vm1, %v6794_v44  ;;  %v6123_v42 = vadd.f32 %v1268_v6, %v911_v29  ;;  %v926_v58 = vadd.f32 %v4757_v21, %v5989_v0  ;;  %5058 = vmatprep.mubr.msk.f32.mxu1 %vm274_vm1, %v3024_v38 }
 0x110   : > { %5111 = vmatprep.mubr.msk.f32.mxu0 %vm274_vm1, %v6795_v45  ;;  %v920_v30 = vpop.f32.mrf.mxu1  ;;  %v3027_v45 = vld [vmem:[#allocation2 + $0x81] sm:$0xff] }
 0x111   : > { %v1288_v31 = vpop.f32.mrf.mxu0  ;;  %v6129_v35 = vadd.f32 %v4807_v3, %v926_v58  ;;  %v921_v17 = vadd.f32 %v920_v30, %v5999_v4  ;;  %v3028_v4 = vld [vmem:[#allocation2 + $0x91] sm:$0xff] }
 0x112   : > { %v4760_v40 = vpop.f32.mrf.mxu1  ;;  %5059 = vmatmul.mubr.msk.f32.gmra.mxu1 %vm274_vm1, %v3025_v43 }
 0x113   : > { %v4813_v29 = vpop.f32.mrf.mxu0  ;;  %5112 = vmatmul.mubr.msk.f32.gmra.mxu0 %vm274_vm1, %v6796_v52  ;;  %v6135_v44 = vadd.f32 %v1278_v50, %v921_v17  ;;  %v936_v0 = vadd.f32 %v4760_v40, %v6005_v12  ;;  %5061 = vmatprep.mubr.msk.f32.mxu1 %vm274_vm1, %v3026_v60 }
 0x114   : > { %5114 = vmatprep.mubr.msk.f32.mxu0 %vm274_vm1, %v6797_v53  ;;  %v930_v3 = vpop.f32.mrf.mxu1  ;;  %v3029_v53 = vld [vmem:[#allocation2 + $0x99] sm:$0xff] }
 0x115   : > { %v1298_v38 = vpop.f32.mrf.mxu0  ;;  %v6141_v6 = vadd.f32 %v4810_v51, %v936_v0  ;;  %v931_v41 = vadd.f32 %v930_v3, %v6015_v18  ;;  %v3030_v18 = vld [vmem:[#allocation2 + $0xa9] sm:$0xff] }
 0x116   : > { %v4763_v21 = vpop.f32.mrf.mxu1  ;;  %5062 = vmatmul.mubr.msk.f32.gmra.mxu1 %vm274_vm1, %v3027_v45 }
 0x117   : > { %v4816_v52 = vpop.f32.mrf.mxu0  ;;  %5115 = vmatmul.mubr.msk.f32.gmra.mxu0 %vm274_vm1, %v6798_v54  ;;  %v6147_v12 = vadd.f32 %v1288_v31, %v931_v41  ;;  %v946_v50 = vadd.f32 %v4763_v21, %v6021_v23  ;;  %5064 = vmatprep.mubr.msk.f32.mxu1 %vm274_vm1, %v3028_v4 }
 0x118   : > { %5117 = vmatprep.mubr.msk.f32.mxu0 %vm274_vm1, %v6799_v55  ;;  %v940_v51 = vpop.f32.mrf.mxu1  ;;  %v3031_v55 = vld [vmem:[#allocation2 + $0xb1] sm:$0xff] }
 0x119   : > { %v1308_v58 = vpop.f32.mrf.mxu0  ;;  %v6153_v43 = vadd.f32 %v4813_v29, %v946_v50  ;;  %v941_v30 = vadd.f32 %v940_v51, %v6031_v26  ;;  %v3032_v26 = vld [vmem:[#allocation2 + $0xc1] sm:$0xff] }
 0x11a   : > { %v4766_v60 = vpop.f32.mrf.mxu1  ;;  %5065 = vmatmul.mubr.msk.f32.gmra.mxu1 %vm274_vm1, %v3029_v53 }
 0x11b   : > { %v4819_v54 = vpop.f32.mrf.mxu0  ;;  %5118 = vmatmul.mubr.msk.f32.gmra.mxu0 %vm274_vm1, %v6800_v56  ;;  %v6159_v23 = vadd.f32 %v1298_v38, %v941_v30  ;;  %v956_v31 = vadd.f32 %v4766_v60, %v6037_v36  ;;  %5067 = vmatprep.mubr.msk.f32.mxu1 %vm274_vm1, %v3030_v18 }
 0x11c   : > { %5120 = vmatprep.mubr.msk.f32.mxu0 %vm274_vm1, %v6801_v57  ;;  %v950_v17 = vpop.f32.mrf.mxu1  ;;  %v3033_v57 = vld [vmem:[#allocation2 + $0xc9] sm:$0xff] }
 0x11d   : > { %v1318_v40 = vpop.f32.mrf.mxu0  ;;  %v6165_v29 = vadd.f32 %v4816_v52, %v956_v31  ;;  %v951_v0 = vadd.f32 %v950_v17, %v6047_v39  ;;  %v3034_v39 = vld [vmem:[#allocation2 + $0xd9] sm:$0xff] }
 0x11e   : > { %v4769_v45 = vpop.f32.mrf.mxu1  ;;  %5068 = vmatmul.mubr.msk.f32.gmra.mxu1 %vm274_vm1, %v3031_v55 }
 0x11f   : > { %v4822_v56 = vpop.f32.mrf.mxu0  ;;  %5121 = vmatmul.mubr.msk.f32.gmra.mxu0 %vm274_vm1, %v6802_v59  ;;  %v6171_v36 = vadd.f32 %v1308_v58, %v951_v0  ;;  %v966_v3 = vadd.f32 %v4769_v45, %v6053_v48  ;;  %5070 = vmatprep.mubr.msk.f32.mxu1 %vm274_vm1, %v3032_v26 }
 0x120   : > { %5123 = vmatprep.mubr.msk.f32.mxu0 %vm274_vm1, %v6803_v61  ;;  %v960_v38 = vpop.f32.mrf.mxu1  ;;  %v3035_v61 = vld [vmem:[#allocation2 + $0xe1] sm:$0xff] }
 0x121   : > { %v1328_v4 = vpop.f32.mrf.mxu0  ;;  %v6177_v41 = vadd.f32 %v4819_v54, %v966_v3  ;;  %v961_v21 = vadd.f32 %v960_v38, %v6063_v49  ;;  %v3036_v49 = vld [vmem:[#allocation2 + $0xf1] sm:$0xff] }
 0x122   : > { %v4772_v52 = vpop.f32.mrf.mxu1  ;;  %5071 = vmatmul.mubr.msk.f32.gmra.mxu1 %vm274_vm1, %v3033_v57 }
 0x123   : > { %v4825_v59 = vpop.f32.mrf.mxu0  ;;  %5124 = vmatmul.mubr.msk.f32.gmra.mxu0 %vm274_vm1, %v6804_v63  ;;  %v6183_v48 = vadd.f32 %v1318_v40, %v961_v21  ;;  %v976_v50 = vadd.f32 %v4772_v52, %v6069_v5  ;;  %5073 = vmatprep.mubr.msk.f32.mxu1 %vm274_vm1, %v3034_v39 }
 0x124   : > { %5126 = vmatprep.mubr.msk.f32.mxu0 %vm274_vm1, %v6805_v1  ;;  %v970_v53 = vpop.f32.mrf.mxu1  ;;  %v3037_v1 = vld [vmem:[#allocation2 + $0xf9] sm:$0xff] }
 0x125   : > { %v1338_v51 = vpop.f32.mrf.mxu0  ;;  %v6189_v58 = vadd.f32 %v4822_v56, %v976_v50  ;;  %v971_v18 = vadd.f32 %v970_v53, %v6078_v10  ;;  %v3038_v10 = vld [vmem:[#allocation2 + $0x109] sm:$0xff] }
 0x126   : > { %v4775_v30 = vpop.f32.mrf.mxu1  ;;  %5074 = vmatmul.mubr.msk.f32.gmra.mxu1 %vm274_vm1, %v3035_v61  ;;  %v3435_v61 = vld [vmem:[#allocation2 + $0x15a] sm:$0xff] }
 0x127   : > { %v4828_v63 = vpop.f32.mrf.mxu0  ;;  %5127 = vmatmul.mubr.msk.f32.gmra.mxu0 %vm274_vm1, %v6806_v11  ;;  %v6195_v5 = vadd.f32 %v1328_v4, %v971_v18  ;;  %v986_v60 = vadd.f32 %v4775_v30, %v6086_v32  ;;  %5076 = vmatprep.mubr.msk.f32.mxu1 %vm274_vm1, %v3036_v49  ;;  %v3436_v49 = vld [vmem:[#allocation2 + $0x16a] sm:$0xff] }
 0x128   : > { %5129 = vmatprep.mubr.msk.f32.mxu0 %vm274_vm1, %v6807_v14  ;;  %v980_v54 = vpop.f32.mrf.mxu1  ;;  %v3039_v14 = vld [vmem:[#allocation2 + $0x111] sm:$0xff] }
 0x129   : > { %v1348_v31 = vpop.f32.mrf.mxu0  ;;  %v6201_v55 = vadd.f32 %v4825_v59, %v986_v60  ;;  %v981_v17 = vadd.f32 %v980_v54, %v6097_v37  ;;  %v3040_v37 = vld [vmem:[#allocation2 + $0x121] sm:$0xff] }
 0x12a   : > { %v4778_v40 = vpop.f32.mrf.mxu1  ;;  %5077 = vmatmul.mubr.msk.f32.gmra.mxu1 %vm274_vm1, %v3037_v1  ;;  %v3437_v1 = vld [vmem:[#allocation2 + $0x172] sm:$0xff] }
 0x12b   : > { %v4831_v11 = vpop.f32.mrf.mxu0  ;;  %5130 = vmatmul.mubr.msk.f32.gmra.mxu0 %vm274_vm1, %v6808_v22  ;;  %v6207_v32 = vadd.f32 %v1338_v51, %v981_v17  ;;  %v996_v26 = vadd.f32 %v4778_v40, %v5985_v62  ;;  %5079 = vmatprep.mubr.msk.f32.mxu1 %vm274_vm1, %v3038_v10  ;;  %v3044_v51 = vld [vmem:[#allocation2 + $0x151] sm:$0xff]  ;;  %v3046_v10 = vld [vmem:[#allocation2 + $0x169] sm:$0xff] }
 0x12c   : > { %5132 = vmatprep.mubr.msk.f32.mxu0 %vm274_vm1, %v6809_v24  ;;  %v990_v0 = vpop.f32.mrf.mxu1  ;;  %v3041_v24 = vld [vmem:[#allocation2 + $0x129] sm:$0xff] }
 0x12d   : > { %v1358_v45 = vpop.f32.mrf.mxu0  ;;  %v6213_v56 = vadd.f32 %v4828_v63, %v996_v26  ;;  %v991_v3 = vadd.f32 %v990_v0, %v5997_v2  ;;  %v3042_v2 = vld [vmem:[#allocation2 + $0x139] sm:$0xff] }
 0x12e   : > { %v4781_v57 = vpop.f32.mrf.mxu1  ;;  %5080 = vmatmul.mubr.msk.f32.gmra.mxu1 %vm274_vm1, %v3039_v14  ;;  %v3047_v14 = vld [vmem:[#allocation2 + $0x171] sm:$0xff] }
 0x12f   : > { %v4834_v22 = vpop.f32.mrf.mxu0  ;;  %5133 = vmatmul.mubr.msk.f32.gmra.mxu0 %vm274_vm1, %v6810_v28  ;;  %v6219_v62 = vadd.f32 %v1348_v31, %v991_v3  ;;  %v1006_v38 = vadd.f32 %v4781_v57, %v6001_v8  ;;  %5082 = vmatprep.mubr.msk.f32.mxu1 %vm274_vm1, %v3040_v37  ;;  %v3440_v37 = vld [vmem:[#allocation2 + $0x19a] sm:$0xff] }
 0x130   : > { %5135 = vmatprep.mubr.msk.f32.mxu0 %vm274_vm1, %v6811_v34  ;;  %v1000_v4 = vpop.f32.mrf.mxu1  ;;  %v3043_v34 = vld [vmem:[#allocation2 + $0x141] sm:$0xff] }
 0x131   : > { %v1368_v39 = vpop.f32.mrf.mxu0  ;;  %v6225_v21 = vadd.f32 %v4831_v11, %v1006_v38  ;;  %v1001_v52 = vadd.f32 %v1000_v4, %v6013_v16  ;;  %v6822_v38 = vld [vmem:[#allocation3_spill] sm:$0xff]  ;;  %v6823_v4 = vld [vmem:[#allocation32_spill] sm:$0xff] }
 0x132   : > { %v4784_v59 = vpop.f32.mrf.mxu1  ;;  %5083 = vmatmul.mubr.msk.f32.gmra.mxu1 %vm274_vm1, %v3041_v24 }
 0x133   : > { %v4837_v28 = vpop.f32.mrf.mxu0  ;;  %5136 = vmatmul.mubr.msk.f32.gmra.mxu0 %vm274_vm1, %v6812_v47  ;;  %v6231_v8 = vadd.f32 %v1358_v45, %v1001_v52  ;;  %v1016_v50 = vadd.f32 %v4784_v59, %v6017_v20  ;;  %5085 = vmatprep.mubr.msk.f32.mxu1 %vm274_vm1, %v3042_v2  ;;  %v6824_v59 = vld [vmem:[#allocation4_spill] sm:$0xff] }
 0x134   : > { %5138 = vmatprep.mubr.msk.f32.mxu0 %vm274_vm1, %v6813_v25  ;;  %v1010_v53 = vpop.f32.mrf.mxu1  ;;  %v3045_v25 = vld [vmem:[#allocation2 + $0x159] sm:$0xff] }
 0x135   : > { %v1378_v16 = vpop.f32.mrf.mxu0  ;;  %v6237_v18 = vadd.f32 %v4834_v22, %v1016_v50  ;;  %v1011_v30 = vadd.f32 %v1010_v53, %v6029_v19  ;;  %v6826_v53 = vld [vmem:[#allocation5_spill] sm:$0xff] }
 0x136   : > { %v4787_v47 = vpop.f32.mrf.mxu1  ;;  %5086 = vmatmul.mubr.msk.f32.gmra.mxu1 %vm274_vm1, %v3043_v34  ;;  %v6825_v34 = vld [vmem:[#allocation33_spill] sm:$0xff] }
 0x137   : > { %v4840_v63 = vpop.f32.mrf.mxu0  ;;  %5139 = vmatmul.mubr.msk.f32.gmra.mxu0 %vm274_vm1, %v3435_v61  ;;  %v6242_v20 = vadd.f32 %v1368_v39, %v1011_v30  ;;  %v1026_v60 = vadd.f32 %v4787_v47, %v6033_v27  ;;  %5088 = vmatprep.mubr.msk.f32.mxu1 %vm274_vm1, %v3044_v51  ;;  %v3051_v51 = vld [vmem:[#allocation2 + $0x1a1] sm:$0xff] }
 0x138   : > { %5141 = vmatprep.mubr.msk.f32.mxu0 %vm274_vm1, %v3436_v49  ;;  %v1020_v54 = vpop.f32.mrf.mxu1 }
 0x139   : > { %v1388_v31 = vpop.f32.mrf.mxu0  ;;  %v6247_v19 = vadd.f32 %v4837_v28, %v1026_v60  ;;  %v1021_v17 = vadd.f32 %v1020_v54, %v6045_v13 }
 0x13a   : > { %v4790_v40 = vpop.f32.mrf.mxu1  ;;  %5089 = vmatmul.mubr.msk.f32.gmra.mxu1 %vm274_vm1, %v3045_v25 }
 0x13b   : > { %v4843_v11 = vpop.f32.mrf.mxu0  ;;  %5142 = vmatmul.mubr.msk.f32.gmra.mxu0 %vm274_vm1, %v3437_v1  ;;  %v6252_v27 = vadd.f32 %v1378_v16, %v1021_v17  ;;  %v1036_v26 = vadd.f32 %v4790_v40, %v6049_v46  ;;  %5091 = vmatprep.mubr.msk.f32.mxu1 %vm274_vm1, %v3046_v10 }
 0x13c   : > { %5144 = vmatprep.mubr.msk.f32.mxu0 %vm274_vm1, %v6080_v15  ;;  %v1030_v0 = vpop.f32.mrf.mxu1  ;;  %v3441_v15 = vld [vmem:[#allocation2 + $0x1a2] sm:$0xff] }
 0x13d   : > { %v1398_v45 = vpop.f32.mrf.mxu0  ;;  %v6258_v13 = vadd.f32 %v4840_v63, %v1036_v26  ;;  %v1031_v3 = vadd.f32 %v1030_v0, %v6061_v7  ;;  %v3050_v7 = vld [vmem:[#allocation2 + $0x199] sm:$0xff]  ;;  %v6827_v63 = vld [vmem:[#allocation6_spill] sm:$0xff] }
 0x13e   : > { %v4793_v57 = vpop.f32.mrf.mxu1  ;;  %5092 = vmatmul.mubr.msk.f32.gmra.mxu1 %vm274_vm1, %v3047_v14  ;;  %v6829_v26 = vld [vmem:[#allocation8_spill] sm:$0xff] }
 0x13f   : > { %v4846_v22 = vpop.f32.mrf.mxu0  ;;  %5145 = vmatmul.mubr.msk.f32.gmra.mxu0 %vm274_vm1, %v6091_v33  ;;  %v6264_v46 = vadd.f32 %v1388_v31, %v1031_v3  ;;  %v1046_v24 = vadd.f32 %v4793_v57, %v6822_v38  ;;  %5094 = vmatprep.mubr.msk.f32.mxu1 %vm274_vm1, %v6823_v4  ;;  %v6828_v31 = vld [vmem:[#allocation7_spill] sm:$0xff] }
 0x140   : > { %5147 = vmatprep.mubr.msk.f32.mxu0 %vm274_vm1, %v3440_v37  ;;  %v1040_v39 = vpop.f32.mrf.mxu1 }
 0x141   : > { %v1408_v2 = vpop.f32.mrf.mxu0  ;;  %v6270_v52 = vadd.f32 %v4843_v11, %v1046_v24  ;;  %v1041_v28 = vadd.f32 %v1040_v39, %v6824_v59 }
 0x142   : > { %v4796_v50 = vpop.f32.mrf.mxu1  ;;  %5095 = vmatmul.mubr.msk.f32.gmra.mxu1 %vm274_vm1, %v6825_v34 }
 0x143   : > { %v4849_v33 = vpop.f32.mrf.mxu0  ;;  %5148 = vmatmul.mubr.msk.f32.gmra.mxu0 %vm274_vm1, %v3441_v15  ;;  %v6276_v61 = vadd.f32 %v1398_v45, %v1041_v28  ;;  %v1056_v16 = vadd.f32 %v4796_v50, %v6826_v53  ;;  %5097 = vmatprep.mubr.msk.f32.mxu1 %vm274_vm1, %v3050_v7 }
 0x144   : > { %v1050_v49 = vpop.f32.mrf.mxu1 }
 0x145   : > { %v1418_v30 = vpop.f32.mrf.mxu0  ;;  %v6280_v47 = vadd.f32 %v4846_v22, %v1056_v16  ;;  %v1051_v60 = vadd.f32 %v1050_v49, %v6827_v63 }
 0x146   : > { %v4799_v25 = vpop.f32.mrf.mxu1  ;;  %5098 = vmatmul.mubr.msk.f32.gmra.mxu1 %vm274_vm1, %v3051_v51 }
 0x147   : > { %v4904_v1 = vpop.f32.mrf.mxu0  ;;  %v6284_v54 = vadd.f32 %v1408_v2, %v1051_v60  ;;  %v1066_v10 = vadd.f32 %v4799_v25, %v6828_v31 }
 0x148   : > { %v1060_v17 = vpop.f32.mrf.mxu1 }
 0x149   : > { %v2048_v40 = vpop.f32.mrf.mxu0  ;;  %v6287_v11 = vadd.f32 %v4849_v33, %v1066_v10  ;;  %v1061_v14 = vadd.f32 %v1060_v17, %v6829_v26 }
 0x14a   : > { %v4854_v0 = vpop.f32.mrf.mxu1 }
 0x14b   : > { %v4907_v45 = vpop.f32.mrf.mxu0  ;;  %v6290_v37 = vadd.f32 %v1418_v30, %v1061_v14  ;;  %v1818_v3 = vadd.f32 %v4854_v0, %v6117_v9 }
 0x14c   : > { %v1658_v57 = vpop.f32.mrf.mxu1 }
 0x14d   : > { %v2058_v22 = vpop.f32.mrf.mxu0  ;;  %v6293_v38 = vadd.f32 %v4904_v1, %v1818_v3  ;;  %v1817_v24 = vadd.f32 %v1658_v57, %v6123_v42 }
 0x14e   : > { %v4857_v4 = vpop.f32.mrf.mxu1 }
 0x14f   : > { %v4910_v15 = vpop.f32.mrf.mxu0  ;;  %v6296_v39 = vadd.f32 %v2048_v40, %v1817_v24  ;;  %v1820_v2 = vadd.f32 %v4857_v4, %v6129_v35 }
 0x150   : > { %v1668_v7 = vpop.f32.mrf.mxu1 }
 0x151   : > { %v2068_v59 = vpop.f32.mrf.mxu0  ;;  %v6299_v28 = vadd.f32 %v4907_v45, %v1820_v2  ;;  %v1819_v50 = vadd.f32 %v1668_v7, %v6135_v44 }
 0x152   : > { %v4860_v34 = vpop.f32.mrf.mxu1 }
 0x153   : > { %v4913_v9 = vpop.f32.mrf.mxu0  ;;  %v6302_v33 = vadd.f32 %v2058_v22, %v1819_v50  ;;  %v1822_v53 = vadd.f32 %v4860_v34, %v6141_v6 }
 0x154   : > { %v1678_v16 = vpop.f32.mrf.mxu1 }
 0x155   : > { %v2078_v42 = vpop.f32.mrf.mxu0  ;;  %v6305_v51 = vadd.f32 %v4910_v15, %v1822_v53  ;;  %v1821_v49 = vadd.f32 %v1678_v16, %v6147_v12 }
 0x156   : > { %v4863_v30 = vpop.f32.mrf.mxu1 }
 0x157   : > { %v4916_v35 = vpop.f32.mrf.mxu0  ;;  %v6308_v63 = vadd.f32 %v2068_v59, %v1821_v49  ;;  %v1824_v60 = vadd.f32 %v4863_v30, %v6153_v43 }
 0x158   : > { %v1688_v25 = vpop.f32.mrf.mxu1 }
 0x159   : > { %v2088_v44 = vpop.f32.mrf.mxu0  ;;  %v6311_v1 = vadd.f32 %v4913_v9, %v1824_v60  ;;  %v1823_v31 = vadd.f32 %v1688_v25, %v6159_v23 }
 0x15a   : > { %v4866_v10 = vpop.f32.mrf.mxu1 }
 0x15b   : > { %v4919_v6 = vpop.f32.mrf.mxu0  ;;  %v6314_v17 = vadd.f32 %v2078_v42, %v1823_v31  ;;  %v1826_v40 = vadd.f32 %v4866_v10, %v6165_v29 }
 0x15c   : > { %v1698_v26 = vpop.f32.mrf.mxu1 }
 0x15d   : > { %v2098_v12 = vpop.f32.mrf.mxu0  ;;  %v6317_v14 = vadd.f32 %v4916_v35, %v1826_v40  ;;  %v1825_v0 = vadd.f32 %v1698_v26, %v6171_v36 }
 0x15e   : > { %v4869_v45 = vpop.f32.mrf.mxu1 }
 0x15f   : > { %v4922_v43 = vpop.f32.mrf.mxu0  ;;  %v6320_v3 = vadd.f32 %v2088_v44, %v1825_v0  ;;  %v1828_v57 = vadd.f32 %v4869_v45, %v6177_v41 }
 0x160   : > { %v1708_v22 = vpop.f32.mrf.mxu1 }
 0x161   : > { %v2108_v23 = vpop.f32.mrf.mxu0  ;;  %v6323_v24 = vadd.f32 %v4919_v6, %v1828_v57  ;;  %v1827_v4 = vadd.f32 %v1708_v22, %v6183_v48 }
 0x162   : > { %v4872_v15 = vpop.f32.mrf.mxu1 }
 0x163   : > { %v4925_v29 = vpop.f32.mrf.mxu0  ;;  %v6326_v2 = vadd.f32 %v2098_v12, %v1827_v4  ;;  %v1830_v7 = vadd.f32 %v4872_v15, %v6189_v58 }
 0x164   : > { %v1718_v59 = vpop.f32.mrf.mxu1 }
 0x165   : > { %v2118_v36 = vpop.f32.mrf.mxu0  ;;  %v6329_v50 = vadd.f32 %v4922_v43, %v1830_v7  ;;  %v1829_v34 = vadd.f32 %v1718_v59, %v6195_v5 }
 0x166   : > { %v4875_v9 = vpop.f32.mrf.mxu1 }
 0x167   : > { %v4928_v41 = vpop.f32.mrf.mxu0  ;;  %v6332_v53 = vadd.f32 %v2108_v23, %v1829_v34  ;;  %v1832_v16 = vadd.f32 %v4875_v9, %v6201_v55 }
 0x168   : > { %v1728_v42 = vpop.f32.mrf.mxu1 }
 0x169   : > { %v2128_v48 = vpop.f32.mrf.mxu0  ;;  %v6335_v49 = vadd.f32 %v4925_v29, %v1832_v16  ;;  %v1831_v30 = vadd.f32 %v1728_v42, %v6207_v32 }
 0x16a   : > { %v4878_v35 = vpop.f32.mrf.mxu1 }
 0x16b   : > { %v4931_v58 = vpop.f32.mrf.mxu0  ;;  %v6338_v60 = vadd.f32 %v2118_v36, %v1831_v30  ;;  %v1834_v25 = vadd.f32 %v4878_v35, %v6213_v56 }
 0x16c   : > { %v1738_v44 = vpop.f32.mrf.mxu1 }
 0x16d   : > { %v2138_v5 = vpop.f32.mrf.mxu0  ;;  %v6341_v31 = vadd.f32 %v4928_v41, %v1834_v25  ;;  %v1833_v10 = vadd.f32 %v1738_v44, %v6219_v62 }
 0x16e   : > { %v4881_v6 = vpop.f32.mrf.mxu1 }
 0x16f   : > { %v4934_v55 = vpop.f32.mrf.mxu0  ;;  %v6344_v40 = vadd.f32 %v2128_v48, %v1833_v10  ;;  %v1836_v26 = vadd.f32 %v4881_v6, %v6225_v21 }
 0x170   : > { %v1748_v12 = vpop.f32.mrf.mxu1 }
 0x171   : > { %v2148_v32 = vpop.f32.mrf.mxu0  ;;  %v6347_v0 = vadd.f32 %v4931_v58, %v1836_v26  ;;  %v1835_v45 = vadd.f32 %v1748_v12, %v6231_v8 }
 0x172   : > { %v4884_v43 = vpop.f32.mrf.mxu1 }
 0x173   : > { %6830 = vst [vmem:[#allocation9_spill] sm:$0xff] %v6347_v0  ;;  %v4937_v56 = vpop.f32.mrf.mxu0  ;;  %v6350_v57 = vadd.f32 %v2138_v5, %v1835_v45  ;;  %v1838_v22 = vadd.f32 %v4884_v43, %v6237_v18 }
 0x174   : > { %v1758_v23 = vpop.f32.mrf.mxu1 }
 0x175   : > { %6831 = vst [vmem:[#allocation10_spill] sm:$0xff] %v6350_v57  ;;  %v2158_v62 = vpop.f32.mrf.mxu0  ;;  %v6353_v4 = vadd.f32 %v4934_v55, %v1838_v22  ;;  %v1837_v15 = vadd.f32 %v1758_v23, %v6242_v20 }
 0x176   : > { %v4887_v29 = vpop.f32.mrf.mxu1 }
 0x177   : > { %6832 = vst [vmem:[#allocation11_spill] sm:$0xff] %v6353_v4  ;;  %v4940_v21 = vpop.f32.mrf.mxu0  ;;  %v6356_v7 = vadd.f32 %v2148_v32, %v1837_v15  ;;  %v1840_v59 = vadd.f32 %v4887_v29, %v6247_v19 }
 0x178   : > { %v1768_v36 = vpop.f32.mrf.mxu1 }
 0x179   : > { %6833 = vst [vmem:[#allocation12_spill] sm:$0xff] %v6356_v7  ;;  %v2168_v8 = vpop.f32.mrf.mxu0  ;;  %v6359_v34 = vadd.f32 %v4937_v56, %v1840_v59  ;;  %v1839_v9 = vadd.f32 %v1768_v36, %v6252_v27 }
 0x17a   : > { %v4890_v41 = vpop.f32.mrf.mxu1 }
 0x17b   : > { %6834 = vst [vmem:[#allocation13_spill] sm:$0xff] %v6359_v34  ;;  %v4943_v18 = vpop.f32.mrf.mxu0  ;;  %v6362_v16 = vadd.f32 %v2158_v62, %v1839_v9  ;;  %v1842_v42 = vadd.f32 %v4890_v41, %v6258_v13 }
 0x17c   : > { %v1778_v48 = vpop.f32.mrf.mxu1 }
 0x17d   : > { %6835 = vst [vmem:[#allocation14_spill] sm:$0xff] %v6362_v16  ;;  %v2178_v20 = vpop.f32.mrf.mxu0  ;;  %v6365_v30 = vadd.f32 %v4940_v21, %v1842_v42  ;;  %v1841_v35 = vadd.f32 %v1778_v48, %v6264_v46 }
 0x17e   : > { %v4893_v58 = vpop.f32.mrf.mxu1 }
 0x17f   : > { %6836 = vst [vmem:[#allocation15_spill] sm:$0xff] %v6365_v30  ;;  %v4946_v19 = vpop.f32.mrf.mxu0  ;;  %v6368_v25 = vadd.f32 %v2168_v8, %v1841_v35  ;;  %v1844_v44 = vadd.f32 %v4893_v58, %v6270_v52 }
 0x180   : > { %v1788_v5 = vpop.f32.mrf.mxu1 }
 0x181   : > { %6837 = vst [vmem:[#allocation16_spill] sm:$0xff] %v6368_v25  ;;  %v2188_v27 = vpop.f32.mrf.mxu0  ;;  %v6371_v10 = vadd.f32 %v4943_v18, %v1844_v44  ;;  %v1843_v6 = vadd.f32 %v1788_v5, %v6276_v61 }
 0x182   : > { %v4896_v55 = vpop.f32.mrf.mxu1 }
 0x183   : > { %6838 = vst [vmem:[#allocation17_spill] sm:$0xff] %v6371_v10  ;;  %v4949_v13 = vpop.f32.mrf.mxu0  ;;  %v6374_v26 = vadd.f32 %v2178_v20, %v1843_v6  ;;  %v1846_v12 = vadd.f32 %v4896_v55, %v6280_v47 }
 0x184   : > { %v1798_v32 = vpop.f32.mrf.mxu1 }
 0x185   : > { %6839 = vst [vmem:[#allocation18_spill] sm:$0xff] %v6374_v26  ;;  %v2198_v46 = vpop.f32.mrf.mxu0  ;;  %v6377_v45 = vadd.f32 %v4946_v19, %v1846_v12  ;;  %v1845_v43 = vadd.f32 %v1798_v32, %v6284_v54 }
 0x186   : > { %v4899_v56 = vpop.f32.mrf.mxu1 }
 0x187   : > { %6840 = vst [vmem:[#allocation19_spill] sm:$0xff] %v6377_v45  ;;  %v6380_v52 = vpop.f32.mrf.mxu0  ;;  %v6382_v22 = vadd.f32 %v2188_v27, %v1845_v43  ;;  %v1848_v23 = vadd.f32 %v4899_v56, %v6287_v11 }
 0x188   : > { %v1808_v61 = vpop.f32.mrf.mxu1 }
 0x189   : > { %6841 = vst [vmem:[#allocation20_spill] sm:$0xff] %v6382_v22  ;;  %v6385_v62 = vpop.f32.mrf.mxu0  ;;  %v6387_v15 = vadd.f32 %v4949_v13, %v1848_v23  ;;  %v1847_v47 = vadd.f32 %v1808_v61, %v6290_v37 }
 0x18a   : > { %v4954_v29 = vpop.f32.mrf.mxu1 }
 0x18b   : > { %6842 = vst [vmem:[#allocation21_spill] sm:$0xff] %v6387_v15  ;;  %v6390_v21 = vpop.f32.mrf.mxu0  ;;  %v6392_v59 = vadd.f32 %v2198_v46, %v1847_v47 }
 0x18c   : > { %v2438_v54 = vpop.f32.mrf.mxu1 }
 0x18d   : > { %6843 = vst [vmem:[#allocation22_spill] sm:$0xff] %v6392_v59  ;;  %v6394_v36 = vpop.f32.mrf.mxu0 }
 0x18e   : > { %v6396_v8 = vpop.f32.mrf.mxu1 }
 0x18f   : > { %v6398_v9 = vpop.f32.mrf.mxu0 }
 0x190   : > { %v6400_v11 = vpop.f32.mrf.mxu1 }
 0x191   : > { %v6402_v41 = vpop.f32.mrf.mxu0 }
 0x192   : > { %v6404_v18 = vpop.f32.mrf.mxu1 }
 0x193   : > { %v6406_v42 = vpop.f32.mrf.mxu0 }
 0x194   : > { %v6408_v37 = vpop.f32.mrf.mxu1 }
 0x195   : > { %v6410_v48 = vpop.f32.mrf.mxu0 }
 0x196   : > { %v6412_v20 = vpop.f32.mrf.mxu1 }
 0x197   : > { %v6414_v35 = vpop.f32.mrf.mxu0 }
 0x198   : > { %v6416_v58 = vpop.f32.mrf.mxu1 }
 0x199   : > { %v6418_v19 = vpop.f32.mrf.mxu0 }
 0x19a   : > { %v6420_v44 = vpop.f32.mrf.mxu1 }
 0x19b   : > { %v6422_v5 = vpop.f32.mrf.mxu0 }
 0x19c   : > { %v6424_v27 = vpop.f32.mrf.mxu1 }
 0x19d   : > { %v6426_v6 = vpop.f32.mrf.mxu0 }
 0x19e   : > { %v6428_v55 = vpop.f32.mrf.mxu1 }
 0x19f   : > { %v6430_v13 = vpop.f32.mrf.mxu0 }
 0x1a0   : > { %v6432_v12 = vpop.f32.mrf.mxu1 }
 0x1a1   : > { %v6434_v32 = vpop.f32.mrf.mxu0 }
 0x1a2   : > { %v6436_v46 = vpop.f32.mrf.mxu1 }
 0x1a3   : > { %v6438_v43 = vpop.f32.mrf.mxu0 }
 0x1a4   : > { %v6440_v56 = vpop.f32.mrf.mxu1 }
 0x1a5   : > { %v6442_v23 = vpop.f32.mrf.mxu0 }
 0x1a6   : > { %v6444_v61 = vpop.f32.mrf.mxu1 }
 0x1a7   : > { %v6446_v47 = vpop.f32.mrf.mxu0 }
 0x1a8   : > { %v6448_v59 = vpop.f32.mrf.mxu1 }
 0x1a9   : > { %v6450_v15 = vpop.f32.mrf.mxu0 }
 0x1aa   : > { %6844 = vst [vmem:[#allocation23_spill] sm:$0xff] %v6450_v15  ;;  %v6452_v22 = vpop.f32.mrf.mxu1 }
 0x1ab   : > { %v6454_v45 = vpop.f32.mrf.mxu0 }
 0x1ac   : > { %6845 = vst [vmem:[#allocation24_spill] sm:$0xff] %v6454_v45  ;;  %v6456_v26 = vpop.f32.mrf.mxu1 }
 0x1ad   : > { %v6458_v10 = vpop.f32.mrf.mxu0 }
 0x1ae   : > { %6846 = vst [vmem:[#allocation25_spill] sm:$0xff] %v6458_v10  ;;  %v6460_v25 = vpop.f32.mrf.mxu1 }
 0x1af   : > { %6847 = vst [vmem:[#allocation26_spill] sm:$0xff] %v6460_v25  ;;  %v6462_v30 = vpop.f32.mrf.mxu0 }
 0x1b0   : > { %6848 = vst [vmem:[#allocation27_spill] sm:$0xff] %v6462_v30  ;;  %v6464_v16 = vpop.f32.mrf.mxu1 }
 0x1b1   : > { %6849 = vst [vmem:[#allocation28_spill] sm:$0xff] %v6464_v16  ;;  %v6466_v34 = vpop.f32.mrf.mxu0 }
 0x1b2   : > { %6850 = vst [vmem:[#allocation29_spill] sm:$0xff] %v6466_v34  ;;  %v6468_v7 = vpop.f32.mrf.mxu1 }
 0x1b3   : > { %6851 = vst [vmem:[#allocation30_spill] sm:$0xff] %v6468_v7  ;;  %v6470_v4 = vpop.f32.mrf.mxu0 }
 0x1b4   : > { %6852 = vst [vmem:[#allocation31_spill] sm:$0xff] %v6470_v4  ;;  %v6472_v57 = vpop.f32.mrf.mxu1 }
 0x1b5   : > { %6853 = vst [vmem:[#allocation3_spill] sm:$0xff] %v6472_v57  ;;  %v6474_v0 = vpop.f32.mrf.mxu0 }
 0x1b6   : > { %6854 = vst [vmem:[#allocation32_spill] sm:$0xff] %v6474_v0  ;;  %v6476_v45 = vpop.f32.mrf.mxu1 }
 0x1b7   : > { %6855 = vst [vmem:[#allocation4_spill] sm:$0xff] %v6476_v45  ;;  %v6478_v15 = vpop.f32.mrf.mxu0 }
 0x1b8   : > { %6856 = vst [vmem:[#allocation33_spill] sm:$0xff] %v6478_v15  ;;  %v6480_v10 = vpop.f32.mrf.mxu1 }
 0x1b9   : > { %6857 = vst [vmem:[#allocation5_spill] sm:$0xff] %v6480_v10  ;;  %v6482_v25 = vpop.f32.mrf.mxu0 }
 0x1ba   : > { %6858 = vst [vmem:[#allocation6_spill] sm:$0xff] %v6482_v25  ;;  %v6484_v30 = vpop.f32.mrf.mxu1 }
 0x1bb   : > { %6859 = vst [vmem:[#allocation7_spill] sm:$0xff] %v6484_v30  ;;  %v6486_v16 = vpop.f32.mrf.mxu0 }
 0x1bc   : > { %6860 = vst [vmem:[#allocation8_spill] sm:$0xff] %v6486_v16  ;;  %v6488_v34 = vpop.f32.mrf.mxu1  ;;  %v2598_v16 = vadd.f32 %v4954_v29, %v6293_v38  ;;  %v2599_v38 = vadd.f32 %v6400_v11, %v6302_v33 }
 0x1bd   : > { %6861 = vst [vmem:[#allocation34_spill] sm:$0xff] %v6488_v34  ;;  %v6490_v7 = vpop.f32.mrf.mxu0 }
 0x1be   : > { %6862 = vst [vmem:[#allocation35_spill] sm:$0xff] %v6490_v7  ;;  %v6492_v4 = vpop.f32.mrf.mxu1 }
 0x1bf   : > { %6863 = vst [vmem:[#allocation36_spill] sm:$0xff] %v6492_v4  ;;  %v6494_v57 = vpop.f32.mrf.mxu0  ;;  %v2597_v4 = vadd.f32 %v2438_v54, %v6296_v39  ;;  %v6523_v39 = vld [vmem:[%s6695_s2] ss:$0 sm:$0xff] }
 0x1c0   : > { %6864 = vst [vmem:[#allocation37_spill] sm:$0xff] %v6494_v57  ;;  %v6496_v0 = vpop.f32.mrf.mxu1 }
 0x1c1   : > { %6865 = vst [vmem:[#allocation38_spill] sm:$0xff] %v6496_v0  ;;  %v6498_v45 = vpop.f32.mrf.mxu0 }
 0x1c2   : > { %6866 = vst [vmem:[#allocation39_spill] sm:$0xff] %v6498_v45  ;;  %v6500_v15 = vpop.f32.mrf.mxu1  ;;  %v2989_v45 = vadd.f32 %v6380_v52, %v2598_v16 }
 0x1c3   : > { %6867 = vst [vmem:[#allocation40_spill] sm:$0xff] %v6500_v15  ;;  %v6502_v10 = vpop.f32.mrf.mxu0 }
 0x1c4   : > { %6868 = vst [vmem:[#allocation41_spill] sm:$0xff] %v6502_v10  ;;  %v6504_v25 = vpop.f32.mrf.mxu1  ;;  %v2600_v10 = vadd.f32 %v6396_v8, %v6299_v28  ;;  %v2602_v28 = vadd.f32 %v6404_v18, %v6305_v51 }
 0x1c5   : > { %6869 = vst [vmem:[#allocation42_spill] sm:$0xff] %v6504_v25  ;;  %v6506_v30 = vpop.f32.mrf.mxu0 }
 0x1c6   : > { %6870 = vst [vmem:[#allocation43_spill] sm:$0xff] %v6506_v30  ;;  %v6509_v34 = vpop.f32.mrf.mxu1  ;;  %v2988_v30 = vadd.f32 %v6385_v62, %v2597_v4  ;;  %v2991_v16 = vadd.f32 %v6390_v21, %v2600_v10  ;;  %v2601_v4 = vadd.f32 %v6408_v37, %v6308_v63  ;;  %v2990_v62 = vadd.f32 %v6394_v36, %v2599_v38 }
 0x1c7   : > { %6871 = vst [vmem:[#allocation44_spill] sm:$0xff] %v6509_v34  ;;  %v5104_v7 = vpop.f32.mrf.mxu0  ;;  %v2604_v63 = vadd.f32 %v6412_v20, %v6311_v1  ;;  %v2993_v18 = vadd.f32 %v6398_v9, %v2602_v28 }
 0x1c8   : > { %v6512_v57 = vpop.f32.mrf.mxu1  ;;  %v2992_v37 = vadd.f32 %v6402_v41, %v2601_v4 }
 0x1c9   : > { %6872 = vst [vmem:[#allocation45_spill] sm:$0xff] %v6512_v57  ;;  %v3609_v0 = vpop.f32.mrf.mxu0 }
 0x1ca   : > { %v5054_v15 = vpop.f32.mrf.mxu1 }
 0x1cb   : > { %v5107_v25 = vpop.f32.mrf.mxu0  ;;  %v3379_v29 = vadd.f32 %v5054_v15, %v2989_v45 }
 0x1cc   : > { %v3219_v54 = vpop.f32.mrf.mxu1 }
 0x1cd   : > { %v3619_v57 = vpop.f32.mrf.mxu0  ;;  %v3769_v52 = vadd.f32 %v5104_v7, %v3379_v29  ;;  %v3378_v34 = vadd.f32 %v3219_v54, %v2988_v30 }
 0x1ce   : > { %v5057_v33 = vpop.f32.mrf.mxu1 }
 0x1cf   : > { %v5110_v45 = vpop.f32.mrf.mxu0  ;;  %v3808_v7 = vadd.f32 %v6523_v39, %v3769_v52  ;;  %v3768_v30 = vadd.f32 %v3609_v0, %v3378_v34  ;;  %v3381_v10 = vadd.f32 %v5057_v33, %v2991_v16  ;;  %v2603_v0 = vadd.f32 %v6416_v58, %v6314_v17 }
 0x1d0   : > { %v3229_v51 = vpop.f32.mrf.mxu1  ;;  %v2995_v52 = vadd.f32 %v6406_v42, %v2604_v63  ;;  %v2605_v33 = vadd.f32 %v6424_v27, %v6320_v3 }
 0x1d1   : > { %v3629_v15 = vpop.f32.mrf.mxu0  ;;  %3948 = vst [vmem:[%s6535_s24 + $0x8] sm:$0xff] %v3808_v7  ;;  %v3807_v21 = vadd.f32 %v6523_v39, %v3768_v30  ;;  %v3771_v8 = vadd.f32 %v5107_v25, %v3381_v10  ;;  %v3380_v11 = vadd.f32 %v3229_v51, %v2990_v62  ;;  %v3878_v34 = vmul.f32 %v3808_v7, %v3808_v7 }
 0x1d2   : > { %v5060_v36 = vpop.f32.mrf.mxu1  ;;  %v2606_v25 = vadd.f32 %v6420_v44, %v6317_v14  ;;  %v2994_v4 = vadd.f32 %v6410_v48, %v2603_v0  ;;  %v2608_v51 = vadd.f32 %v6428_v55, %v6323_v24 }
 0x1d3   : > { %v5113_v38 = vpop.f32.mrf.mxu0  ;;  %v3839_v29 = vadd.f32 %v3808_v7, %v3807_v21  ;;  %v3877_v54 = vmul.f32 %v3807_v21, %v3807_v21  ;;  %3947 = vst [vmem:[%s6535_s24] sm:$0xff] %v3807_v21  ;;  %v3810_v1 = vadd.f32 %v6523_v39, %v3771_v8  ;;  %v3770_v20 = vadd.f32 %v3619_v57, %v3380_v11 }
 0x1d4   : > { %v3383_v9 = vadd.f32 %v5060_v36, %v2993_v18  ;;  %v3239_v16 = vpop.f32.mrf.mxu1  ;;  %v2997_v42 = vadd.f32 %v6414_v35, %v2606_v25  ;;  %v2996_v18 = vadd.f32 %v6418_v19, %v2605_v33  ;;  %v2610_v35 = vadd.f32 %v6436_v46, %v6329_v50 }
 0x1d5   : > { %v3639_v41 = vpop.f32.mrf.mxu0  ;;  %v3909_v28 = vadd.f32 %v3878_v34, %v3877_v54  ;;  %3950 = vst [vmem:[%s6535_s24 + $0x18] sm:$0xff] %v3810_v1  ;;  %v3809_v17 = vadd.f32 %v6523_v39, %v3770_v20  ;;  %v3382_v58 = vadd.f32 %v3239_v16, %v2992_v37  ;;  %v3880_v63 = vmul.f32 %v3810_v1, %v3810_v1 }
 0x1d6   : > { %v3773_v57 = vadd.f32 %v5110_v45, %v3383_v9  ;;  %v5063_v62 = vpop.f32.mrf.mxu1  ;;  %v2609_v19 = vadd.f32 %v6440_v56, %v6332_v53 }
 0x1d7   : > { %v5116_v7 = vpop.f32.mrf.mxu0  ;;  %v3840_v14 = vadd.f32 %v3839_v29, %v3809_v17  ;;  %v3879_v44 = vmul.f32 %v3809_v17, %v3809_v17  ;;  %3949 = vst [vmem:[%s6535_s24 + $0x10] sm:$0xff] %v3809_v17  ;;  %v3772_v30 = vadd.f32 %v3629_v15, %v3382_v58  ;;  %v3385_v10 = vadd.f32 %v5063_v62, %v2995_v52 }
 0x1d8   : > { %v3812_v48 = vadd.f32 %v6523_v39, %v3773_v57  ;;  %v3249_v21 = vpop.f32.mrf.mxu1  ;;  %v2607_v15 = vadd.f32 %v6432_v12, %v6326_v2  ;;  %v3001_v17 = vadd.f32 %v6430_v13, %v2610_v35  ;;  %v3000_v58 = vadd.f32 %v6434_v32, %v2609_v19 }
 0x1d9   : > { %v3649_v3 = vpop.f32.mrf.mxu0  ;;  %v3910_v27 = vadd.f32 %v3909_v28, %v3879_v44  ;;  %v3811_v45 = vadd.f32 %v6523_v39, %v3772_v30  ;;  %v3841_v8 = vadd.f32 %v3840_v14, %v3810_v1  ;;  %v3775_v11 = vadd.f32 %v5113_v38, %v3385_v10 }
 0x1da   : > { %3952 = vst [vmem:[%s6535_s24 + $0x28] sm:$0xff] %v3812_v48  ;;  %v3384_v24 = vadd.f32 %v3249_v21, %v2994_v4  ;;  %v5066_v55 = vpop.f32.mrf.mxu1  ;;  %v2999_v38 = vadd.f32 %v6422_v5, %v2608_v51  ;;  %v3882_v46 = vmul.f32 %v3812_v48, %v3812_v48  ;;  %v2998_v9 = vadd.f32 %v6426_v6, %v2607_v15 }
 0x1db   : > { %v5119_v37 = vpop.f32.mrf.mxu0  ;;  %v3842_v0 = vadd.f32 %v3841_v8, %v3811_v45  ;;  %v3881_v34 = vmul.f32 %v3811_v45, %v3811_v45  ;;  %v3911_v36 = vadd.f32 %v3910_v27, %v3880_v63  ;;  %3951 = vst [vmem:[%s6535_s24 + $0x20] sm:$0xff] %v3811_v45  ;;  %v3814_v29 = vadd.f32 %v6523_v39, %v3775_v11 }
 0x1dc   : > { %v3774_v2 = vadd.f32 %v3639_v41, %v3384_v24  ;;  %v3387_v12 = vadd.f32 %v5066_v55, %v2997_v42  ;;  %v3259_v54 = vpop.f32.mrf.mxu1  ;;  %v2611_v30 = vadd.f32 %v6448_v59, %v6338_v60  ;;  %v2613_v27 = vadd.f32 %v6456_v26, %v6344_v40 }
 0x1dd   : > { %v3659_v50 = vpop.f32.mrf.mxu0  ;;  %v3912_v1 = vadd.f32 %v3911_v36, %v3881_v34  ;;  %3954 = vst [vmem:[%s6535_s24 + $0x38] sm:$0xff] %v3814_v29  ;;  %v3843_v20 = vadd.f32 %v3842_v0, %v3812_v48  ;;  %v3386_v25 = vadd.f32 %v3259_v54, %v2996_v18  ;;  %v3884_v10 = vmul.f32 %v3814_v29, %v3814_v29  ;;  %v6874_v54 = vld [vmem:[#allocation9_spill] sm:$0xff] }
 0x1de   : > { %v3813_v16 = vadd.f32 %v6523_v39, %v3774_v2  ;;  %v3777_v52 = vadd.f32 %v5116_v7, %v3387_v12  ;;  %v5069_v28 = vpop.f32.mrf.mxu1  ;;  %v2612_v7 = vadd.f32 %v6444_v61, %v6335_v49  ;;  %v2614_v61 = vadd.f32 %v6452_v22, %v6341_v31 }
 0x1df   : > { %v5122_v5 = vpop.f32.mrf.mxu0  ;;  %v3913_v53 = vadd.f32 %v3912_v1, %v3882_v46  ;;  %v3776_v56 = vadd.f32 %v3649_v3, %v3386_v25  ;;  %v3389_v41 = vadd.f32 %v5069_v28, %v2999_v38  ;;  %v3002_v24 = vadd.f32 %v6442_v23, %v2611_v30 }
 0x1e0   : > { %v3844_v4 = vadd.f32 %v3843_v20, %v3813_v16  ;;  %v3883_v33 = vmul.f32 %v3813_v16, %v3813_v16  ;;  %3953 = vst [vmem:[%s6535_s24 + $0x30] sm:$0xff] %v3813_v16  ;;  %v3816_v57 = vadd.f32 %v6523_v39, %v3777_v52  ;;  %v3269_v6 = vpop.f32.mrf.mxu1  ;;  %v3003_v11 = vadd.f32 %v6438_v43, %v2612_v7  ;;  %v6877_v16 = vld [vmem:[#allocation28_spill] sm:$0xff]  ;;  %v6881_v7 = vld [vmem:[#allocation3_spill] sm:$0xff] }
 0x1e1   : > { %v3669_v62 = vpop.f32.mrf.mxu0  ;;  %v3815_v14 = vadd.f32 %v6523_v39, %v3776_v56  ;;  %v3779_v13 = vadd.f32 %v5119_v37, %v3389_v41  ;;  %v3388_v44 = vadd.f32 %v3269_v6, %v2998_v9  ;;  %v3005_v43 = vadd.f32 %v6446_v47, %v2614_v61  ;;  %v6876_v9 = vld [vmem:[#allocation10_spill] sm:$0xff] }
 0x1e2   : > { %v3914_v32 = vadd.f32 %v3913_v53, %v3883_v33  ;;  %3956 = vst [vmem:[%s6535_s24 + $0x48] sm:$0xff] %v3816_v57  ;;  %v3845_v42 = vadd.f32 %v3844_v4, %v3814_v29  ;;  %v5072_v51 = vpop.f32.mrf.mxu1  ;;  %v3886_v55 = vmul.f32 %v3816_v57, %v3816_v57  ;;  %v6873_v29 = vld [vmem:[#allocation23_spill] sm:$0xff]  ;;  %v2615_v52 = vadd.f32 %v6877_v16, %v6876_v9 }
 0x1e3   : > { %v5125_v63 = vpop.f32.mrf.mxu0  ;;  %v3885_v48 = vmul.f32 %v3815_v14, %v3815_v14  ;;  %3955 = vst [vmem:[%s6535_s24 + $0x40] sm:$0xff] %v3815_v14  ;;  %v3818_v21 = vadd.f32 %v6523_v39, %v3779_v13  ;;  %v3778_v3 = vadd.f32 %v3659_v50, %v3388_v44  ;;  %v3391_v49 = vadd.f32 %v5072_v51, %v3001_v17  ;;  %v6875_v50 = vld [vmem:[#allocation26_spill] sm:$0xff]  ;;  %v6878_v33 = vld [vmem:[#allocation11_spill] sm:$0xff] }
 0x1e4   : > { %v3846_v60 = vadd.f32 %v3845_v42, %v3815_v14  ;;  %v3915_v59 = vadd.f32 %v3914_v32, %v3884_v10  ;;  %v3279_v45 = vpop.f32.mrf.mxu1  ;;  %v3004_v38 = vadd.f32 %v6873_v29, %v2613_v27  ;;  %v2616_v46 = vadd.f32 %v6875_v50, %v6874_v54  ;;  %v6882_v32 = vld [vmem:[#allocation24_spill] sm:$0xff]  ;;  %v6890_v16 = vld [vmem:[#allocation15_spill] sm:$0xff] }
 0x1e5   : > { %v3679_v8 = vpop.f32.mrf.mxu0  ;;  %3958 = vst [vmem:[%s6535_s24 + $0x58] sm:$0xff] %v3818_v21  ;;  %v3817_v18 = vadd.f32 %v6523_v39, %v3778_v3  ;;  %v3781_v15 = vadd.f32 %v5122_v5, %v3391_v49  ;;  %v3390_v35 = vadd.f32 %v3279_v45, %v3000_v58  ;;  %v3888_v28 = vmul.f32 %v3818_v21, %v3818_v21 }
 0x1e6   : > { %v3916_v37 = vadd.f32 %v3915_v59, %v3885_v48  ;;  %v3847_v31 = vadd.f32 %v3846_v60, %v3816_v57  ;;  %v5075_v22 = vpop.f32.mrf.mxu1  ;;  %v6879_v57 = vld [vmem:[#allocation30_spill] sm:$0xff]  ;;  %v3007_v42 = vadd.f32 %v6882_v32, %v2616_v46 }
 0x1e7   : > { %v5128_v40 = vpop.f32.mrf.mxu0  ;;  %v3887_v26 = vmul.f32 %v3817_v18, %v3817_v18  ;;  %3957 = vst [vmem:[%s6535_s24 + $0x50] sm:$0xff] %v3817_v18  ;;  %v3820_v0 = vadd.f32 %v6523_v39, %v3781_v15  ;;  %v3780_v34 = vadd.f32 %v3669_v62, %v3390_v35  ;;  %v3393_v36 = vadd.f32 %v5075_v22, %v3003_v11  ;;  %v6880_v62 = vld [vmem:[#allocation12_spill] sm:$0xff]  ;;  %v6884_v15 = vld [vmem:[#allocation27_spill] sm:$0xff] }
 0x1e8   : > { %v3848_v19 = vadd.f32 %v3847_v31, %v3817_v18  ;;  %v3917_v2 = vadd.f32 %v3916_v37, %v3886_v55  ;;  %v3289_v23 = vpop.f32.mrf.mxu1  ;;  %v2618_v6 = vadd.f32 %v6879_v57, %v6878_v33  ;;  %v2617_v14 = vadd.f32 %v6881_v7, %v6880_v62  ;;  %v6895_v7 = vld [vmem:[#allocation32_spill] sm:$0xff] }
 0x1e9   : > { %v3689_v12 = vpop.f32.mrf.mxu0  ;;  %3960 = vst [vmem:[%s6535_s24 + $0x68] sm:$0xff] %v3820_v0  ;;  %v3819_v1 = vadd.f32 %v6523_v39, %v3780_v34  ;;  %v3783_v20 = vadd.f32 %v5125_v63, %v3393_v36  ;;  %v3392_v25 = vadd.f32 %v3289_v23, %v3002_v24  ;;  %v3890_v49 = vmul.f32 %v3820_v0, %v3820_v0  ;;  %v6885_v24 = vld [vmem:[#allocation29_spill] sm:$0xff]  ;;  %v6887_v34 = vld [vmem:[#allocation4_spill] sm:$0xff] }
 0x1ea   : > { %v3918_v47 = vadd.f32 %v3917_v2, %v3887_v26  ;;  %v3849_v5 = vadd.f32 %v3848_v19, %v3818_v21  ;;  %v5078_v17 = vpop.f32.mrf.mxu1  ;;  %v6883_v21 = vld [vmem:[#allocation25_spill] sm:$0xff]  ;;  %v3009_v35 = vadd.f32 %v6884_v15, %v2618_v6  ;;  %v3008_v55 = vadd.f32 %v6885_v24, %v2617_v14 }
 0x1eb   : > { %v5131_v53 = vpop.f32.mrf.mxu0  ;;  %v3889_v56 = vmul.f32 %v3819_v1, %v3819_v1  ;;  %3959 = vst [vmem:[%s6535_s24 + $0x60] sm:$0xff] %v3819_v1  ;;  %v3822_v41 = vadd.f32 %v6523_v39, %v3783_v20  ;;  %v3782_v58 = vadd.f32 %v3679_v8, %v3392_v25  ;;  %v3395_v4 = vadd.f32 %v5078_v17, %v3005_v43  ;;  %v6886_v26 = vld [vmem:[#allocation13_spill] sm:$0xff] }
 0x1ec   : > { %v3850_v13 = vadd.f32 %v3849_v5, %v3819_v1  ;;  %v3919_v44 = vadd.f32 %v3918_v47, %v3888_v28  ;;  %v3299_v30 = vpop.f32.mrf.mxu1  ;;  %v3006_v3 = vadd.f32 %v6883_v21, %v2615_v52  ;;  %v6889_v19 = vld [vmem:[#allocation5_spill] sm:$0xff]  ;;  %v6891_v52 = vld [vmem:[#allocation7_spill] sm:$0xff]  ;;  %v6892_v47 = vld [vmem:[#allocation16_spill] sm:$0xff] }
 0x1ed   : > { %v3699_v10 = vpop.f32.mrf.mxu0  ;;  %3962 = vst [vmem:[%s6535_s24 + $0x78] sm:$0xff] %v3822_v41  ;;  %v3821_v51 = vadd.f32 %v6523_v39, %v3782_v58  ;;  %v3785_v63 = vadd.f32 %v5128_v40, %v3395_v4  ;;  %v3394_v48 = vadd.f32 %v3299_v30, %v3004_v38  ;;  %v6888_v38 = vld [vmem:[#allocation14_spill] sm:$0xff]  ;;  %v3892_v23 = vmul.f32 %v3822_v41, %v3822_v41  ;;  %v6896_v21 = vld [vmem:[#allocation33_spill] sm:$0xff] }
 0x1ee   : > { %v3920_v61 = vadd.f32 %v3919_v44, %v3889_v56  ;;  %v3851_v27 = vadd.f32 %v3850_v13, %v3820_v0  ;;  %v5081_v60 = vpop.f32.mrf.mxu1  ;;  %v2620_v0 = vadd.f32 %v6887_v34, %v6886_v26  ;;  %v2619_v2 = vadd.f32 %v6889_v19, %v6888_v38  ;;  %v6893_v5 = vld [vmem:[#allocation34_spill] sm:$0xff]  ;;  %v6902_v19 = vld [vmem:[#allocation19_spill] sm:$0xff] }
 0x1ef   : > { %v5134_v59 = vpop.f32.mrf.mxu0  ;;  %v3891_v45 = vmul.f32 %v3821_v51, %v3821_v51  ;;  %3961 = vst [vmem:[%s6535_s24 + $0x70] sm:$0xff] %v3821_v51  ;;  %v3824_v8 = vadd.f32 %v6523_v39, %v3785_v63  ;;  %v3784_v11 = vadd.f32 %v3689_v12, %v3394_v48  ;;  %v3397_v18 = vadd.f32 %v5081_v60, %v3007_v42 }
 0x1f0   : > { %v3852_v37 = vadd.f32 %v3851_v27, %v3821_v51  ;;  %v3921_v31 = vadd.f32 %v3920_v61, %v3890_v49  ;;  %v3309_v22 = vpop.f32.mrf.mxu1  ;;  %v2622_v28 = vadd.f32 %v6891_v52, %v6890_v16  ;;  %v2621_v17 = vadd.f32 %v6893_v5, %v6892_v47  ;;  %v6897_v49 = vld [vmem:[#allocation6_spill] sm:$0xff]  ;;  %v6907_v5 = vld [vmem:[#allocation35_spill] sm:$0xff] }
 0x1f1   : > { %v3709_v40 = vpop.f32.mrf.mxu0  ;;  %3964 = vst [vmem:[%s6535_s24 + $0x88] sm:$0xff] %v3824_v8  ;;  %v3823_v36 = vadd.f32 %v6523_v39, %v3784_v11  ;;  %v3787_v43 = vadd.f32 %v5131_v53, %v3397_v18  ;;  %v3396_v29 = vadd.f32 %v3309_v22, %v3006_v3  ;;  %v3010_v14 = vadd.f32 %v6895_v7, %v2619_v2  ;;  %v6898_v11 = vld [vmem:[#allocation17_spill] sm:$0xff]  ;;  %v6899_v18 = vld [vmem:[#allocation36_spill] sm:$0xff] }
 0x1f2   : > { %v3922_v12 = vadd.f32 %v3921_v31, %v3891_v45  ;;  %v3853_v54 = vadd.f32 %v3852_v37, %v3822_v41  ;;  %v5084_v50 = vpop.f32.mrf.mxu1  ;;  %v6894_v41 = vld [vmem:[#allocation31_spill] sm:$0xff]  ;;  %v3894_v13 = vmul.f32 %v3824_v8, %v3824_v8  ;;  %v3013_v3 = vadd.f32 %v6896_v21, %v2622_v28  ;;  %v6901_v37 = vld [vmem:[#allocation38_spill] sm:$0xff]  ;;  %v6903_v2 = vld [vmem:[#allocation40_spill] sm:$0xff] }
 0x1f3   : > { %v5137_v46 = vpop.f32.mrf.mxu0  ;;  %v3893_v1 = vmul.f32 %v3823_v36, %v3823_v36  ;;  %3963 = vst [vmem:[%s6535_s24 + $0x80] sm:$0xff] %v3823_v36  ;;  %v3826_v20 = vadd.f32 %v6523_v39, %v3787_v43  ;;  %v3786_v25 = vadd.f32 %v3699_v10, %v3396_v29  ;;  %v3399_v9 = vadd.f32 %v5084_v50, %v3009_v35  ;;  %v6908_v7 = vld [vmem:[#allocation37_spill] sm:$0xff] }
 0x1f4   : > { %v3854_v53 = vadd.f32 %v3853_v54, %v3823_v36  ;;  %v3923_v56 = vadd.f32 %v3922_v12, %v3892_v23  ;;  %v3319_v58 = vpop.f32.mrf.mxu1  ;;  %v3011_v33 = vadd.f32 %v6894_v41, %v2620_v0  ;;  %v3012_v61 = vadd.f32 %v6897_v49, %v2621_v17  ;;  %v6904_v12 = vld [vmem:[#allocation20_spill] sm:$0xff]  ;;  %v6905_v54 = vld [vmem:[#allocation42_spill] sm:$0xff] }
 0x1f5   : > { %v3719_v4 = vpop.f32.mrf.mxu0  ;;  %3966 = vst [vmem:[%s6535_s24 + $0x98] sm:$0xff] %v3826_v20  ;;  %v3825_v57 = vadd.f32 %v6523_v39, %v3786_v25  ;;  %v3789_v6 = vadd.f32 %v5134_v59, %v3399_v9  ;;  %v3398_v62 = vadd.f32 %v3319_v58, %v3008_v55  ;;  %v6900_v55 = vld [vmem:[#allocation18_spill] sm:$0xff]  ;;  %v3896_v22 = vmul.f32 %v3826_v20, %v3826_v20 }
 0x1f6   : > { %v3924_v44 = vadd.f32 %v3923_v56, %v3893_v1  ;;  %v3855_v30 = vadd.f32 %v3854_v53, %v3824_v8  ;;  %v5087_v10 = vpop.f32.mrf.mxu1  ;;  %v2624_v8 = vadd.f32 %v6899_v18, %v6898_v11  ;;  %v2623_v31 = vadd.f32 %v6901_v37, %v6900_v55  ;;  %v6912_v49 = vld [vmem:[#allocation22_spill] sm:$0xff] }
 0x1f7   : > { %v5140_v32 = vpop.f32.mrf.mxu0  ;;  %v3895_v42 = vmul.f32 %v3825_v57, %v3825_v57  ;;  %3965 = vst [vmem:[%s6535_s24 + $0x90] sm:$0xff] %v3825_v57  ;;  %v3828_v51 = vadd.f32 %v6523_v39, %v3789_v6  ;;  %v3788_v63 = vadd.f32 %v3709_v40, %v3398_v62  ;;  %v3401_v48 = vadd.f32 %v5087_v10, %v3011_v33 }
 0x1f8   : > { %v3856_v27 = vadd.f32 %v3855_v30, %v3825_v57  ;;  %v3925_v60 = vadd.f32 %v3924_v44, %v3894_v13  ;;  %v3329_v59 = vpop.f32.mrf.mxu1  ;;  %v2626_v23 = vadd.f32 %v6903_v2, %v6902_v19  ;;  %v2625_v50 = vadd.f32 %v6905_v54, %v6904_v12  ;;  %v6909_v13 = vld [vmem:[#allocation39_spill] sm:$0xff] }
 0x1f9   : > { %v3729_v45 = vpop.f32.mrf.mxu0  ;;  %3968 = vst [vmem:[%s6535_s24 + $0xa8] sm:$0xff] %v3828_v51  ;;  %v3827_v15 = vadd.f32 %v6523_v39, %v3788_v63  ;;  %v3791_v35 = vadd.f32 %v5137_v46, %v3401_v48  ;;  %v3400_v24 = vadd.f32 %v3329_v59, %v3010_v14  ;;  %v3014_v17 = vadd.f32 %v6907_v5, %v2623_v31  ;;  %v6911_v63 = vld [vmem:[#allocation44_spill] sm:$0xff] }
 0x1fa   : > { %v3926_v40 = vadd.f32 %v3925_v60, %v3895_v42  ;;  %v3857_v26 = vadd.f32 %v3856_v27, %v3826_v20  ;;  %v5090_v34 = vpop.f32.mrf.mxu1  ;;  %v6906_v20 = vld [vmem:[#allocation8_spill] sm:$0xff]  ;;  %v3898_v53 = vmul.f32 %v3828_v51, %v3828_v51  ;;  %v3017_v14 = vadd.f32 %v6908_v7, %v2626_v23  ;;  %v6910_v42 = vld [vmem:[#allocation21_spill] sm:$0xff] }
 0x1fb   : > { %v5143_v0 = vpop.f32.mrf.mxu0  ;;  %v3897_v36 = vmul.f32 %v3827_v15, %v3827_v15  ;;  %3967 = vst [vmem:[%s6535_s24 + $0xa0] sm:$0xff] %v3827_v15  ;;  %v3830_v43 = vadd.f32 %v6523_v39, %v3791_v35  ;;  %v3790_v29 = vadd.f32 %v3719_v4, %v3400_v24  ;;  %v3403_v38 = vadd.f32 %v5090_v34, %v3013_v3 }
 0x1fc   : > { %v3858_v46 = vadd.f32 %v3857_v26, %v3827_v15  ;;  %v3927_v1 = vadd.f32 %v3926_v40, %v3896_v22  ;;  %v3339_v25 = vpop.f32.mrf.mxu1  ;;  %v3015_v16 = vadd.f32 %v6906_v20, %v2624_v8  ;;  %v3016_v44 = vadd.f32 %v6909_v13, %v2625_v50  ;;  %v6914_v22 = vld [vmem:[#allocation41_spill] sm:$0xff] }
 0x1fd   : > { %v3739_v9 = vpop.f32.mrf.mxu0  ;;  %3970 = vst [vmem:[%s6535_s24 + $0xb8] sm:$0xff] %v3830_v43  ;;  %v3829_v52 = vadd.f32 %v6523_v39, %v3790_v29  ;;  %v3793_v28 = vadd.f32 %v5140_v32, %v3403_v38  ;;  %v3402_v47 = vadd.f32 %v3339_v25, %v3012_v61  ;;  %v2628_v48 = vadd.f32 %v6911_v63, %v6910_v42  ;;  %v6913_v61 = vld [vmem:[#allocation45_spill] sm:$0xff] }
 0x1fe   : > { %v3928_v56 = vadd.f32 %v3927_v1, %v3897_v36  ;;  %v3859_v58 = vadd.f32 %v3858_v46, %v3828_v51  ;;  %v5093_v4 = vpop.f32.mrf.mxu1  ;;  %v2627_v27 = vadd.f32 %v6913_v61, %v6912_v49  ;;  %v3900_v60 = vmul.f32 %v3830_v43, %v3830_v43  ;;  %v6915_v36 = vld [vmem:[#allocation43_spill] sm:$0xff] }
 0x1ff   : > { %v5146_v41 = vpop.f32.mrf.mxu0  ;;  %v3899_v33 = vmul.f32 %v3829_v52, %v3829_v52  ;;  %3969 = vst [vmem:[%s6535_s24 + $0xb0] sm:$0xff] %v3829_v52  ;;  %v3832_v57 = vadd.f32 %v6523_v39, %v3793_v28  ;;  %v3792_v6 = vadd.f32 %v3729_v45, %v3402_v47  ;;  %v3405_v62 = vadd.f32 %v5093_v4, %v3015_v16 }
 0x200   : > { %v3860_v30 = vadd.f32 %v3859_v58, %v3829_v52  ;;  %v3929_v10 = vadd.f32 %v3928_v56, %v3898_v53  ;;  %v3349_v32 = vpop.f32.mrf.mxu1  ;;  %v3019_v40 = vadd.f32 %v6914_v22, %v2628_v48 }
 0x201   : > { %3972 = vst [vmem:[%s6535_s24 + $0xc8] sm:$0xff] %v3832_v57  ;;  %v3831_v51 = vadd.f32 %v6523_v39, %v3792_v6  ;;  %v3795_v21 = vadd.f32 %v5143_v0, %v3405_v62  ;;  %v3404_v3 = vadd.f32 %v3349_v32, %v3014_v17  ;;  %v3749_v18 = vpop.f32.mrf.mxu0  ;;  %v3902_v29 = vmul.f32 %v3832_v57, %v3832_v57 }
 0x202   : > { %v3930_v59 = vadd.f32 %v3929_v10, %v3899_v33  ;;  %v3861_v45 = vadd.f32 %v3860_v30, %v3830_v43  ;;  %v5096_v11 = vpop.f32.mrf.mxu1  ;;  %v3018_v43 = vadd.f32 %v6915_v36, %v2627_v27 }
 0x203   : > { %v3901_v8 = vmul.f32 %v3831_v51, %v3831_v51  ;;  %3971 = vst [vmem:[%s6535_s24 + $0xc0] sm:$0xff] %v3831_v51  ;;  %v3834_v15 = vadd.f32 %v6523_v39, %v3795_v21  ;;  %v3794_v35 = vadd.f32 %v3739_v9, %v3404_v3  ;;  %v3407_v24 = vadd.f32 %v5096_v11, %v3017_v14  ;;  %v5149_v23 = vpop.f32.mrf.mxu0 }
 0x204   : > { %v3862_v55 = vadd.f32 %v3861_v45, %v3831_v51  ;;  %v3931_v37 = vadd.f32 %v3930_v59, %v3900_v60  ;;  %v3359_v31 = vpop.f32.mrf.mxu1 }
 0x205   : > { %3974 = vst [vmem:[%s6535_s24 + $0xd8] sm:$0xff] %v3834_v15  ;;  %v3833_v26 = vadd.f32 %v6523_v39, %v3794_v35  ;;  %v3797_v34 = vadd.f32 %v5146_v41, %v3407_v24  ;;  %v3406_v0 = vadd.f32 %v3359_v31, %v3016_v44  ;;  %v3904_v28 = vmul.f32 %v3834_v15, %v3834_v15  ;;  %v3759_v17 = vpop.f32.mrf.mxu0 }
 0x206   : > { %v3932_v38 = vadd.f32 %v3931_v37, %v3901_v8  ;;  %v3863_v19 = vadd.f32 %v3862_v55, %v3832_v57  ;;  %v5099_v2 = vpop.f32.mrf.mxu1 }
 0x207   : > { %v3903_v12 = vmul.f32 %v3833_v26, %v3833_v26  ;;  %3973 = vst [vmem:[%s6535_s24 + $0xd0] sm:$0xff] %v3833_v26  ;;  %v3836_v54 = vadd.f32 %v6523_v39, %v3797_v34  ;;  %v3796_v50 = vadd.f32 %v3749_v18, %v3406_v0  ;;  %v3409_v46 = vadd.f32 %v5099_v2, %v3019_v40 }
 0x208   : > { %v3864_v1 = vadd.f32 %v3863_v19, %v3833_v26  ;;  %v3933_v25 = vadd.f32 %v3932_v38, %v3902_v29  ;;  %v3369_v9 = vpop.f32.mrf.mxu1 }
 0x209   : > { %3976 = vst [vmem:[%s6535_s24 + $0xe8] sm:$0xff] %v3836_v54  ;;  %v3835_v20 = vadd.f32 %v6523_v39, %v3796_v50  ;;  %v3799_v16 = vadd.f32 %v5149_v23, %v3409_v46  ;;  %v3408_v52 = vadd.f32 %v3369_v9, %v3018_v43  ;;  %v3906_v57 = vmul.f32 %v3836_v54, %v3836_v54 }
 0x20a   : > { %v3934_v47 = vadd.f32 %v3933_v25, %v3903_v12  ;;  %v3865_v5 = vadd.f32 %v3864_v1, %v3834_v15 }
 0x20b   : > { %v3905_v53 = vmul.f32 %v3835_v20, %v3835_v20  ;;  %3975 = vst [vmem:[%s6535_s24 + $0xe0] sm:$0xff] %v3835_v20  ;;  %v3838_v56 = vadd.f32 %v6523_v39, %v3799_v16  ;;  %v3798_v58 = vadd.f32 %v3759_v17, %v3408_v52 }
 0x20c   : > { %v3866_v4 = vadd.f32 %v3865_v5, %v3835_v20  ;;  %v3935_v41 = vadd.f32 %v3934_v47, %v3904_v28 }
 0x20d   : > { %3978 = vst [vmem:[%s6535_s24 + $0xf8] sm:$0xff] %v3838_v56  ;;  %v3837_v33 = vadd.f32 %v6523_v39, %v3798_v58  ;;  %v3908_v44 = vmul.f32 %v3838_v56, %v3838_v56 }
 0x20e   : > { %v3936_v6 = vadd.f32 %v3935_v41, %v3905_v53  ;;  %v3867_v62 = vadd.f32 %v3866_v4, %v3836_v54 }
 0x20f   : > { %v3907_v7 = vmul.f32 %v3837_v33, %v3837_v33  ;;  %3977 = vst [vmem:[%s6535_s24 + $0xf0] sm:$0xff] %v3837_v33 }
 0x210   : > { %v3868_v14 = vadd.f32 %v3867_v62, %v3837_v33  ;;  %v3937_v13 = vadd.f32 %v3936_v6, %v3906_v57 }
 0x212   : > { %v3869_v30 = vadd.f32 %v3868_v14, %v3838_v56  ;;  %v3938_v10 = vadd.f32 %v3937_v13, %v3907_v7 }
 0x214   : > { %v3870_v32 = vrot.slane %v3869_v30, 4  ;;  %v3939_v42 = vadd.f32 %v3938_v10, %v3908_v44 }
 0x216   : > { %v3871_v63 = vadd.f32 %v3870_v32, %v3869_v30  ;;  %v3940_v48 = vrot.slane %v3939_v42, 4 }
 0x218   : > { %v3872_v51 = vrot.slane %v3871_v63, 2  ;;  %v3941_v21 = vadd.f32 %v3940_v48, %v3939_v42 }
 0x21a   : > { %v3873_v3 = vadd.f32 %v3872_v51, %v3871_v63  ;;  %v3942_v39 = vrot.slane %v3941_v21, 2 }
 0x21c   : > { %v3874_v49 = vrot.slane %v3873_v3, 1  ;;  %v3943_v61 = vadd.f32 %v3942_v39, %v3941_v21 }
 0x21e   : > { %v3875_v27 = vadd.f32 %v3874_v49, %v3873_v3  ;;  %v3944_v60 = vrot.slane %v3943_v61, 1 }
 0x220   : > { %3876 = vst [vmem:[%s238_s27] sm:$0x1] %v3875_v27  ;;  %v3945_v59 = vadd.f32 %v3944_v60, %v3943_v61 }
 0x222   : > { %3946 = vst [vmem:[%s241_s30] sm:$0x1] %v3945_v59 }
 0x223 PF: > { %s16_s18 = sadd.s32 1, %s5167_s18  }
 0x224   : > { %p13_p4 = scmp.ge.s32.totalorder %s16_s18, 4  }
 0x226   :  { %15 = sbr.rel (!%p13_p4) target bundleno = 1 (0x1), region = 97 }

// kernel: conv_block_forward.4
= control target key start
LH: loop header
LB: loop body
LE: loop exit
PB: predicated region body
PF: predicated region fallthrough
CT: control target
= control target key end

     0   :  { %s5339_s24 = smov 0   ;;  %s6884_s0 = inlined_call_operand.vmem [shape: f32[2,16,16,128], index: 0, kind: input, shape index: {}]   ;;  %s6885_s1 = inlined_call_operand.vmem [shape: f32[9,8,128], index: 1, kind: input, shape index: {}]   ;;  %s6886_s2 = inlined_call_operand.vmem [shape: f32[1,128], index: 2, kind: input, shape index: {}]   ;;  %s6887_s3 = inlined_call_operand.vmem [shape: f32[1,128], index: 3, kind: input, shape index: {}]   ;;  %s6888_s4 = inlined_call_operand.vmem [shape: f32[1,128], index: 4, kind: input, shape index: {}]   ;;  %s6889_s5 = inlined_call_operand.vmem [shape: f32[2,16,16,128], index: 5, kind: output, shape index: {0}]   ;;  %s6890_s6 = inlined_call_operand.vmem [shape: f32[2,1,128], index: 6, kind: output, shape index: {1}]   ;;  %s6891_s7 = inlined_call_operand.vmem [shape: f32[2,1,128], index: 7, kind: output, shape index: {2}]  }
   0x1 LB: > { %s4220_s25 = sadd.s32 4294967295, %s5296_s24   ;;  %p4224_p0 = scmp.ge.s32.totalorder %s5296_s24, 1  ;;  %s5296_s24 = sphi %s5339_s24, %s18_s24  }
   0x2   : > { %p242_p1 = scmp.lt.s32.totalorder %s5296_s24, 3 }
   0x4   : > { %p243_p2 = pnand %p4224_p0, %p242_p1 }
   0x6   : > { %246 = sbr.rel (%p243_p2) target bundleno = 547 (0x223), region = 40 }
   0xb   : > { %v4231_v0 = vld [vmem:[%s6885_s1 + $0x8] sm:$0xff]  ;;  %vm438_vm0 = vcmask 64512   ;;  %p5350_p3 = scmp.lt.s32.totalorder %s4220_s25, 1  ;;  %v5298_v1 = vmov 0.0   ;;  %v5361_v2 = vld [vmem:[%s6885_s1] sm:$0xff]  ;;  %vm441_vm1 = vcmask 58368  }
   0xc   : > { %5279 = vmatprep.subr.mxu1 %v4231_v0  ;;  %4829 = vmatprep.subr.mxu0 %v4231_v0  ;;  %439 = vst.msk [vmem:[#allocation2] sm:$0xff] %vm438_vm0, %v5298_v1  ;;  %440 = vst.msk [vmem:[#allocation2 + $0x8] sm:$0xff] %vm438_vm0, %v5298_v1  ;;  %vm447_vm2 = vcmask 57344   ;;  %v5366_v3 = vld [vmem:[%s6885_s1 + $0x10] sm:$0xff]  ;;  %v5414_v4 = vld [vmem:[%s6887_s3] ss:$0 sm:$0xff] }
   0xd   : > { %444 = vst.msk [vmem:[#allocation2 + $0x198] sm:$0xff] %vm438_vm0, %v5298_v1  ;;  %445 = vst.msk [vmem:[#allocation2 + $0x1a0] sm:$0xff] %vm438_vm0, %v5298_v1  ;;  %5280 = vmatpush3.msra.mxu1 %v4231_v0  ;;  %4830 = vmatpush3.msra.mxu0 %v4231_v0  ;;  %s7101_s25 = smov (!%p5350_p3, %s4220_s25), 1  ;;  %v5426_v5 = vld [vmem:[%s6888_s4] ss:$0 sm:$0xff] }
   0xe   : > { %442 = vst.msk [vmem:[#allocation2 + $0x10] sm:$0x3] %vm441_vm1, %v5298_v1  ;;  %446 = vst.msk [vmem:[#allocation2 + $0x1a8] sm:$0x3] %vm441_vm1, %v5298_v1  ;;  %4879 = vmatprep.subr.mxu1 %v5361_v2  ;;  %4929 = vmatprep.subr.mxu0 %v5366_v3  ;;  %s4530_s10 = sshll.u32 %s7101_s25, 8  ;;  %v5450_v26 = vld [vmem:[%s6885_s1 + $0x20] sm:$0xff]  ;;  %s292_s16 = scalar_lea.vmem %s6890_s6, %s7101_s25 }
   0xf   : > { %448 = vst.msk [vmem:[#allocation2] sm:$0x1] %vm447_vm2, %v5298_v1  ;;  %449 = vst.msk [vmem:[#allocation2 + $0x18] sm:$0x1] %vm447_vm2, %v5298_v1  ;;  %s5421_s15 = scalar_lea.vmem %s6884_s0, %s4530_s10  ;;  %s6726_s14 = scalar_lea.vmem %s6889_s5, %s4530_s10 }
  0x10   : > { %450 = vst.msk [vmem:[#allocation2 + $0x30] sm:$0x1] %vm447_vm2, %v5298_v1  ;;  %451 = vst.msk [vmem:[#allocation2 + $0x48] sm:$0x1] %vm447_vm2, %v5298_v1  ;;  %v310_v6 = vld [vmem:[%s5421_s15 + $0x70] sm:$0xff]  ;;  %v311_v7 = vld [vmem:[%s5421_s15 + $0x78] sm:$0xff]  ;;  %s295_s19 = scalar_lea.vmem %s6891_s7, %s7101_s25 }
  0x11   : > { %452 = vst.msk [vmem:[#allocation2 + $0x60] sm:$0x1] %vm447_vm2, %v5298_v1  ;;  %453 = vst.msk [vmem:[#allocation2 + $0x78] sm:$0x1] %vm447_vm2, %v5298_v1  ;;  %v296_v8 = vld [vmem:[%s5421_s15] sm:$0xff]  ;;  %v350_v9 = vmul.f32 %v5414_v4, %v310_v6  ;;  %v351_v10 = vmul.f32 %v5414_v4, %v311_v7  ;;  %v297_v13 = vld [vmem:[%s5421_s15 + $0x8] sm:$0xff] }
  0x12   : > { %454 = vst.msk [vmem:[#allocation2 + $0x90] sm:$0x1] %vm447_vm2, %v5298_v1  ;;  %455 = vst.msk [vmem:[#allocation2 + $0xa8] sm:$0x1] %vm447_vm2, %v5298_v1  ;;  %v336_v11 = vmul.f32 %v5414_v4, %v296_v8  ;;  %v312_v12 = vld [vmem:[%s5421_s15 + $0x80] sm:$0xff]  ;;  %v313_v14 = vld [vmem:[%s5421_s15 + $0x88] sm:$0xff]  ;;  %v337_v17 = vmul.f32 %v5414_v4, %v297_v13 }
  0x13   : > { %456 = vst.msk [vmem:[#allocation2 + $0xc0] sm:$0x1] %vm447_vm2, %v5298_v1  ;;  %457 = vst.msk [vmem:[#allocation2 + $0xd8] sm:$0x1] %vm447_vm2, %v5298_v1  ;;  %v550_v15 = vld [vmem:[#allocation2 + $0x1] sm:$0xff]  ;;  %v352_v16 = vmul.f32 %v5414_v4, %v312_v12  ;;  %v353_v18 = vmul.f32 %v5414_v4, %v313_v14  ;;  %v298_v19 = vld [vmem:[%s5421_s15 + $0x10] sm:$0xff]  ;;  %v388_v21 = vadd.f32 %v5426_v5, %v350_v9 }
  0x14   : > { %458 = vst.msk [vmem:[#allocation2 + $0xf0] sm:$0x1] %vm447_vm2, %v5298_v1  ;;  %459 = vst.msk [vmem:[#allocation2 + $0x108] sm:$0x1] %vm447_vm2, %v5298_v1  ;;  %v314_v20 = vld [vmem:[%s5421_s15 + $0x90] sm:$0xff]  ;;  %4831 = vmatprep.mubr.msk.f32.mxu0 %vm438_vm0, %v550_v15  ;;  %v389_v23 = vadd.f32 %v5426_v5, %v351_v10  ;;  %v374_v24 = vadd.f32 %v5426_v5, %v336_v11  ;;  %v338_v25 = vmul.f32 %v5414_v4, %v298_v19  ;;  %v299_v31 = vld [vmem:[%s5421_s15 + $0x18] sm:$0xff] }
  0x15   : > { %460 = vst.msk [vmem:[#allocation2 + $0x120] sm:$0x1] %vm447_vm2, %v5298_v1  ;;  %461 = vst.msk [vmem:[#allocation2 + $0x138] sm:$0x1] %vm447_vm2, %v5298_v1  ;;  %v551_v22 = vld [vmem:[#allocation2 + $0x9] sm:$0xff]  ;;  %v390_v27 = vadd.f32 %v5426_v5, %v352_v16  ;;  %v375_v28 = vadd.f32 %v5426_v5, %v337_v17  ;;  %v391_v29 = vadd.f32 %v5426_v5, %v353_v18  ;;  %v315_v32 = vld [vmem:[%s5421_s15 + $0x98] sm:$0xff] }
  0x16   : > { %462 = vst.msk [vmem:[#allocation2 + $0x150] sm:$0x1] %vm447_vm2, %v5298_v1  ;;  %463 = vst.msk [vmem:[#allocation2 + $0x168] sm:$0x1] %vm447_vm2, %v5298_v1  ;;  %4832 = vmatmul.mubr.msk.f32.vlgmr.msra.gmra.mxu0 %vm438_vm0, %v551_v22  ;;  %v354_v30 = vmul.f32 %v5414_v4, %v314_v20  ;;  %v300_v33 = vld [vmem:[%s5421_s15 + $0x20] sm:$0xff]  ;;  %v420_v34 = vmax.f32 %v388_v21, 0.0  ;;  %v376_v37 = vadd.f32 %v5426_v5, %v338_v25 }
  0x17   : > { %464 = vst.msk [vmem:[#allocation2 + $0x180] sm:$0x1] %vm447_vm2, %v5298_v1  ;;  %465 = vst.msk [vmem:[#allocation2 + $0x198] sm:$0x1] %vm447_vm2, %v5298_v1  ;;  %v421_v35 = vmax.f32 %v389_v23, 0.0  ;;  %4930 = vmatpush3.msra.mxu0 %v5366_v3  ;;  %v406_v36 = vmax.f32 %v374_v24, 0.0  ;;  %v339_v47 = vmul.f32 %v5414_v4, %v299_v31  ;;  %v355_v48 = vmul.f32 %v5414_v4, %v315_v32 }
  0x18   : > { %467 = vst.msk [vmem:[#allocation2 + $0x29] sm:$0x1] %vm447_vm2, %v5298_v1  ;;  %468 = vst.msk [vmem:[#allocation2 + $0x41] sm:$0x1] %vm447_vm2, %v5298_v1  ;;  %v316_v38 = vld [vmem:[%s5421_s15 + $0xa0] sm:$0xff]  ;;  %v301_v39 = vld [vmem:[%s5421_s15 + $0x28] sm:$0xff]  ;;  %v392_v44 = vadd.f32 %v5426_v5, %v354_v30  ;;  %5029 = vmatprep.subr.mxu0 %v5450_v26  ;;  %v340_v49 = vmul.f32 %v5414_v4, %v300_v33 }
  0x19   : > { %469 = vst.msk [vmem:[#allocation2 + $0x59] sm:$0x1] %vm447_vm2, %v5298_v1  ;;  %470 = vst.msk [vmem:[#allocation2 + $0x71] sm:$0x1] %vm447_vm2, %v5298_v1  ;;  %v317_v40 = vld [vmem:[%s5421_s15 + $0xa8] sm:$0xff]  ;;  %v422_v41 = vmax.f32 %v390_v27, 0.0  ;;  %v356_v52 = vmul.f32 %v5414_v4, %v316_v38  ;;  %v341_v53 = vmul.f32 %v5414_v4, %v301_v39  ;;  %v377_v55 = vadd.f32 %v5426_v5, %v339_v47 }
  0x1a   : > { %471 = vst.msk [vmem:[#allocation2 + $0x89] sm:$0x1] %vm447_vm2, %v5298_v1  ;;  %472 = vst.msk [vmem:[#allocation2 + $0xa1] sm:$0x1] %vm447_vm2, %v5298_v1  ;;  %v407_v42 = vmax.f32 %v375_v28, 0.0  ;;  %v423_v43 = vmax.f32 %v391_v29, 0.0  ;;  %v357_v54 = vmul.f32 %v5414_v4, %v317_v40  ;;  %v393_v56 = vadd.f32 %v5426_v5, %v355_v48 }
  0x1b   : > { %473 = vst.msk [vmem:[#allocation2 + $0xb9] sm:$0x1] %vm447_vm2, %v5298_v1  ;;  %474 = vst.msk [vmem:[#allocation2 + $0xd1] sm:$0x1] %vm447_vm2, %v5298_v1  ;;  %v302_v45 = vld [vmem:[%s5421_s15 + $0x30] sm:$0xff]  ;;  %v408_v46 = vmax.f32 %v376_v37, 0.0  ;;  %v378_v57 = vadd.f32 %v5426_v5, %v340_v49  ;;  %v394_v59 = vadd.f32 %v5426_v5, %v356_v52  ;;  %v379_v60 = vadd.f32 %v5426_v5, %v341_v53 }
  0x1c   : > { %475 = vst.msk [vmem:[#allocation2 + $0xe9] sm:$0x1] %vm447_vm2, %v5298_v1  ;;  %476 = vst.msk [vmem:[#allocation2 + $0x101] sm:$0x1] %vm447_vm2, %v5298_v1  ;;  %v318_v50 = vld [vmem:[%s5421_s15 + $0xb0] sm:$0xff]  ;;  %v424_v51 = vmax.f32 %v392_v44, 0.0  ;;  %v342_v58 = vmul.f32 %v5414_v4, %v302_v45  ;;  %v395_v61 = vadd.f32 %v5426_v5, %v357_v54 }
  0x1d   : > { %477 = vst.msk [vmem:[#allocation2 + $0x119] sm:$0x1] %vm447_vm2, %v5298_v1  ;;  %478 = vst.msk [vmem:[#allocation2 + $0x131] sm:$0x1] %vm447_vm2, %v5298_v1  ;;  %v358_v62 = vmul.f32 %v5414_v4, %v318_v50  ;;  %v303_v63 = vld [vmem:[%s5421_s15 + $0x38] sm:$0xff]  ;;  %v409_v3 = vmax.f32 %v377_v55, 0.0 }
  0x1e   : > { %479 = vst.msk [vmem:[#allocation2 + $0x149] sm:$0x1] %vm447_vm2, %v5298_v1  ;;  %480 = vst.msk [vmem:[#allocation2 + $0x161] sm:$0x1] %vm447_vm2, %v5298_v1  ;;  %v319_v0 = vld [vmem:[%s5421_s15 + $0xb8] sm:$0xff]  ;;  %v425_v6 = vmax.f32 %v393_v56, 0.0  ;;  %v380_v8 = vadd.f32 %v5426_v5, %v342_v58  ;;  %v343_v17 = vmul.f32 %v5414_v4, %v303_v63 }
  0x1f   : > { %481 = vst.msk [vmem:[#allocation2 + $0x179] sm:$0x1] %vm447_vm2, %v5298_v1  ;;  %482 = vst.msk [vmem:[#allocation2 + $0x191] sm:$0x1] %vm447_vm2, %v5298_v1  ;;  %v410_v7 = vmax.f32 %v378_v57, 0.0  ;;  %v320_v9 = vld [vmem:[%s5421_s15 + $0xc0] sm:$0xff]  ;;  %v396_v15 = vadd.f32 %v5426_v5, %v358_v62  ;;  %v359_v18 = vmul.f32 %v5414_v4, %v319_v0 }
  0x20   : > { %466 = vst.msk [vmem:[#allocation2 + $0x11] sm:$0x1] %vm447_vm2, %v5298_v1  ;;  %483 = vst.msk [vmem:[#allocation2 + $0x1a9] sm:$0x1] %vm447_vm2, %v5298_v1  ;;  %v304_v1 = vld [vmem:[%s5421_s15 + $0x40] sm:$0xff]  ;;  %v305_v10 = vld [vmem:[%s5421_s15 + $0x48] sm:$0xff]  ;;  %v360_v28 = vmul.f32 %v5414_v4, %v320_v9 }
  0x21   : > { %499 = vst.msk [vmem:[#allocation2 + $0xc1] sm:$0xff] %vm438_vm0, %v420_v34  ;;  %500 = vst.msk [vmem:[#allocation2 + $0xc9] sm:$0xff] %vm438_vm0, %v421_v35  ;;  %v321_v11 = vld [vmem:[%s5421_s15 + $0xc8] sm:$0xff]  ;;  %v426_v12 = vmax.f32 %v394_v59, 0.0  ;;  %v411_v13 = vmax.f32 %v379_v60, 0.0  ;;  %v427_v14 = vmax.f32 %v395_v61, 0.0  ;;  %v344_v19 = vmul.f32 %v5414_v4, %v304_v1 }
  0x22   : > { %485 = vst.msk [vmem:[#allocation2 + $0x19] sm:$0xff] %vm438_vm0, %v406_v36  ;;  %501 = vst.msk [vmem:[#allocation2 + $0xd9] sm:$0xff] %vm438_vm0, %v422_v41  ;;  %v412_v16 = vmax.f32 %v380_v8, 0.0  ;;  %v306_v20 = vld [vmem:[%s5421_s15 + $0x50] sm:$0xff]  ;;  %v5510_v22 = vld [vmem:[%s6885_s1 + $0x18] sm:$0xff]  ;;  %v428_v27 = vmax.f32 %v396_v15, 0.0  ;;  %v345_v29 = vmul.f32 %v5414_v4, %v305_v10  ;;  %v361_v30 = vmul.f32 %v5414_v4, %v321_v11 }
  0x23   : > { %486 = vst.msk [vmem:[#allocation2 + $0x21] sm:$0xff] %vm438_vm0, %v407_v42  ;;  %502 = vst.msk [vmem:[#allocation2 + $0xe1] sm:$0xff] %vm438_vm0, %v423_v43  ;;  %v322_v21 = vld [vmem:[%s5421_s15 + $0xd0] sm:$0xff]  ;;  %v307_v31 = vld [vmem:[%s5421_s15 + $0x58] sm:$0xff]  ;;  %v381_v34 = vadd.f32 %v5426_v5, %v343_v17  ;;  %v397_v35 = vadd.f32 %v5426_v5, %v359_v18  ;;  %v382_v36 = vadd.f32 %v5426_v5, %v344_v19 }
  0x24   : > { %487 = vst.msk [vmem:[#allocation2 + $0x31] sm:$0xff] %vm438_vm0, %v408_v46  ;;  %503 = vst.msk [vmem:[#allocation2 + $0xf1] sm:$0xff] %vm438_vm0, %v424_v51  ;;  %v323_v37 = vld [vmem:[%s5421_s15 + $0xd8] sm:$0xff]  ;;  %v398_v39 = vadd.f32 %v5426_v5, %v360_v28  ;;  %v383_v40 = vadd.f32 %v5426_v5, %v345_v29  ;;  %v399_v41 = vadd.f32 %v5426_v5, %v361_v30  ;;  %v308_v42 = vld [vmem:[%s5421_s15 + $0x60] sm:$0xff] }
  0x25   : > { %488 = vst.msk [vmem:[#allocation2 + $0x39] sm:$0xff] %vm438_vm0, %v409_v3  ;;  %504 = vst.msk [vmem:[#allocation2 + $0xf9] sm:$0xff] %vm438_vm0, %v425_v6  ;;  %v324_v43 = vld [vmem:[%s5421_s15 + $0xe0] sm:$0xff]  ;;  %v413_v45 = vmax.f32 %v381_v34, 0.0  ;;  %v429_v46 = vmax.f32 %v397_v35, 0.0  ;;  %v414_v47 = vmax.f32 %v382_v36, 0.0  ;;  %v346_v48 = vmul.f32 %v5414_v4, %v306_v20 }
  0x26   : > { %489 = vst.msk [vmem:[#allocation2 + $0x49] sm:$0xff] %vm438_vm0, %v410_v7  ;;  %505 = vst.msk [vmem:[#allocation2 + $0x109] sm:$0xff] %vm438_vm0, %v426_v12  ;;  %v309_v49 = vld [vmem:[%s5421_s15 + $0x68] sm:$0xff]  ;;  %v430_v52 = vmax.f32 %v398_v39, 0.0  ;;  %v415_v53 = vmax.f32 %v383_v40, 0.0  ;;  %v362_v54 = vmul.f32 %v5414_v4, %v322_v21  ;;  %v347_v56 = vmul.f32 %v5414_v4, %v307_v31 }
  0x27   : > { %490 = vst.msk [vmem:[#allocation2 + $0x51] sm:$0xff] %vm438_vm0, %v411_v13  ;;  %506 = vst.msk [vmem:[#allocation2 + $0x111] sm:$0xff] %vm438_vm0, %v427_v14  ;;  %v325_v50 = vld [vmem:[%s5421_s15 + $0xe8] sm:$0xff]  ;;  %v384_v55 = vadd.f32 %v5426_v5, %v346_v48  ;;  %v363_v57 = vmul.f32 %v5414_v4, %v323_v37  ;;  %v348_v58 = vmul.f32 %v5414_v4, %v308_v42  ;;  %v517_v48 = vld [vmem:[#allocation2] sm:$0xff] }
  0x28   : > { %v5512_v23 = vld [vmem:[#allocation2 + $0xc1] sm:$0xff]  ;;  %v5514_v24 = vld [vmem:[#allocation2 + $0xc9] sm:$0xff]  ;;  %491 = vst.msk [vmem:[#allocation2 + $0x61] sm:$0xff] %vm438_vm0, %v412_v16  ;;  %507 = vst.msk [vmem:[#allocation2 + $0x121] sm:$0xff] %vm438_vm0, %v428_v27  ;;  %v400_v61 = vadd.f32 %v5426_v5, %v362_v54  ;;  %v364_v62 = vmul.f32 %v5414_v4, %v324_v43  ;;  %v349_v63 = vmul.f32 %v5414_v4, %v309_v49 }
  0x29   : > { %v5516_v25 = vld [vmem:[#allocation2 + $0x19] sm:$0xff]  ;;  %4855 = vmatprep.mubr.msk.f32.mxu1 %vm438_vm0, %v5512_v23  ;;  %492 = vst.msk [vmem:[#allocation2 + $0x69] sm:$0xff] %vm438_vm0, %v413_v45  ;;  %508 = vst.msk [vmem:[#allocation2 + $0x129] sm:$0xff] %vm438_vm0, %v429_v46  ;;  %v365_v0 = vmul.f32 %v5414_v4, %v325_v50  ;;  %v416_v3 = vmax.f32 %v384_v55, 0.0  ;;  %v385_v6 = vadd.f32 %v5426_v5, %v347_v56  ;;  %v1226_v46 = vld [vmem:[#allocation2 + $0x2] sm:$0xff] }
  0x2a   : > { %4834 = vmatprep.mubr.msk.f32.mxu0 %vm438_vm0, %v5516_v25  ;;  %v5529_v32 = vld [vmem:[#allocation2 + $0xd9] sm:$0xff]  ;;  %v5531_v33 = vld [vmem:[#allocation2 + $0x21] sm:$0xff]  ;;  %4856 = vmatmul.mubr.msk.f32.vlgmr.msra.gmra.mxu1 %vm438_vm0, %v5514_v24  ;;  %493 = vst.msk [vmem:[#allocation2 + $0x79] sm:$0xff] %vm438_vm0, %v414_v47  ;;  %509 = vst.msk [vmem:[#allocation2 + $0x139] sm:$0xff] %vm438_vm0, %v430_v52  ;;  %v401_v7 = vadd.f32 %v5426_v5, %v363_v57  ;;  %v386_v8 = vadd.f32 %v5426_v5, %v348_v58  ;;  %v432_v11 = vmax.f32 %v400_v61, 0.0 }
  0x2b   : > { %4835 = vmatmul.mubr.msk.f32.gmra.mxu0 %vm438_vm0, %v5531_v33  ;;  %v5542_v38 = vld [vmem:[#allocation2 + $0x31] sm:$0xff]  ;;  %4880 = vmatpush3.msra.mxu1 %v5361_v2  ;;  %v5553_v44 = vld [vmem:[#allocation2 + $0xe1] sm:$0xff]  ;;  %v431_v2 = vmax.f32 %v399_v41, 0.0  ;;  %494 = vst.msk [vmem:[#allocation2 + $0x81] sm:$0xff] %vm438_vm0, %v415_v53  ;;  %v402_v12 = vadd.f32 %v5426_v5, %v364_v62  ;;  %v387_v13 = vadd.f32 %v5426_v5, %v349_v63  ;;  %495 = vst.msk [vmem:[#allocation2 + $0x91] sm:$0xff] %vm438_vm0, %v416_v3 }
  0x2c   : > { %4858 = vmatprep.mubr.msk.f32.mxu1 %vm438_vm0, %v5529_v32  ;;  %4837 = vmatprep.mubr.msk.f32.mxu0 %vm438_vm0, %v5542_v38  ;;  %v5560_v51 = vld [vmem:[#allocation2 + $0xf1] sm:$0xff]  ;;  %v5573_v59 = vld [vmem:[#allocation2 + $0x39] sm:$0xff]  ;;  %v403_v14 = vadd.f32 %v5426_v5, %v365_v0  ;;  %v417_v16 = vmax.f32 %v385_v6, 0.0  ;;  %v433_v17 = vmax.f32 %v401_v7, 0.0  ;;  %v418_v18 = vmax.f32 %v386_v8, 0.0  ;;  %511 = vst.msk [vmem:[#allocation2 + $0x151] sm:$0xff] %vm438_vm0, %v432_v11 }
  0x2d   : > { %4979 = vmatprep.subr.mxu1 %v5510_v22  ;;  %v5575_v60 = vld [vmem:[#allocation2 + $0x49] sm:$0xff]  ;;  %510 = vst.msk [vmem:[#allocation2 + $0x141] sm:$0xff] %vm438_vm0, %v431_v2  ;;  %v5588_v1 = vld [vmem:[#allocation2 + $0xf9] sm:$0xff]  ;;  %v434_v19 = vmax.f32 %v402_v12, 0.0  ;;  %v419_v20 = vmax.f32 %v387_v13, 0.0 }
  0x2e   : > { %4859 = vmatmul.mubr.msk.f32.gmra.mxu1 %vm438_vm0, %v5553_v44  ;;  %v5595_v9 = vld [vmem:[#allocation2 + $0x109] sm:$0xff]  ;;  %v5597_v10 = vld [vmem:[#allocation2 + $0x51] sm:$0xff]  ;;  %v435_v21 = vmax.f32 %v403_v14, 0.0  ;;  %496 = vst.msk [vmem:[#allocation2 + $0x99] sm:$0xff] %vm438_vm0, %v417_v16  ;;  %512 = vst.msk [vmem:[#allocation2 + $0x159] sm:$0xff] %vm438_vm0, %v433_v17 }
  0x2f   : > { %4861 = vmatprep.mubr.msk.f32.mxu1 %vm438_vm0, %v5560_v51  ;;  %4838 = vmatmul.mubr.msk.f32.gmra.mxu0 %vm438_vm0, %v5573_v59  ;;  %v5602_v15 = vld [vmem:[#allocation2 + $0x61] sm:$0xff]  ;;  %v5612_v27 = vld [vmem:[#allocation2 + $0x111] sm:$0xff]  ;;  %497 = vst.msk [vmem:[#allocation2 + $0xa9] sm:$0xff] %vm438_vm0, %v418_v18  ;;  %513 = vst.msk [vmem:[#allocation2 + $0x169] sm:$0xff] %vm438_vm0, %v434_v19 }
  0x30   : > { %4840 = vmatprep.mubr.msk.f32.mxu0 %vm438_vm0, %v5575_v60  ;;  %v5619_v28 = vld [vmem:[#allocation2 + $0x121] sm:$0xff]  ;;  %v5621_v29 = vld [vmem:[#allocation2 + $0x69] sm:$0xff]  ;;  %498 = vst.msk [vmem:[#allocation2 + $0xb1] sm:$0xff] %vm438_vm0, %v419_v20  ;;  %514 = vst.msk [vmem:[#allocation2 + $0x171] sm:$0xff] %vm438_vm0, %v435_v21 }
  0x31   : > { %v5626_v30 = vld [vmem:[#allocation2 + $0x79] sm:$0xff]  ;;  %v5634_v31 = vld [vmem:[#allocation2 + $0x129] sm:$0xff] }
  0x32   : > { %4862 = vmatmul.mubr.msk.f32.gmra.mxu1 %vm438_vm0, %v5588_v1  ;;  %v5638_v34 = vld [vmem:[#allocation2 + $0x139] sm:$0xff]  ;;  %v5640_v35 = vld [vmem:[#allocation2 + $0x81] sm:$0xff]  ;;  %v5642_v36 = vld [vmem:[#allocation2 + $0x91] sm:$0xff] }
  0x33   : > { %4864 = vmatprep.mubr.msk.f32.mxu1 %vm438_vm0, %v5595_v9  ;;  %4841 = vmatmul.mubr.msk.f32.gmra.mxu0 %vm438_vm0, %v5597_v10  ;;  %v5654_v39 = vld [vmem:[#allocation2 + $0x151] sm:$0xff]  ;;  %v5683_v50 = vld [vmem:[#allocation2 + $0x1a] sm:$0xff]  ;;  %v518_v54 = vld [vmem:[#allocation2 + $0x8] sm:$0xff] }
  0x34   : > { %4843 = vmatprep.mubr.msk.f32.mxu0 %vm438_vm0, %v5602_v15  ;;  %v5650_v37 = vld [vmem:[#allocation2 + $0x141] sm:$0xff]  ;;  %v1227_v49 = vld [vmem:[#allocation2 + $0xa] sm:$0xff]  ;;  %6947 = vst [vmem:[#allocation4_spill] sm:$0xff] %v5683_v50  ;;  %v327_v2 = vld [vmem:[%s5421_s15 + $0xf8] sm:$0xff] }
  0x35   : > { %v5656_v40 = vld [vmem:[#allocation2 + $0x99] sm:$0xff]  ;;  %v5690_v52 = vld [vmem:[%s6885_s1 + $0x30] sm:$0xff]  ;;  %v367_v56 = vmul.f32 %v5414_v4, %v327_v2  ;;  %v5703_v58 = vld [vmem:[#allocation2 + $0x22] sm:$0xff] }
  0x36   : > { %4865 = vmatmul.mubr.msk.f32.gmra.mxu1 %vm438_vm0, %v5612_v27  ;;  %v5658_v41 = vld [vmem:[#allocation2 + $0xa9] sm:$0xff]  ;;  %v5666_v42 = vld [vmem:[#allocation2 + $0x159] sm:$0xff]  ;;  %6948 = vst [vmem:[#allocation5_spill] sm:$0xff] %v5703_v58 }
  0x37   : > { %4867 = vmatprep.mubr.msk.f32.mxu1 %vm438_vm0, %v5619_v28  ;;  %4844 = vmatmul.mubr.msk.f32.gmra.mxu0 %vm438_vm0, %v5621_v29  ;;  %v5670_v43 = vld [vmem:[#allocation2 + $0x169] sm:$0xff]  ;;  %v5672_v45 = vld [vmem:[#allocation2 + $0xb1] sm:$0xff]  ;;  %v5719_v63 = vld [vmem:[#allocation2 + $0x20] sm:$0xff] }
  0x38   : > { %4846 = vmatprep.mubr.msk.f32.mxu0 %vm438_vm0, %v5626_v30  ;;  %v5680_v47 = vld [vmem:[#allocation2 + $0x171] sm:$0xff]  ;;  %v5708_v61 = vld [vmem:[%s6885_s1 + $0x28] sm:$0xff]  ;;  %v5758_v14 = vld [vmem:[#allocation2 + $0x60] sm:$0xff] }
  0x39   : > { %6946 = vst [vmem:[#allocation3_spill] sm:$0xff] %v5680_v47  ;;  %v326_v53 = vld [vmem:[%s5421_s15 + $0xf0] sm:$0xff]  ;;  %v5699_v57 = vld [vmem:[#allocation2 + $0x18] sm:$0xff]  ;;  %v5742_v8 = vld [vmem:[#allocation2 + $0x48] sm:$0xff] }
  0x3a   : > { %4868 = vmatmul.mubr.msk.f32.gmra.mxu1 %vm438_vm0, %v5634_v31  ;;  %v366_v55 = vmul.f32 %v5414_v4, %v326_v53  ;;  %v405_v4 = vadd.f32 %v5426_v5, %v367_v56  ;;  %v5723_v6 = vld [vmem:[#allocation2 + $0x30] sm:$0xff]  ;;  %v5738_v7 = vld [vmem:[#allocation2 + $0x38] sm:$0xff]  ;;  %v5750_v12 = vld [vmem:[#allocation2 + $0x62] sm:$0xff] }
  0x3b   : > { %4870 = vmatprep.mubr.msk.f32.mxu1 %vm438_vm0, %v5638_v34  ;;  %4847 = vmatmul.mubr.msk.f32.gmra.mxu0 %vm438_vm0, %v5640_v35  ;;  %v5746_v11 = vld [vmem:[#allocation2 + $0x52] sm:$0xff]  ;;  %6953 = vst [vmem:[#allocation10_spill] sm:$0xff] %v5750_v12  ;;  %v5762_v16 = vld [vmem:[#allocation2 + $0x6a] sm:$0xff]  ;;  %v5766_v17 = vld [vmem:[#allocation2 + $0x7a] sm:$0xff] }
  0x3c   : > { %4849 = vmatprep.mubr.msk.f32.mxu0 %vm438_vm0, %v5642_v36  ;;  %v404_v62 = vadd.f32 %v5426_v5, %v366_v55  ;;  %v437_v3 = vmax.f32 %v405_v4, 0.0  ;;  %v5728_v5 = vld [vmem:[#allocation2 + $0x3a] sm:$0xff]  ;;  %6952 = vst [vmem:[#allocation9_spill] sm:$0xff] %v5746_v11  ;;  %v5754_v13 = vld [vmem:[#allocation2 + $0x50] sm:$0xff]  ;;  %6954 = vst [vmem:[#allocation11_spill] sm:$0xff] %v5762_v16 }
  0x3d   : > { %6950 = vst [vmem:[#allocation7_spill] sm:$0xff] %v5728_v5  ;;  %6955 = vst [vmem:[#allocation12_spill] sm:$0xff] %v5766_v17  ;;  %v5770_v18 = vld [vmem:[#allocation2 + $0x68] sm:$0xff]  ;;  %v5774_v19 = vld [vmem:[#allocation2 + $0x78] sm:$0xff] }
  0x3e   : > { %4871 = vmatmul.mubr.msk.f32.gmra.mxu1 %vm438_vm0, %v5650_v37  ;;  %v436_v0 = vmax.f32 %v404_v62, 0.0  ;;  %516 = vst.msk [vmem:[#allocation2 + $0x189] sm:$0xff] %vm438_vm0, %v437_v3  ;;  %v5778_v20 = vld [vmem:[#allocation2 + $0x82] sm:$0xff]  ;;  %v5782_v21 = vld [vmem:[#allocation2 + $0x92] sm:$0xff]  ;;  %v5798_v53 = vld [vmem:[#allocation2 + $0xaa] sm:$0xff] }
  0x3f   : > { %4873 = vmatprep.mubr.msk.f32.mxu1 %vm438_vm0, %v5654_v39  ;;  %4850 = vmatmul.mubr.msk.f32.gmra.mxu0 %vm438_vm0, %v5656_v40  ;;  %6956 = vst [vmem:[#allocation13_spill] sm:$0xff] %v5778_v20  ;;  %6957 = vst [vmem:[#allocation14_spill] sm:$0xff] %v5782_v21  ;;  %v5802_v2 = vld [vmem:[#allocation2 + $0x98] sm:$0xff]  ;;  %v5814_v56 = vld [vmem:[#allocation2 + $0xc2] sm:$0xff] }
  0x40   : > { %4852 = vmatprep.mubr.msk.f32.mxu0 %vm438_vm0, %v5658_v41  ;;  %515 = vst.msk [vmem:[#allocation2 + $0x181] sm:$0xff] %vm438_vm0, %v436_v0  ;;  %6959 = vst [vmem:[#allocation16_spill] sm:$0xff] %v5798_v53  ;;  %v5810_v55 = vld [vmem:[#allocation2 + $0xb2] sm:$0xff]  ;;  %v5822_v4 = vld [vmem:[#allocation2 + $0xc0] sm:$0xff] }
  0x41   : > { %6960 = vst [vmem:[#allocation17_spill] sm:$0xff] %v5810_v55  ;;  %6961 = vst [vmem:[#allocation18_spill] sm:$0xff] %v5814_v56  ;;  %v5818_v62 = vld [vmem:[#allocation2 + $0xb0] sm:$0xff]  ;;  %v5830_v3 = vld [vmem:[#allocation2 + $0xda] sm:$0xff] }
  0x42   : > { %4874 = vmatmul.mubr.msk.f32.gmra.mxu1 %vm438_vm0, %v5666_v42  ;;  %v5826_v0 = vld [vmem:[#allocation2 + $0xca] sm:$0xff]  ;;  %6963 = vst [vmem:[#allocation20_spill] sm:$0xff] %v5830_v3 }
  0x43   : > { %4876 = vmatprep.mubr.msk.f32.mxu1 %vm438_vm0, %v5670_v43  ;;  %4853 = vmatmul.mubr.msk.f32.gmra.mxu0 %vm438_vm0, %v5672_v45  ;;  %6962 = vst [vmem:[#allocation19_spill] sm:$0xff] %v5826_v0 }
  0x44   : > { %4931 = vmatprep.mubr.msk.f32.mxu0 %vm438_vm0, %v1226_v46  ;;  %v5786_v46 = vld [vmem:[#allocation2 + $0x80] sm:$0xff] }
  0x46   : > { %4877 = vmatmul.mubr.msk.f32.gmra.mxu1 %vm438_vm0, %v5680_v47  ;;  %v5944_v47 = vld [vmem:[#allocation2 + $0x170] sm:$0xff] }
  0x47   : > { %4881 = vmatprep.mubr.msk.f32.mxu1 %vm438_vm0, %v517_v48  ;;  %4932 = vmatmul.mubr.msk.f32.vlgmr.msra.gmra.mxu0 %vm438_vm0, %v1227_v49  ;;  %v5790_v48 = vld [vmem:[#allocation2 + $0x90] sm:$0xff]  ;;  %v5794_v49 = vld [vmem:[#allocation2 + $0x9a] sm:$0xff] }
  0x48   : > { %5030 = vmatpush3.msra.mxu0 %v5450_v26  ;;  %4934 = vmatprep.mubr.msk.f32.mxu0 %vm438_vm0, %v5683_v50  ;;  %v5714_v26 = vld [vmem:[#allocation2 + $0x32] sm:$0xff]  ;;  %6958 = vst [vmem:[#allocation15_spill] sm:$0xff] %v5794_v49 }
  0x49   : > { %5129 = vmatprep.subr.mxu0 %v5690_v52  ;;  %6949 = vst [vmem:[#allocation6_spill] sm:$0xff] %v5714_v26  ;;  %v5930_v50 = vld [vmem:[#allocation2 + $0x158] sm:$0xff] }
  0x4a   : > { %4882 = vmatmul.mubr.msk.f32.vlgmr.msra.gmra.mxu1 %vm438_vm0, %v518_v54  ;;  %v5806_v54 = vld [vmem:[#allocation2 + $0xa8] sm:$0xff] }
  0x4b   : > { %4980 = vmatpush3.msra.mxu1 %v5510_v22  ;;  %4884 = vmatprep.mubr.msk.f32.mxu1 %vm438_vm0, %v5699_v57  ;;  %v5734_v22 = vld [vmem:[#allocation2 + $0x4a] sm:$0xff] }
  0x4c   : > { %4935 = vmatmul.mubr.msk.f32.gmra.mxu0 %vm438_vm0, %v5703_v58  ;;  %5079 = vmatprep.subr.mxu1 %v5708_v61  ;;  %6951 = vst [vmem:[#allocation8_spill] sm:$0xff] %v5734_v22  ;;  %v5926_v58 = vld [vmem:[#allocation2 + $0x16a] sm:$0xff] }
  0x4d   : > { %4937 = vmatprep.mubr.msk.f32.mxu0 %vm438_vm0, %v5714_v26  ;;  %v5914_v26 = vld [vmem:[#allocation2 + $0x140] sm:$0xff]  ;;  %6974 = vst [vmem:[#allocation31_spill] sm:$0xff] %v5926_v58 }
  0x4e   : > { %4885 = vmatmul.mubr.msk.f32.gmra.mxu1 %vm438_vm0, %v5719_v63 }
  0x4f   : > { %4887 = vmatprep.mubr.msk.f32.mxu1 %vm438_vm0, %v5723_v6 }
  0x50   : > { %4938 = vmatmul.mubr.msk.f32.gmra.mxu0 %vm438_vm0, %v5728_v5  ;;  %v5910_v5 = vld [vmem:[#allocation2 + $0x152] sm:$0xff] }
  0x51   : > { %4940 = vmatprep.mubr.msk.f32.mxu0 %vm438_vm0, %v5734_v22  ;;  %v5898_v22 = vld [vmem:[#allocation2 + $0x128] sm:$0xff]  ;;  %6973 = vst [vmem:[#allocation30_spill] sm:$0xff] %v5910_v5 }
  0x52   : > { %4888 = vmatmul.mubr.msk.f32.gmra.mxu1 %vm438_vm0, %v5738_v7 }
  0x53   : > { %4890 = vmatprep.mubr.msk.f32.mxu1 %vm438_vm0, %v5742_v8 }
  0x54   : > { %4941 = vmatmul.mubr.msk.f32.gmra.mxu0 %vm438_vm0, %v5746_v11  ;;  %v5894_v11 = vld [vmem:[#allocation2 + $0x13a] sm:$0xff] }
  0x55   : > { %4943 = vmatprep.mubr.msk.f32.mxu0 %vm438_vm0, %v5750_v12  ;;  %v5882_v12 = vld [vmem:[#allocation2 + $0x110] sm:$0xff]  ;;  %6971 = vst [vmem:[#allocation28_spill] sm:$0xff] %v5894_v11 }
  0x56   : > { %4891 = vmatmul.mubr.msk.f32.gmra.mxu1 %vm438_vm0, %v5754_v13 }
  0x57   : > { %4893 = vmatprep.mubr.msk.f32.mxu1 %vm438_vm0, %v5758_v14 }
  0x58   : > { %4944 = vmatmul.mubr.msk.f32.gmra.mxu0 %vm438_vm0, %v5762_v16  ;;  %v5878_v16 = vld [vmem:[#allocation2 + $0x122] sm:$0xff] }
  0x59   : > { %4946 = vmatprep.mubr.msk.f32.mxu0 %vm438_vm0, %v5766_v17  ;;  %v5866_v17 = vld [vmem:[#allocation2 + $0xf8] sm:$0xff]  ;;  %6969 = vst [vmem:[#allocation26_spill] sm:$0xff] %v5878_v16 }
  0x5a   : > { %4894 = vmatmul.mubr.msk.f32.gmra.mxu1 %vm438_vm0, %v5770_v18 }
  0x5b   : > { %4896 = vmatprep.mubr.msk.f32.mxu1 %vm438_vm0, %v5774_v19 }
  0x5c   : > { %4947 = vmatmul.mubr.msk.f32.gmra.mxu0 %vm438_vm0, %v5778_v20  ;;  %v5862_v20 = vld [vmem:[#allocation2 + $0x10a] sm:$0xff] }
  0x5d   : > { %4949 = vmatprep.mubr.msk.f32.mxu0 %vm438_vm0, %v5782_v21  ;;  %v5850_v21 = vld [vmem:[#allocation2 + $0xe0] sm:$0xff]  ;;  %6967 = vst [vmem:[#allocation24_spill] sm:$0xff] %v5862_v20 }
  0x5e   : > { %4897 = vmatmul.mubr.msk.f32.gmra.mxu1 %vm438_vm0, %v5786_v46 }
  0x5f   : > { %4899 = vmatprep.mubr.msk.f32.mxu1 %vm438_vm0, %v5790_v48 }
  0x60   : > { %4950 = vmatmul.mubr.msk.f32.gmra.mxu0 %vm438_vm0, %v5794_v49  ;;  %v5846_v49 = vld [vmem:[#allocation2 + $0xf2] sm:$0xff] }
  0x61   : > { %4952 = vmatprep.mubr.msk.f32.mxu0 %vm438_vm0, %v5798_v53  ;;  %v5834_v53 = vld [vmem:[#allocation2 + $0xc8] sm:$0xff]  ;;  %6965 = vst [vmem:[#allocation22_spill] sm:$0xff] %v5846_v49 }
  0x62   : > { %4900 = vmatmul.mubr.msk.f32.gmra.mxu1 %vm438_vm0, %v5802_v2 }
  0x63   : > { %4902 = vmatprep.mubr.msk.f32.mxu1 %vm438_vm0, %v5806_v54 }
  0x64   : > { %4953 = vmatmul.mubr.msk.f32.gmra.mxu0 %vm438_vm0, %v5810_v55  ;;  %v5838_v55 = vld [vmem:[#allocation2 + $0xd8] sm:$0xff] }
  0x65   : > { %4955 = vmatprep.mubr.msk.f32.mxu0 %vm438_vm0, %v5814_v56  ;;  %v5842_v56 = vld [vmem:[#allocation2 + $0xe2] sm:$0xff] }
  0x66   : > { %4903 = vmatmul.mubr.msk.f32.gmra.mxu1 %vm438_vm0, %v5818_v62  ;;  %6964 = vst [vmem:[#allocation21_spill] sm:$0xff] %v5842_v56 }
  0x67   : > { %4905 = vmatprep.mubr.msk.f32.mxu1 %vm438_vm0, %v5822_v4 }
  0x68   : > { %4956 = vmatmul.mubr.msk.f32.gmra.mxu0 %vm438_vm0, %v5826_v0  ;;  %v5854_v0 = vld [vmem:[#allocation2 + $0xf0] sm:$0xff] }
  0x69   : > { %4958 = vmatprep.mubr.msk.f32.mxu0 %vm438_vm0, %v5830_v3  ;;  %v5858_v3 = vld [vmem:[#allocation2 + $0xfa] sm:$0xff] }
  0x6a   : > { %4906 = vmatmul.mubr.msk.f32.gmra.mxu1 %vm438_vm0, %v5834_v53  ;;  %6966 = vst [vmem:[#allocation23_spill] sm:$0xff] %v5858_v3 }
  0x6b   : > { %4908 = vmatprep.mubr.msk.f32.mxu1 %vm438_vm0, %v5838_v55 }
  0x6c   : > { %4959 = vmatmul.mubr.msk.f32.gmra.mxu0 %vm438_vm0, %v5842_v56  ;;  %v5870_v56 = vld [vmem:[#allocation2 + $0x108] sm:$0xff] }
  0x6d   : > { %4961 = vmatprep.mubr.msk.f32.mxu0 %vm438_vm0, %v5846_v49  ;;  %v5874_v49 = vld [vmem:[#allocation2 + $0x112] sm:$0xff] }
  0x6e   : > { %4909 = vmatmul.mubr.msk.f32.gmra.mxu1 %vm438_vm0, %v5850_v21  ;;  %6968 = vst [vmem:[#allocation25_spill] sm:$0xff] %v5874_v49 }
  0x6f   : > { %4911 = vmatprep.mubr.msk.f32.mxu1 %vm438_vm0, %v5854_v0 }
  0x70   : > { %4962 = vmatmul.mubr.msk.f32.gmra.mxu0 %vm438_vm0, %v5858_v3  ;;  %v5886_v3 = vld [vmem:[#allocation2 + $0x120] sm:$0xff] }
  0x71   : > { %4964 = vmatprep.mubr.msk.f32.mxu0 %vm438_vm0, %v5862_v20  ;;  %v5890_v20 = vld [vmem:[#allocation2 + $0x12a] sm:$0xff] }
  0x72   : > { %4912 = vmatmul.mubr.msk.f32.gmra.mxu1 %vm438_vm0, %v5866_v17  ;;  %6970 = vst [vmem:[#allocation27_spill] sm:$0xff] %v5890_v20 }
  0x73   : > { %4914 = vmatprep.mubr.msk.f32.mxu1 %vm438_vm0, %v5870_v56 }
  0x74   : > { %4965 = vmatmul.mubr.msk.f32.gmra.mxu0 %vm438_vm0, %v5874_v49  ;;  %v5902_v49 = vld [vmem:[#allocation2 + $0x138] sm:$0xff] }
  0x75   : > { %4967 = vmatprep.mubr.msk.f32.mxu0 %vm438_vm0, %v5878_v16  ;;  %v5906_v16 = vld [vmem:[#allocation2 + $0x142] sm:$0xff] }
  0x76   : > { %4915 = vmatmul.mubr.msk.f32.gmra.mxu1 %vm438_vm0, %v5882_v12  ;;  %6972 = vst [vmem:[#allocation29_spill] sm:$0xff] %v5906_v16 }
  0x77   : > { %4917 = vmatprep.mubr.msk.f32.mxu1 %vm438_vm0, %v5886_v3 }
  0x78   : > { %4968 = vmatmul.mubr.msk.f32.gmra.mxu0 %vm438_vm0, %v5890_v20  ;;  %v5918_v20 = vld [vmem:[#allocation2 + $0x150] sm:$0xff] }
  0x79   : > { %4970 = vmatprep.mubr.msk.f32.mxu0 %vm438_vm0, %v5894_v11  ;;  %v5922_v11 = vld [vmem:[#allocation2 + $0x15a] sm:$0xff] }
  0x7a   : > { %4918 = vmatmul.mubr.msk.f32.gmra.mxu1 %vm438_vm0, %v5898_v22 }
  0x7b   : > { %4920 = vmatprep.mubr.msk.f32.mxu1 %vm438_vm0, %v5902_v49 }
  0x7c   : > { %4971 = vmatmul.mubr.msk.f32.gmra.mxu0 %vm438_vm0, %v5906_v16  ;;  %v5934_v16 = vld [vmem:[#allocation2 + $0x168] sm:$0xff] }
  0x7d   : > { %4973 = vmatprep.mubr.msk.f32.mxu0 %vm438_vm0, %v5910_v5  ;;  %v5938_v5 = vld [vmem:[#allocation2 + $0x172] sm:$0xff] }
  0x7e   : > { %4921 = vmatmul.mubr.msk.f32.gmra.mxu1 %vm438_vm0, %v5914_v26 }
  0x7f   : > { %4923 = vmatprep.mubr.msk.f32.mxu1 %vm438_vm0, %v5918_v20 }
  0x80   : > { %4974 = vmatmul.mubr.msk.f32.gmra.mxu0 %vm438_vm0, %v5922_v11 }
  0x81   : > { %4976 = vmatprep.mubr.msk.f32.mxu0 %vm438_vm0, %v5926_v58  ;;  %v5957_v58 = vld [vmem:[%s6885_s1 + $0x40] sm:$0xff] }
  0x82   : > { %4924 = vmatmul.mubr.msk.f32.gmra.mxu1 %vm438_vm0, %v5930_v50 }
  0x83   : > { %4926 = vmatprep.mubr.msk.f32.mxu1 %vm438_vm0, %v5934_v16 }
  0x84   : > { %4977 = vmatmul.mubr.msk.f32.gmra.mxu0 %vm438_vm0, %v5938_v5 }
  0x85   : > { %5031 = vmatprep.mubr.msk.f32.mxu0 %vm438_vm0, %v5516_v25  ;;  %v5967_v25 = vld [vmem:[%s6885_s1 + $0x38] sm:$0xff] }
  0x86   : > { %4927 = vmatmul.mubr.msk.f32.gmra.mxu1 %vm438_vm0, %v5944_v47 }
  0x87   : > { %4981 = vmatprep.mubr.msk.f32.mxu1 %vm438_vm0, %v5699_v57 }
  0x88   : > { %5032 = vmatmul.mubr.msk.f32.vlgmr.msra.gmra.mxu0 %vm438_vm0, %v5531_v33  ;;  %v6088_v33 = vld [vmem:[#allocation2 + $0x189] sm:$0xff] }
  0x89   : > { %5130 = vmatpush3.msra.mxu0 %v5690_v52  ;;  %5034 = vmatprep.mubr.msk.f32.mxu0 %vm438_vm0, %v5542_v38  ;;  %v6094_v38 = vld [vmem:[#allocation2 + $0x188] sm:$0xff] }
  0x8a   : > { %4982 = vmatmul.mubr.msk.f32.vlgmr.msra.gmra.mxu1 %vm438_vm0, %v5719_v63  ;;  %5229 = vmatprep.subr.mxu0 %v5957_v58  ;;  %v6997_v63 = vld [vmem:[#allocation24_spill] sm:$0xff] }
  0x8b   : > { %5080 = vmatpush3.msra.mxu1 %v5708_v61  ;;  %4984 = vmatprep.mubr.msk.f32.mxu1 %vm438_vm0, %v5723_v6  ;;  %v6996_v61 = vld [vmem:[#allocation23_spill] sm:$0xff] }
  0x8c   : > { %5035 = vmatmul.mubr.msk.f32.gmra.mxu0 %vm438_vm0, %v5573_v59  ;;  %5179 = vmatprep.subr.mxu1 %v5967_v25  ;;  %v6979_v59 = vld [vmem:[#allocation6_spill] sm:$0xff] }
  0x8d   : > { %5037 = vmatprep.mubr.msk.f32.mxu0 %vm438_vm0, %v5575_v60  ;;  %v6980_v60 = vld [vmem:[#allocation7_spill] sm:$0xff] }
  0x8e   : > { %4985 = vmatmul.mubr.msk.f32.gmra.mxu1 %vm438_vm0, %v5738_v7 }
  0x8f   : > { %4987 = vmatprep.mubr.msk.f32.mxu1 %vm438_vm0, %v5742_v8 }
  0x90   : > { %5038 = vmatmul.mubr.msk.f32.gmra.mxu0 %vm438_vm0, %v5597_v10  ;;  %v6983_v10 = vld [vmem:[#allocation10_spill] sm:$0xff] }
  0x91   : > { %5040 = vmatprep.mubr.msk.f32.mxu0 %vm438_vm0, %v5602_v15  ;;  %v6984_v15 = vld [vmem:[#allocation11_spill] sm:$0xff] }
  0x92   : > { %4988 = vmatmul.mubr.msk.f32.gmra.mxu1 %vm438_vm0, %v5754_v13 }
  0x93   : > { %4990 = vmatprep.mubr.msk.f32.mxu1 %vm438_vm0, %v5758_v14 }
  0x94   : > { %5041 = vmatmul.mubr.msk.f32.gmra.mxu0 %vm438_vm0, %v5621_v29  ;;  %v6987_v29 = vld [vmem:[#allocation14_spill] sm:$0xff] }
  0x95   : > { %5043 = vmatprep.mubr.msk.f32.mxu0 %vm438_vm0, %v5626_v30  ;;  %v6988_v30 = vld [vmem:[#allocation15_spill] sm:$0xff] }
  0x96   : > { %4991 = vmatmul.mubr.msk.f32.gmra.mxu1 %vm438_vm0, %v5770_v18 }
  0x97   : > { %4993 = vmatprep.mubr.msk.f32.mxu1 %vm438_vm0, %v5774_v19 }
  0x98   : > { %5044 = vmatmul.mubr.msk.f32.gmra.mxu0 %vm438_vm0, %v5640_v35 }
  0x99   : > { %5046 = vmatprep.mubr.msk.f32.mxu0 %vm438_vm0, %v5642_v36  ;;  %v6991_v36 = vld [vmem:[#allocation18_spill] sm:$0xff] }
  0x9a   : > { %4994 = vmatmul.mubr.msk.f32.gmra.mxu1 %vm438_vm0, %v5786_v46 }
  0x9b   : > { %4996 = vmatprep.mubr.msk.f32.mxu1 %vm438_vm0, %v5790_v48 }
  0x9c   : > { %5047 = vmatmul.mubr.msk.f32.gmra.mxu0 %vm438_vm0, %v5656_v40  ;;  %v6993_v40 = vld [vmem:[#allocation20_spill] sm:$0xff] }
  0x9d   : > { %5049 = vmatprep.mubr.msk.f32.mxu0 %vm438_vm0, %v5658_v41 }
  0x9e   : > { %4997 = vmatmul.mubr.msk.f32.gmra.mxu1 %vm438_vm0, %v5802_v2 }
  0x9f   : > { %4999 = vmatprep.mubr.msk.f32.mxu1 %vm438_vm0, %v5806_v54 }
  0xa0   : > { %5050 = vmatmul.mubr.msk.f32.gmra.mxu0 %vm438_vm0, %v5672_v45  ;;  %v6995_v45 = vld [vmem:[#allocation22_spill] sm:$0xff] }
  0xa1   : > { %5052 = vmatprep.mubr.msk.f32.mxu0 %vm438_vm0, %v5512_v23  ;;  %v6078_v23 = vld [vmem:[#allocation2 + $0x181] sm:$0xff] }
  0xa2   : > { %5000 = vmatmul.mubr.msk.f32.gmra.mxu1 %vm438_vm0, %v5818_v62 }
  0xa3   : > { %5002 = vmatprep.mubr.msk.f32.mxu1 %vm438_vm0, %v5822_v4 }
  0xa4   : > { %5053 = vmatmul.mubr.msk.f32.gmra.mxu0 %vm438_vm0, %v5514_v24  ;;  %v6975_v24 = vld [vmem:[#allocation3_spill] sm:$0xff] }
  0xa5   : > { %5055 = vmatprep.mubr.msk.f32.mxu0 %vm438_vm0, %v5529_v32  ;;  %v6084_v32 = vld [vmem:[#allocation2 + $0x180] sm:$0xff]  ;;  %6976 = vst [vmem:[#allocation3_spill] sm:$0xff] %v6088_v33 }
  0xa6   : > { %5003 = vmatmul.mubr.msk.f32.gmra.mxu1 %vm438_vm0, %v5834_v53 }
  0xa7   : > { %5005 = vmatprep.mubr.msk.f32.mxu1 %vm438_vm0, %v5838_v55 }
  0xa8   : > { %5056 = vmatmul.mubr.msk.f32.gmra.mxu0 %vm438_vm0, %v5553_v44  ;;  %v6977_v44 = vld [vmem:[#allocation4_spill] sm:$0xff] }
  0xa9   : > { %5058 = vmatprep.mubr.msk.f32.mxu0 %vm438_vm0, %v5560_v51  ;;  %v6978_v51 = vld [vmem:[#allocation5_spill] sm:$0xff] }
  0xaa   : > { %5006 = vmatmul.mubr.msk.f32.gmra.mxu1 %vm438_vm0, %v5850_v21 }
  0xab   : > { %5008 = vmatprep.mubr.msk.f32.mxu1 %vm438_vm0, %v5854_v0 }
  0xac   : > { %5059 = vmatmul.mubr.msk.f32.gmra.mxu0 %vm438_vm0, %v5588_v1  ;;  %v6981_v1 = vld [vmem:[#allocation8_spill] sm:$0xff] }
  0xad   : > { %5061 = vmatprep.mubr.msk.f32.mxu0 %vm438_vm0, %v5595_v9  ;;  %v6982_v9 = vld [vmem:[#allocation9_spill] sm:$0xff] }
  0xae   : > { %5009 = vmatmul.mubr.msk.f32.gmra.mxu1 %vm438_vm0, %v5866_v17 }
  0xaf   : > { %5011 = vmatprep.mubr.msk.f32.mxu1 %vm438_vm0, %v5870_v56 }
  0xb0   : > { %5062 = vmatmul.mubr.msk.f32.gmra.mxu0 %vm438_vm0, %v5612_v27  ;;  %v6985_v27 = vld [vmem:[#allocation12_spill] sm:$0xff] }
  0xb1   : > { %5064 = vmatprep.mubr.msk.f32.mxu0 %vm438_vm0, %v5619_v28  ;;  %v6986_v28 = vld [vmem:[#allocation13_spill] sm:$0xff] }
  0xb2   : > { %5012 = vmatmul.mubr.msk.f32.gmra.mxu1 %vm438_vm0, %v5882_v12 }
  0xb3   : > { %5014 = vmatprep.mubr.msk.f32.mxu1 %vm438_vm0, %v5886_v3 }
  0xb4   : > { %5065 = vmatmul.mubr.msk.f32.gmra.mxu0 %vm438_vm0, %v5634_v31  ;;  %v6989_v31 = vld [vmem:[#allocation16_spill] sm:$0xff] }
  0xb5   : > { %5067 = vmatprep.mubr.msk.f32.mxu0 %vm438_vm0, %v5638_v34  ;;  %v6990_v34 = vld [vmem:[#allocation17_spill] sm:$0xff] }
  0xb6   : > { %5015 = vmatmul.mubr.msk.f32.gmra.mxu1 %vm438_vm0, %v5898_v22 }
  0xb7   : > { %5017 = vmatprep.mubr.msk.f32.mxu1 %vm438_vm0, %v5902_v49 }
  0xb8   : > { %5068 = vmatmul.mubr.msk.f32.gmra.mxu0 %vm438_vm0, %v5650_v37  ;;  %v6992_v37 = vld [vmem:[#allocation19_spill] sm:$0xff] }
  0xb9   : > { %5070 = vmatprep.mubr.msk.f32.mxu0 %vm438_vm0, %v5654_v39 }
  0xba   : > { %5018 = vmatmul.mubr.msk.f32.gmra.mxu1 %vm438_vm0, %v5914_v26 }
  0xbb   : > { %5020 = vmatprep.mubr.msk.f32.mxu1 %vm438_vm0, %v5918_v20 }
  0xbc   : > { %5071 = vmatmul.mubr.msk.f32.gmra.mxu0 %vm438_vm0, %v5666_v42  ;;  %v6994_v42 = vld [vmem:[#allocation21_spill] sm:$0xff] }
  0xbd   : > { %5073 = vmatprep.mubr.msk.f32.mxu0 %vm438_vm0, %v5670_v43 }
  0xbe   : > { %5021 = vmatmul.mubr.msk.f32.gmra.mxu1 %vm438_vm0, %v5930_v50 }
  0xbf   : > { %5023 = vmatprep.mubr.msk.f32.mxu1 %vm438_vm0, %v5934_v16 }
  0xc0   : > { %5074 = vmatmul.mubr.msk.f32.gmra.mxu0 %vm438_vm0, %v6975_v24 }
  0xc1   : > { %5076 = vmatprep.mubr.msk.f32.mxu0 %vm438_vm0, %v6078_v23 }
  0xc2   : > { %5024 = vmatmul.mubr.msk.f32.gmra.mxu1 %vm438_vm0, %v5944_v47 }
  0xc3   : > { %5026 = vmatprep.mubr.msk.f32.mxu1 %vm438_vm0, %v6084_v32 }
  0xc4   : > { %5077 = vmatmul.mubr.msk.f32.gmra.mxu0 %vm438_vm0, %v6088_v33 }
  0xc5   : > { %5131 = vmatprep.mubr.msk.f32.mxu0 %vm438_vm0, %v5723_v6 }
  0xc6   : > { %5027 = vmatmul.mubr.msk.f32.gmra.mxu1 %vm438_vm0, %v6094_v38 }
  0xc7   : > { %5081 = vmatprep.mubr.msk.f32.mxu1 %vm438_vm0, %v6977_v44  ;;  %v3162_v44 = vld [vmem:[#allocation2 + $0x31] sm:$0xff] }
  0xc8   : > { %5132 = vmatmul.mubr.msk.f32.vlgmr.msra.gmra.mxu0 %vm438_vm0, %v5738_v7 }
  0xc9   : > { %5230 = vmatpush3.msra.mxu0 %v5957_v58  ;;  %5134 = vmatprep.mubr.msk.f32.mxu0 %vm438_vm0, %v5742_v8 }
  0xca   : > { %5082 = vmatmul.mubr.msk.f32.vlgmr.msra.gmra.mxu1 %vm438_vm0, %v6978_v51 }
  0xcb   : > { %5180 = vmatpush3.msra.mxu1 %v5967_v25  ;;  %5084 = vmatprep.mubr.msk.f32.mxu1 %vm438_vm0, %v6979_v59  ;;  %v2806_v25 = vld [vmem:[#allocation2 + $0x1a0] sm:$0xff] }
  0xcc   : > { %5135 = vmatmul.mubr.msk.f32.gmra.mxu0 %vm438_vm0, %v5754_v13  ;;  %v6998_v13 = vld [vmem:[#allocation25_spill] sm:$0xff] }
  0xcd   : > { %5137 = vmatprep.mubr.msk.f32.mxu0 %vm438_vm0, %v5758_v14  ;;  %v6999_v14 = vld [vmem:[#allocation26_spill] sm:$0xff] }
  0xce   : > { %5085 = vmatmul.mubr.msk.f32.gmra.mxu1 %vm438_vm0, %v6980_v60 }
  0xcf   : > { %5087 = vmatprep.mubr.msk.f32.mxu1 %vm438_vm0, %v6981_v1 }
  0xd0   : > { %5138 = vmatmul.mubr.msk.f32.gmra.mxu0 %vm438_vm0, %v5770_v18 }
  0xd1   : > { %5140 = vmatprep.mubr.msk.f32.mxu0 %vm438_vm0, %v5774_v19 }
  0xd2   : > { %5088 = vmatmul.mubr.msk.f32.gmra.mxu1 %vm438_vm0, %v6982_v9 }
  0xd3   : > { %5090 = vmatprep.mubr.msk.f32.mxu1 %vm438_vm0, %v6983_v10 }
  0xd4   : > { %5141 = vmatmul.mubr.msk.f32.gmra.mxu0 %vm438_vm0, %v5786_v46  ;;  %v7001_v46 = vld [vmem:[#allocation28_spill] sm:$0xff] }
  0xd5   : > { %5143 = vmatprep.mubr.msk.f32.mxu0 %vm438_vm0, %v5790_v48 }
  0xd6   : > { %5091 = vmatmul.mubr.msk.f32.gmra.mxu1 %vm438_vm0, %v6984_v15  ;;  %v6160_v35 = vpop.f32.mrf.mxu0 }
  0xd7   : > { %5093 = vmatprep.mubr.msk.f32.mxu1 %vm438_vm0, %v6985_v27 }
  0xd8   : > { %5144 = vmatmul.mubr.msk.f32.gmra.mxu0 %vm438_vm0, %v5802_v2  ;;  %v6170_v39 = vpop.f32.mrf.mxu0  ;;  %v7003_v2 = vld [vmem:[#allocation30_spill] sm:$0xff] }
  0xd9   : > { %5146 = vmatprep.mubr.msk.f32.mxu0 %vm438_vm0, %v5806_v54 }
  0xda   : > { %5094 = vmatmul.mubr.msk.f32.gmra.mxu1 %vm438_vm0, %v6986_v28 }
  0xdb   : > { %5096 = vmatprep.mubr.msk.f32.mxu1 %vm438_vm0, %v6987_v29 }
  0xdc   : > { %5147 = vmatmul.mubr.msk.f32.gmra.mxu0 %vm438_vm0, %v5818_v62  ;;  %v7004_v62 = vld [vmem:[#allocation31_spill] sm:$0xff] }
  0xdd   : > { %5149 = vmatprep.mubr.msk.f32.mxu0 %vm438_vm0, %v5822_v4 }
  0xde   : > { %5097 = vmatmul.mubr.msk.f32.gmra.mxu1 %vm438_vm0, %v6988_v30 }
  0xdf   : > { %5099 = vmatprep.mubr.msk.f32.mxu1 %vm438_vm0, %v6989_v31 }
  0xe0   : > { %5150 = vmatmul.mubr.msk.f32.gmra.mxu0 %vm438_vm0, %v5834_v53  ;;  %v7002_v53 = vld [vmem:[#allocation29_spill] sm:$0xff] }
  0xe1   : > { %5152 = vmatprep.mubr.msk.f32.mxu0 %vm438_vm0, %v5838_v55 }
  0xe2   : > { %5100 = vmatmul.mubr.msk.f32.gmra.mxu1 %vm438_vm0, %v6990_v34 }
  0xe3   : > { %5102 = vmatprep.mubr.msk.f32.mxu1 %vm438_vm0, %v6991_v36 }
  0xe4   : > { %5153 = vmatmul.mubr.msk.f32.gmra.mxu0 %vm438_vm0, %v5850_v21  ;;  %v7000_v21 = vld [vmem:[#allocation27_spill] sm:$0xff] }
  0xe5   : > { %5155 = vmatprep.mubr.msk.f32.mxu0 %vm438_vm0, %v5854_v0 }
  0xe6   : > { %5103 = vmatmul.mubr.msk.f32.gmra.mxu1 %vm438_vm0, %v6992_v37 }
  0xe7   : > { %5105 = vmatprep.mubr.msk.f32.mxu1 %vm438_vm0, %v6993_v40 }
  0xe8   : > { %5156 = vmatmul.mubr.msk.f32.gmra.mxu0 %vm438_vm0, %v5866_v17 }
  0xe9   : > { %5158 = vmatprep.mubr.msk.f32.mxu0 %vm438_vm0, %v5870_v56  ;;  %v2805_v56 = vld [vmem:[#allocation2 + $0x198] sm:$0xff] }
  0xea   : > { %v6178_v41 = vpop.f32.mrf.mxu1  ;;  %5106 = vmatmul.mubr.msk.f32.gmra.mxu1 %vm438_vm0, %v6994_v42 }
  0xeb   : > { %v6182_v43 = vpop.f32.mrf.mxu0  ;;  %5108 = vmatprep.mubr.msk.f32.mxu1 %vm438_vm0, %v6995_v45 }
  0xec   : > { %v6186_v52 = vpop.f32.mrf.mxu1  ;;  %5159 = vmatmul.mubr.msk.f32.gmra.mxu0 %vm438_vm0, %v5882_v12 }
  0xed   : > { %v6190_v57 = vpop.f32.mrf.mxu0  ;;  %5161 = vmatprep.mubr.msk.f32.mxu0 %vm438_vm0, %v5886_v3 }
  0xee   : > { %v6194_v58 = vpop.f32.mrf.mxu1  ;;  %5109 = vmatmul.mubr.msk.f32.gmra.mxu1 %vm438_vm0, %v6996_v61 }
  0xef   : > { %5111 = vmatprep.mubr.msk.f32.mxu1 %vm438_vm0, %v6997_v63  ;;  %v6200_v6 = vpop.f32.mrf.mxu0 }
  0xf0   : > { %v6202_v7 = vpop.f32.mrf.mxu1  ;;  %5162 = vmatmul.mubr.msk.f32.gmra.mxu0 %vm438_vm0, %v5898_v22 }
  0xf1   : > { %v6206_v8 = vpop.f32.mrf.mxu0  ;;  %5164 = vmatprep.mubr.msk.f32.mxu0 %vm438_vm0, %v5902_v49 }
  0xf2   : > { %v6210_v12 = vpop.f32.mrf.mxu1  ;;  %5112 = vmatmul.mubr.msk.f32.gmra.mxu1 %vm438_vm0, %v6998_v13 }
  0xf3   : > { %5114 = vmatprep.mubr.msk.f32.mxu1 %vm438_vm0, %v6999_v14  ;;  %v6216_v17 = vpop.f32.mrf.mxu0 }
  0xf4   : > { %v6218_v18 = vpop.f32.mrf.mxu1  ;;  %5165 = vmatmul.mubr.msk.f32.gmra.mxu0 %vm438_vm0, %v5914_v26 }
  0xf5   : > { %v6222_v22 = vpop.f32.mrf.mxu0  ;;  %5167 = vmatprep.mubr.msk.f32.mxu0 %vm438_vm0, %v5918_v20 }
  0xf6   : > { %v6226_v19 = vpop.f32.mrf.mxu1  ;;  %5115 = vmatmul.mubr.msk.f32.gmra.mxu1 %vm438_vm0, %v7000_v21 }
  0xf7   : > { %5117 = vmatprep.mubr.msk.f32.mxu1 %vm438_vm0, %v7001_v46  ;;  %v6232_v48 = vpop.f32.mrf.mxu0 }
  0xf8   : > { %v6234_v49 = vpop.f32.mrf.mxu1  ;;  %5168 = vmatmul.mubr.msk.f32.gmra.mxu0 %vm438_vm0, %v5930_v50 }
  0xf9   : > { %v6238_v26 = vpop.f32.mrf.mxu0  ;;  %5170 = vmatprep.mubr.msk.f32.mxu0 %vm438_vm0, %v5934_v16 }
  0xfa   : > { %v6242_v20 = vpop.f32.mrf.mxu1  ;;  %5118 = vmatmul.mubr.msk.f32.gmra.mxu1 %vm438_vm0, %v7002_v53 }
  0xfb   : > { %5120 = vmatprep.mubr.msk.f32.mxu1 %vm438_vm0, %v7003_v2  ;;  %v6248_v54 = vpop.f32.mrf.mxu0  ;;  %v3163_v2 = vld [vmem:[#allocation2 + $0x39] sm:$0xff] }
  0xfc   : > { %v6250_v55 = vpop.f32.mrf.mxu1  ;;  %5171 = vmatmul.mubr.msk.f32.gmra.mxu0 %vm438_vm0, %v5944_v47  ;;  %v6270_v47 = vld [vmem:[#allocation2 + $0x182] sm:$0xff] }
  0xfd   : > { %v6254_v50 = vpop.f32.mrf.mxu0  ;;  %5173 = vmatprep.mubr.msk.f32.mxu0 %vm438_vm0, %v6084_v32  ;;  %v6283_v32 = vld [vmem:[#allocation2 + $0x18a] sm:$0xff] }
  0xfe   : > { %v6258_v16 = vpop.f32.mrf.mxu1  ;;  %5121 = vmatmul.mubr.msk.f32.gmra.mxu1 %vm438_vm0, %v5922_v11 }
  0xff   : > { %5123 = vmatprep.mubr.msk.f32.mxu1 %vm438_vm0, %v7004_v62  ;;  %v6264_v4 = vpop.f32.mrf.mxu0  ;;  %v3164_v62 = vld [vmem:[#allocation2 + $0x49] sm:$0xff] }
 0x100   : > { %v6266_v0 = vpop.f32.mrf.mxu1  ;;  %5174 = vmatmul.mubr.msk.f32.gmra.mxu0 %vm438_vm0, %v6094_v38 }
 0x101   : > { %7005 = vst [vmem:[#allocation4_spill] sm:$0xff] %v6266_v0  ;;  %v6272_v3 = vpop.f32.mrf.mxu0  ;;  %5176 = vmatprep.mubr.msk.f32.mxu0 %vm438_vm0, %v2805_v56 }
 0x102   : > { %v6275_v24 = vpop.f32.mrf.mxu1  ;;  %5124 = vmatmul.mubr.msk.f32.gmra.mxu1 %vm438_vm0, %v5938_v5 }
 0x103   : > { %7006 = vst [vmem:[#allocation5_spill] sm:$0xff] %v6275_v24  ;;  %5126 = vmatprep.mubr.msk.f32.mxu1 %vm438_vm0, %v6270_v47  ;;  %v6281_v11 = vpop.f32.mrf.mxu0 }
 0x104   : > { %v6285_v38 = vpop.f32.mrf.mxu1  ;;  %5177 = vmatmul.mubr.msk.f32.gmra.mxu0 %vm438_vm0, %v2806_v25 }
 0x105   : > { %7007 = vst [vmem:[#allocation6_spill] sm:$0xff] %v6285_v38  ;;  %v6288_v51 = vpop.f32.mrf.mxu0  ;;  %5231 = vmatprep.mubr.msk.f32.mxu0 %vm438_vm0, %v6979_v59 }
 0x106   : > { %v6292_v53 = vpop.f32.mrf.mxu1  ;;  %5127 = vmatmul.mubr.msk.f32.gmra.mxu1 %vm438_vm0, %v6283_v32 }
 0x107   : > { %7008 = vst [vmem:[#allocation7_spill] sm:$0xff] %v6292_v53  ;;  %5181 = vmatprep.mubr.msk.f32.mxu1 %vm438_vm0, %v3162_v44  ;;  %v4933_v5 = vpop.f32.mrf.mxu0  ;;  %v3165_v44 = vld [vmem:[#allocation2 + $0x51] sm:$0xff] }
 0x108   : > { %v6297_v56 = vpop.f32.mrf.mxu1  ;;  %5232 = vmatmul.mubr.msk.f32.vlgmr.msra.gmra.mxu0 %vm438_vm0, %v6980_v60 }
 0x109   : > { %7009 = vst [vmem:[#allocation8_spill] sm:$0xff] %v6297_v56  ;;  %v1422_v25 = vpop.f32.mrf.mxu0  ;;  %5234 = vmatprep.mubr.msk.f32.mxu0 %vm438_vm0, %v6981_v1  ;;  %v3166_v56 = vld [vmem:[#allocation2 + $0x61] sm:$0xff] }
 0x10a   : > { %v4883_v59 = vpop.f32.mrf.mxu1  ;;  %5182 = vmatmul.mubr.msk.f32.vlgmr.msra.gmra.mxu1 %vm438_vm0, %v3163_v2 }
 0x10b   : > { %v1073_v53 = vadd.f32 %v4883_v59, %v6160_v35  ;;  %5184 = vmatprep.mubr.msk.f32.mxu1 %vm438_vm0, %v3164_v62  ;;  %v3167_v59 = vld [vmem:[#allocation2 + $0x69] sm:$0xff] }
 0x10c   : > { %v1067_v38 = vpop.f32.mrf.mxu1  ;;  %v4936_v24 = vpop.f32.mrf.mxu0  ;;  %5235 = vmatmul.mubr.msk.f32.gmra.mxu0 %vm438_vm0, %v6982_v9 }
 0x10d   : > { %v6308_v60 = vadd.f32 %v4933_v5, %v1073_v53  ;;  %v1068_v33 = vadd.f32 %v1067_v38, %v6170_v39  ;;  %5237 = vmatprep.mubr.msk.f32.mxu0 %vm438_vm0, %v6983_v10  ;;  %v3168_v39 = vld [vmem:[#allocation2 + $0x79] sm:$0xff] }
 0x10e   : > { %v4886_v1 = vpop.f32.mrf.mxu1  ;;  %5185 = vmatmul.mubr.msk.f32.gmra.mxu1 %vm438_vm0, %v3165_v44  ;;  %v1432_v35 = vpop.f32.mrf.mxu0 }
 0x10f   : > { %v6314_v2 = vadd.f32 %v1422_v25, %v1068_v33  ;;  %v1083_v62 = vadd.f32 %v4886_v1, %v6182_v43  ;;  %5187 = vmatprep.mubr.msk.f32.mxu1 %vm438_vm0, %v3166_v56  ;;  %v3169_v56 = vld [vmem:[#allocation2 + $0x81] sm:$0xff] }
 0x110   : > { %v1077_v9 = vpop.f32.mrf.mxu1  ;;  %v4939_v0 = vpop.f32.mrf.mxu0  ;;  %5238 = vmatmul.mubr.msk.f32.gmra.mxu0 %vm438_vm0, %v6984_v15 }
 0x111   : > { %v6320_v38 = vadd.f32 %v4936_v24, %v1083_v62  ;;  %v1078_v10 = vadd.f32 %v1077_v9, %v6190_v57  ;;  %5240 = vmatprep.mubr.msk.f32.mxu0 %vm438_vm0, %v6985_v27  ;;  %v3170_v57 = vld [vmem:[#allocation2 + $0x91] sm:$0xff]  ;;  %v3171_v62 = vld [vmem:[#allocation2 + $0x99] sm:$0xff] }
 0x112   : > { %v4889_v33 = vpop.f32.mrf.mxu1  ;;  %5188 = vmatmul.mubr.msk.f32.gmra.mxu1 %vm438_vm0, %v3167_v59  ;;  %v1442_v43 = vpop.f32.mrf.mxu0 }
 0x113   : > { %v6326_v53 = vadd.f32 %v1432_v35, %v1078_v10  ;;  %v1093_v5 = vadd.f32 %v4889_v33, %v6200_v6  ;;  %5190 = vmatprep.mubr.msk.f32.mxu1 %vm438_vm0, %v3168_v39  ;;  %v3173_v33 = vld [vmem:[#allocation2 + $0xb1] sm:$0xff] }
 0x114   : > { %v1087_v15 = vpop.f32.mrf.mxu1  ;;  %v4942_v25 = vpop.f32.mrf.mxu0  ;;  %5241 = vmatmul.mubr.msk.f32.gmra.mxu0 %vm438_vm0, %v6986_v28 }
 0x115   : > { %v6332_v24 = vadd.f32 %v4939_v0, %v1093_v5  ;;  %v1088_v27 = vadd.f32 %v1087_v15, %v6206_v8  ;;  %5243 = vmatprep.mubr.msk.f32.mxu0 %vm438_vm0, %v6987_v29  ;;  %v3172_v8 = vld [vmem:[#allocation2 + $0xa9] sm:$0xff] }
 0x116   : > { %v4892_v44 = vpop.f32.mrf.mxu1  ;;  %5191 = vmatmul.mubr.msk.f32.gmra.mxu1 %vm438_vm0, %v3169_v56  ;;  %v1452_v6 = vpop.f32.mrf.mxu0 }
 0x117   : > { %v6338_v1 = vadd.f32 %v1442_v43, %v1088_v27  ;;  %v1103_v35 = vadd.f32 %v4892_v44, %v6216_v17  ;;  %5193 = vmatprep.mubr.msk.f32.mxu1 %vm438_vm0, %v3170_v57  ;;  %v3175_v57 = vld [vmem:[#allocation2 + $0xc9] sm:$0xff] }
 0x118   : > { %v1097_v28 = vpop.f32.mrf.mxu1  ;;  %v4945_v59 = vpop.f32.mrf.mxu0  ;;  %5244 = vmatmul.mubr.msk.f32.gmra.mxu0 %vm438_vm0, %v6988_v30 }
 0x119   : > { %v6344_v0 = vadd.f32 %v4942_v25, %v1103_v35  ;;  %v1098_v29 = vadd.f32 %v1097_v28, %v6222_v22  ;;  %5246 = vmatprep.mubr.msk.f32.mxu0 %vm438_vm0, %v6989_v31  ;;  %v3174_v22 = vld [vmem:[#allocation2 + $0xc1] sm:$0xff] }
 0x11a   : > { %v4895_v9 = vpop.f32.mrf.mxu1  ;;  %5194 = vmatmul.mubr.msk.f32.gmra.mxu1 %vm438_vm0, %v3171_v62  ;;  %v1462_v17 = vpop.f32.mrf.mxu0  ;;  %v3177_v28 = vld [vmem:[#allocation2 + $0xe1] sm:$0xff] }
 0x11b   : > { %v6350_v39 = vadd.f32 %v1452_v6, %v1098_v29  ;;  %v1113_v10 = vadd.f32 %v4895_v9, %v6232_v48  ;;  %5196 = vmatprep.mubr.msk.f32.mxu1 %vm438_vm0, %v3172_v8 }
 0x11c   : > { %v1107_v30 = vpop.f32.mrf.mxu1  ;;  %v4948_v43 = vpop.f32.mrf.mxu0  ;;  %5247 = vmatmul.mubr.msk.f32.gmra.mxu0 %vm438_vm0, %v6990_v34 }
 0x11d   : > { %v6356_v5 = vadd.f32 %v4945_v59, %v1113_v10  ;;  %v1108_v31 = vadd.f32 %v1107_v30, %v6238_v26  ;;  %5249 = vmatprep.mubr.msk.f32.mxu0 %vm438_vm0, %v6991_v36  ;;  %v3176_v26 = vld [vmem:[#allocation2 + $0xd9] sm:$0xff] }
 0x11e   : > { %v4898_v56 = vpop.f32.mrf.mxu1  ;;  %5197 = vmatmul.mubr.msk.f32.gmra.mxu1 %vm438_vm0, %v3173_v33  ;;  %v1472_v48 = vpop.f32.mrf.mxu0  ;;  %v3179_v10 = vld [vmem:[#allocation2 + $0xf9] sm:$0xff] }
 0x11f   : > { %v6362_v15 = vadd.f32 %v1462_v17, %v1108_v31  ;;  %v1123_v25 = vadd.f32 %v4898_v56, %v6248_v54  ;;  %5199 = vmatprep.mubr.msk.f32.mxu1 %vm438_vm0, %v3174_v22  ;;  %v3181_v56 = vld [vmem:[#allocation2 + $0x111] sm:$0xff] }
 0x120   : > { %v1117_v34 = vpop.f32.mrf.mxu1  ;;  %v4951_v27 = vpop.f32.mrf.mxu0  ;;  %5250 = vmatmul.mubr.msk.f32.gmra.mxu0 %vm438_vm0, %v6992_v37 }
 0x121   : > { %v6368_v44 = vadd.f32 %v4948_v43, %v1123_v25  ;;  %v1118_v36 = vadd.f32 %v1117_v34, %v6254_v50  ;;  %5252 = vmatprep.mubr.msk.f32.mxu0 %vm438_vm0, %v6993_v40  ;;  %v3178_v50 = vld [vmem:[#allocation2 + $0xf1] sm:$0xff] }
 0x122   : > { %v4901_v6 = vpop.f32.mrf.mxu1  ;;  %5200 = vmatmul.mubr.msk.f32.gmra.mxu1 %vm438_vm0, %v3175_v57  ;;  %v1482_v54 = vpop.f32.mrf.mxu0 }
 0x123   : > { %v6374_v35 = vadd.f32 %v1472_v48, %v1118_v36  ;;  %v1133_v62 = vadd.f32 %v4901_v6, %v6264_v4  ;;  %5202 = vmatprep.mubr.msk.f32.mxu1 %vm438_vm0, %v3176_v26  ;;  %v3183_v26 = vld [vmem:[#allocation2 + $0x129] sm:$0xff] }
 0x124   : > { %v1127_v37 = vpop.f32.mrf.mxu1  ;;  %v4954_v59 = vpop.f32.mrf.mxu0  ;;  %5253 = vmatmul.mubr.msk.f32.gmra.mxu0 %vm438_vm0, %v6994_v42 }
 0x125   : > { %v6380_v8 = vadd.f32 %v4951_v27, %v1133_v62  ;;  %v1128_v40 = vadd.f32 %v1127_v37, %v6272_v3  ;;  %5255 = vmatprep.mubr.msk.f32.mxu0 %vm438_vm0, %v6995_v45  ;;  %v3180_v3 = vld [vmem:[#allocation2 + $0x109] sm:$0xff] }
 0x126   : > { %v4904_v29 = vpop.f32.mrf.mxu1  ;;  %5203 = vmatmul.mubr.msk.f32.gmra.mxu1 %vm438_vm0, %v3177_v28  ;;  %v1492_v4 = vpop.f32.mrf.mxu0  ;;  %v3573_v28 = vld [vmem:[#allocation2 + $0x152] sm:$0xff] }
 0x127   : > { %v6386_v9 = vadd.f32 %v1482_v54, %v1128_v40  ;;  %v1143_v17 = vadd.f32 %v4904_v29, %v6281_v11  ;;  %5205 = vmatprep.mubr.msk.f32.mxu1 %vm438_vm0, %v3178_v50  ;;  %v3572_v54 = vld [vmem:[#allocation2 + $0x142] sm:$0xff] }
 0x128   : > { %v1137_v42 = vpop.f32.mrf.mxu1  ;;  %v4957_v33 = vpop.f32.mrf.mxu0  ;;  %5256 = vmatmul.mubr.msk.f32.gmra.mxu0 %vm438_vm0, %v6996_v61 }
 0x129   : > { %v6392_v30 = vadd.f32 %v4954_v59, %v1143_v17  ;;  %v1138_v45 = vadd.f32 %v1137_v42, %v6288_v51  ;;  %5258 = vmatprep.mubr.msk.f32.mxu0 %vm438_vm0, %v6997_v63  ;;  %v3182_v51 = vld [vmem:[#allocation2 + $0x121] sm:$0xff] }
 0x12a   : > { %v4907_v43 = vpop.f32.mrf.mxu1  ;;  %5206 = vmatmul.mubr.msk.f32.gmra.mxu1 %vm438_vm0, %v3179_v10  ;;  %v1502_v11 = vpop.f32.mrf.mxu0 }
 0x12b   : > { %v6398_v22 = vadd.f32 %v1492_v4, %v1138_v45  ;;  %v1153_v31 = vadd.f32 %v4907_v43, %v6178_v41  ;;  %5208 = vmatprep.mubr.msk.f32.mxu1 %vm438_vm0, %v3180_v3  ;;  %v3574_v4 = vld [vmem:[#allocation2 + $0x15a] sm:$0xff] }
 0x12c   : > { %v1147_v61 = vpop.f32.mrf.mxu1  ;;  %v4960_v48 = vpop.f32.mrf.mxu0  ;;  %5259 = vmatmul.mubr.msk.f32.gmra.mxu0 %vm438_vm0, %v6998_v13  ;;  %v3187_v3 = vld [vmem:[#allocation2 + $0x159] sm:$0xff] }
 0x12d   : > { %v6404_v25 = vadd.f32 %v4957_v33, %v1153_v31  ;;  %v1148_v63 = vadd.f32 %v1147_v61, %v6186_v52  ;;  %5261 = vmatprep.mubr.msk.f32.mxu0 %vm438_vm0, %v6999_v14  ;;  %v3184_v52 = vld [vmem:[#allocation2 + $0x139] sm:$0xff] }
 0x12e   : > { %v4910_v57 = vpop.f32.mrf.mxu1  ;;  %5209 = vmatmul.mubr.msk.f32.gmra.mxu1 %vm438_vm0, %v3181_v56  ;;  %v1512_v41 = vpop.f32.mrf.mxu0  ;;  %v3576_v56 = vld [vmem:[#allocation2 + $0x172] sm:$0xff] }
 0x12f   : > { %v6410_v34 = vadd.f32 %v1502_v11, %v1148_v63  ;;  %v1163_v27 = vadd.f32 %v4910_v57, %v6194_v58  ;;  %5211 = vmatprep.mubr.msk.f32.mxu1 %vm438_vm0, %v3182_v51  ;;  %v3189_v63 = vld [vmem:[#allocation2 + $0x171] sm:$0xff] }
 0x130   : > { %v1157_v13 = vpop.f32.mrf.mxu1  ;;  %v4963_v36 = vpop.f32.mrf.mxu0  ;;  %5262 = vmatmul.mubr.msk.f32.gmra.mxu0 %vm438_vm0, %v7000_v21  ;;  %v3185_v21 = vld [vmem:[#allocation2 + $0x141] sm:$0xff] }
 0x131   : > { %v6416_v6 = vadd.f32 %v4960_v48, %v1163_v27  ;;  %v1158_v14 = vadd.f32 %v1157_v13, %v6202_v7  ;;  %5264 = vmatprep.mubr.msk.f32.mxu0 %vm438_vm0, %v7001_v46  ;;  %v3186_v7 = vld [vmem:[#allocation2 + $0x151] sm:$0xff] }
 0x132   : > { %v4913_v62 = vpop.f32.mrf.mxu1  ;;  %5212 = vmatmul.mubr.msk.f32.gmra.mxu1 %vm438_vm0, %v3183_v26  ;;  %v1522_v58 = vpop.f32.mrf.mxu0 }
 0x133   : > { %v6422_v37 = vadd.f32 %v1512_v41, %v1158_v14  ;;  %v1173_v59 = vadd.f32 %v4913_v62, %v6210_v12  ;;  %5214 = vmatprep.mubr.msk.f32.mxu1 %vm438_vm0, %v3184_v52  ;;  %v3575_v12 = vld [vmem:[#allocation2 + $0x16a] sm:$0xff] }
 0x134   : > { %v1167_v50 = vpop.f32.mrf.mxu1  ;;  %v4966_v40 = vpop.f32.mrf.mxu0  ;;  %5265 = vmatmul.mubr.msk.f32.gmra.mxu0 %vm438_vm0, %v3572_v54 }
 0x135   : > { %v6427_v29 = vadd.f32 %v4963_v36, %v1173_v59  ;;  %v1168_v46 = vadd.f32 %v1167_v50, %v6218_v18  ;;  %5267 = vmatprep.mubr.msk.f32.mxu0 %vm438_vm0, %v3573_v28  ;;  %v3188_v18 = vld [vmem:[#allocation2 + $0x169] sm:$0xff]  ;;  %v3579_v36 = vld [vmem:[#allocation2 + $0x19a] sm:$0xff] }
 0x136   : > { %v4916_v17 = vpop.f32.mrf.mxu1  ;;  %5215 = vmatmul.mubr.msk.f32.gmra.mxu1 %vm438_vm0, %v3185_v21  ;;  %v1532_v10 = vpop.f32.mrf.mxu0  ;;  %v3580_v28 = vld [vmem:[#allocation2 + $0x1a2] sm:$0xff]  ;;  %v7011_v21 = vld [vmem:[#allocation3_spill] sm:$0xff] }
 0x137   : > { %v6432_v42 = vadd.f32 %v1522_v58, %v1168_v46  ;;  %v1183_v33 = vadd.f32 %v4916_v17, %v6226_v19  ;;  %5217 = vmatprep.mubr.msk.f32.mxu1 %vm438_vm0, %v3186_v7  ;;  %v7013_v17 = vld [vmem:[#allocation6_spill] sm:$0xff] }
 0x138   : > { %v1177_v45 = vpop.f32.mrf.mxu1  ;;  %v4969_v43 = vpop.f32.mrf.mxu0  ;;  %5268 = vmatmul.mubr.msk.f32.gmra.mxu0 %vm438_vm0, %v3574_v4 }
 0x139   : > { %v6437_v11 = vadd.f32 %v4966_v40, %v1183_v33  ;;  %v1178_v31 = vadd.f32 %v1177_v45, %v6234_v49  ;;  %5270 = vmatprep.mubr.msk.f32.mxu0 %vm438_vm0, %v3575_v12  ;;  %v7014_v45 = vld [vmem:[#allocation7_spill] sm:$0xff] }
 0x13a   : > { %v4919_v61 = vpop.f32.mrf.mxu1  ;;  %5218 = vmatmul.mubr.msk.f32.gmra.mxu1 %vm438_vm0, %v3187_v3  ;;  %v1542_v48 = vpop.f32.mrf.mxu0 }
 0x13b   : > { %v6442_v19 = vadd.f32 %v1532_v10, %v1178_v31  ;;  %v1193_v51 = vadd.f32 %v4919_v61, %v6242_v20  ;;  %5220 = vmatprep.mubr.msk.f32.mxu1 %vm438_vm0, %v3188_v18  ;;  %v7015_v61 = vld [vmem:[#allocation8_spill] sm:$0xff] }
 0x13c   : > { %v1187_v57 = vpop.f32.mrf.mxu1  ;;  %v4972_v41 = vpop.f32.mrf.mxu0  ;;  %5271 = vmatmul.mubr.msk.f32.gmra.mxu0 %vm438_vm0, %v3576_v56 }
 0x13d   : > { %v6447_v27 = vadd.f32 %v4969_v43, %v1193_v51  ;;  %v1188_v49 = vadd.f32 %v1187_v57, %v6250_v55  ;;  %5273 = vmatprep.mubr.msk.f32.mxu0 %vm438_vm0, %v6270_v47  ;;  %v3192_v55 = vld [vmem:[#allocation2 + $0x199] sm:$0xff] }
 0x13e   : > { %v4922_v26 = vpop.f32.mrf.mxu1  ;;  %5221 = vmatmul.mubr.msk.f32.gmra.mxu1 %vm438_vm0, %v3189_v63  ;;  %v1552_v13 = vpop.f32.mrf.mxu0  ;;  %v7010_v47 = vld [vmem:[#allocation4_spill] sm:$0xff] }
 0x13f   : > { %v6453_v20 = vadd.f32 %v1542_v48, %v1188_v49  ;;  %v1203_v52 = vadd.f32 %v4922_v26, %v6258_v16  ;;  %5223 = vmatprep.mubr.msk.f32.mxu1 %vm438_vm0, %v6078_v23  ;;  %v7012_v23 = vld [vmem:[#allocation5_spill] sm:$0xff] }
 0x140   : > { %v1197_v14 = vpop.f32.mrf.mxu1  ;;  %v4975_v54 = vpop.f32.mrf.mxu0  ;;  %5274 = vmatmul.mubr.msk.f32.gmra.mxu0 %vm438_vm0, %v6283_v32  ;;  %v3193_v32 = vld [vmem:[#allocation2 + $0x1a1] sm:$0xff] }
 0x141   : > { %v6460_v62 = vadd.f32 %v4972_v41, %v1203_v52  ;;  %v1198_v58 = vadd.f32 %v1197_v14, %v7010_v47  ;;  %5276 = vmatprep.mubr.msk.f32.mxu0 %vm438_vm0, %v3579_v36 }
 0x142   : > { %v4925_v59 = vpop.f32.mrf.mxu1  ;;  %5224 = vmatmul.mubr.msk.f32.gmra.mxu1 %vm438_vm0, %v7011_v21  ;;  %v1562_v16 = vpop.f32.mrf.mxu0 }
 0x143   : > { %v6466_v50 = vadd.f32 %v1552_v13, %v1198_v58  ;;  %v1213_v40 = vadd.f32 %v4925_v59, %v7012_v23  ;;  %5226 = vmatprep.mubr.msk.f32.mxu1 %vm438_vm0, %v3192_v55 }
 0x144   : > { %v1207_v7 = vpop.f32.mrf.mxu1  ;;  %v4978_v46 = vpop.f32.mrf.mxu0  ;;  %5277 = vmatmul.mubr.msk.f32.gmra.mxu0 %vm438_vm0, %v3580_v28 }
 0x145   : > { %v6471_v4 = vadd.f32 %v4975_v54, %v1213_v40  ;;  %v1208_v10 = vadd.f32 %v1207_v7, %v7013_v17 }
 0x146   : > { %v4928_v12 = vpop.f32.mrf.mxu1  ;;  %5227 = vmatmul.mubr.msk.f32.gmra.mxu1 %vm438_vm0, %v3193_v32  ;;  %v1572_v33 = vpop.f32.mrf.mxu0 }
 0x147   : > { %v6475_v3 = vadd.f32 %v1562_v16, %v1208_v10  ;;  %v1223_v43 = vadd.f32 %v4928_v12, %v7014_v45 }
 0x148   : > { %v1217_v18 = vpop.f32.mrf.mxu1  ;;  %v5033_v31 = vpop.f32.mrf.mxu0 }
 0x149   : > { %v6478_v56 = vadd.f32 %v4978_v46, %v1223_v43  ;;  %v1218_v48 = vadd.f32 %v1217_v18, %v7015_v61 }
 0x14a   : > { %v4983_v51 = vpop.f32.mrf.mxu1  ;;  %v2196_v63 = vpop.f32.mrf.mxu0 }
 0x14b   : > { %v6481_v57 = vadd.f32 %v1572_v33, %v1218_v48  ;;  %v1969_v41 = vadd.f32 %v4983_v51, %v6308_v60 }
 0x14c   : > { %v1809_v49 = vpop.f32.mrf.mxu1  ;;  %v5036_v26 = vpop.f32.mrf.mxu0 }
 0x14d   : > { %v6484_v13 = vadd.f32 %v5033_v31, %v1969_v41  ;;  %v1968_v36 = vadd.f32 %v1809_v49, %v6314_v2 }
 0x14e   : > { %v4986_v52 = vpop.f32.mrf.mxu1  ;;  %v2206_v14 = vpop.f32.mrf.mxu0 }
 0x14f   : > { %v6487_v54 = vadd.f32 %v2196_v63, %v1968_v36  ;;  %v1971_v55 = vadd.f32 %v4986_v52, %v6320_v38 }
 0x150   : > { %v1819_v47 = vpop.f32.mrf.mxu1  ;;  %v5039_v58 = vpop.f32.mrf.mxu0 }
 0x151   : > { %v6490_v28 = vadd.f32 %v5036_v26, %v1971_v55  ;;  %v1970_v59 = vadd.f32 %v1819_v47, %v6326_v53 }
 0x152   : > { %v4989_v21 = vpop.f32.mrf.mxu1  ;;  %v2216_v60 = vpop.f32.mrf.mxu0 }
 0x153   : > { %v6493_v16 = vadd.f32 %v2206_v14, %v1970_v59  ;;  %v1973_v23 = vadd.f32 %v4989_v21, %v6332_v24 }
 0x154   : > { %v1829_v40 = vpop.f32.mrf.mxu1  ;;  %v5042_v2 = vpop.f32.mrf.mxu0 }
 0x155   : > { %v6496_v32 = vadd.f32 %v5039_v58, %v1973_v23  ;;  %v1972_v7 = vadd.f32 %v1829_v40, %v6338_v1 }
 0x156   : > { %v4992_v46 = vpop.f32.mrf.mxu1  ;;  %v2226_v38 = vpop.f32.mrf.mxu0 }
 0x157   : > { %v6499_v17 = vadd.f32 %v2216_v60, %v1972_v7  ;;  %v1975_v10 = vadd.f32 %v4992_v46, %v6344_v0 }
 0x158   : > { %v1839_v12 = vpop.f32.mrf.mxu1  ;;  %v5045_v53 = vpop.f32.mrf.mxu0 }
 0x159   : > { %v6502_v33 = vadd.f32 %v5042_v2, %v1975_v10  ;;  %v1974_v45 = vadd.f32 %v1839_v12, %v6350_v39 }
 0x15a   : > { %v4995_v43 = vpop.f32.mrf.mxu1  ;;  %v2236_v24 = vpop.f32.mrf.mxu0 }
 0x15b   : > { %v6505_v18 = vadd.f32 %v2226_v38, %v1974_v45  ;;  %v1977_v31 = vadd.f32 %v4995_v43, %v6356_v5 }
 0x15c   : > { %v1849_v61 = vpop.f32.mrf.mxu1  ;;  %v5048_v1 = vpop.f32.mrf.mxu0 }
 0x15d   : > { %v6508_v48 = vadd.f32 %v5045_v53, %v1977_v31  ;;  %v1976_v51 = vadd.f32 %v1849_v61, %v6362_v15 }
 0x15e   : > { %v4998_v63 = vpop.f32.mrf.mxu1  ;;  %v2246_v0 = vpop.f32.mrf.mxu0 }
 0x15f   : > { %v6511_v41 = vadd.f32 %v2236_v24, %v1976_v51  ;;  %v1979_v49 = vadd.f32 %v4998_v63, %v6368_v44 }
 0x160   : > { %v1859_v26 = vpop.f32.mrf.mxu1  ;;  %v5051_v39 = vpop.f32.mrf.mxu0 }
 0x161   : > { %v6514_v36 = vadd.f32 %v5048_v1, %v1979_v49  ;;  %v1978_v52 = vadd.f32 %v1859_v26, %v6374_v35 }
 0x162   : > { %v5001_v14 = vpop.f32.mrf.mxu1  ;;  %v2256_v5 = vpop.f32.mrf.mxu0 }
 0x163   : > { %v6517_v55 = vadd.f32 %v2246_v0, %v1978_v52  ;;  %v1981_v47 = vadd.f32 %v5001_v14, %v6380_v8 }
 0x164   : > { %v1869_v58 = vpop.f32.mrf.mxu1  ;;  %v5054_v15 = vpop.f32.mrf.mxu0 }
 0x165   : > { %v6520_v59 = vadd.f32 %v5051_v39, %v1981_v47  ;;  %v1980_v21 = vadd.f32 %v1869_v58, %v6386_v9 }
 0x166   : > { %v5004_v60 = vpop.f32.mrf.mxu1  ;;  %v2266_v44 = vpop.f32.mrf.mxu0 }
 0x167   : > { %v6523_v23 = vadd.f32 %v2256_v5, %v1980_v21  ;;  %v1983_v40 = vadd.f32 %v5004_v60, %v6392_v30 }
 0x168   : > { %v1879_v2 = vpop.f32.mrf.mxu1  ;;  %v5057_v35 = vpop.f32.mrf.mxu0 }
 0x169   : > { %v6526_v7 = vadd.f32 %v5054_v15, %v1983_v40  ;;  %v1982_v46 = vadd.f32 %v1879_v2, %v6398_v22 }
 0x16a   : > { %v5007_v38 = vpop.f32.mrf.mxu1  ;;  %v2276_v8 = vpop.f32.mrf.mxu0 }
 0x16b   : > { %v6529_v10 = vadd.f32 %v2266_v44, %v1982_v46  ;;  %v1985_v12 = vadd.f32 %v5007_v38, %v6404_v25 }
 0x16c   : > { %v1889_v53 = vpop.f32.mrf.mxu1  ;;  %v5060_v9 = vpop.f32.mrf.mxu0 }
 0x16d   : > { %v6532_v45 = vadd.f32 %v5057_v35, %v1985_v12  ;;  %v1984_v43 = vadd.f32 %v1889_v53, %v6410_v34 }
 0x16e   : > { %v5010_v24 = vpop.f32.mrf.mxu1  ;;  %v2286_v30 = vpop.f32.mrf.mxu0 }
 0x16f   : > { %v6535_v31 = vadd.f32 %v2276_v8, %v1984_v43  ;;  %v1987_v61 = vadd.f32 %v5010_v24, %v6416_v6 }
 0x170   : > { %v1899_v1 = vpop.f32.mrf.mxu1  ;;  %v5063_v22 = vpop.f32.mrf.mxu0 }
 0x171   : > { %v6538_v51 = vadd.f32 %v5060_v9, %v1987_v61  ;;  %v1986_v63 = vadd.f32 %v1899_v1, %v6422_v37 }
 0x172   : > { %v5013_v0 = vpop.f32.mrf.mxu1  ;;  %v2296_v25 = vpop.f32.mrf.mxu0 }
 0x173   : > { %7016 = vst [vmem:[#allocation9_spill] sm:$0xff] %v6538_v51  ;;  %v6541_v49 = vadd.f32 %v2286_v30, %v1986_v63  ;;  %v1989_v26 = vadd.f32 %v5013_v0, %v6427_v29 }
 0x174   : > { %v1909_v39 = vpop.f32.mrf.mxu1  ;;  %v5066_v34 = vpop.f32.mrf.mxu0 }
 0x175   : > { %7017 = vst [vmem:[#allocation10_spill] sm:$0xff] %v6541_v49  ;;  %v6544_v52 = vadd.f32 %v5063_v22, %v1989_v26  ;;  %v1988_v14 = vadd.f32 %v1909_v39, %v6432_v42 }
 0x176   : > { %v5016_v5 = vpop.f32.mrf.mxu1  ;;  %v2306_v6 = vpop.f32.mrf.mxu0 }
 0x177   : > { %7018 = vst [vmem:[#allocation11_spill] sm:$0xff] %v6544_v52  ;;  %v6547_v47 = vadd.f32 %v2296_v25, %v1988_v14  ;;  %v1991_v58 = vadd.f32 %v5016_v5, %v6437_v11 }
 0x178   : > { %v1919_v15 = vpop.f32.mrf.mxu1  ;;  %v5069_v37 = vpop.f32.mrf.mxu0 }
 0x179   : > { %7019 = vst [vmem:[#allocation12_spill] sm:$0xff] %v6547_v47  ;;  %v6550_v21 = vadd.f32 %v5066_v34, %v1991_v58  ;;  %v1990_v60 = vadd.f32 %v1919_v15, %v6442_v19 }
 0x17a   : > { %v5019_v44 = vpop.f32.mrf.mxu1  ;;  %v2316_v29 = vpop.f32.mrf.mxu0 }
 0x17b   : > { %7020 = vst [vmem:[#allocation13_spill] sm:$0xff] %v6550_v21  ;;  %v6553_v40 = vadd.f32 %v2306_v6, %v1990_v60  ;;  %v1993_v2 = vadd.f32 %v5019_v44, %v6447_v27 }
 0x17c   : > { %v1929_v35 = vpop.f32.mrf.mxu1  ;;  %v5072_v42 = vpop.f32.mrf.mxu0 }
 0x17d   : > { %7021 = vst [vmem:[#allocation14_spill] sm:$0xff] %v6553_v40  ;;  %v6556_v46 = vadd.f32 %v5069_v37, %v1993_v2  ;;  %v1992_v38 = vadd.f32 %v1929_v35, %v6453_v20 }
 0x17e   : > { %v5022_v8 = vpop.f32.mrf.mxu1  ;;  %v2326_v11 = vpop.f32.mrf.mxu0 }
 0x17f   : > { %7022 = vst [vmem:[#allocation15_spill] sm:$0xff] %v6556_v46  ;;  %v6559_v12 = vadd.f32 %v2316_v29, %v1992_v38  ;;  %v1995_v53 = vadd.f32 %v5022_v8, %v6460_v62 }
 0x180   : > { %v1939_v9 = vpop.f32.mrf.mxu1  ;;  %v5075_v19 = vpop.f32.mrf.mxu0 }
 0x181   : > { %7023 = vst [vmem:[#allocation16_spill] sm:$0xff] %v6559_v12  ;;  %v6562_v43 = vadd.f32 %v5072_v42, %v1995_v53  ;;  %v1994_v24 = vadd.f32 %v1939_v9, %v6466_v50 }
 0x182   : > { %v5025_v30 = vpop.f32.mrf.mxu1  ;;  %v2336_v27 = vpop.f32.mrf.mxu0 }
 0x183   : > { %7024 = vst [vmem:[#allocation17_spill] sm:$0xff] %v6562_v43  ;;  %v6565_v61 = vadd.f32 %v2326_v11, %v1994_v24  ;;  %v1997_v1 = vadd.f32 %v5025_v30, %v6471_v4 }
 0x184   : > { %v1949_v22 = vpop.f32.mrf.mxu1  ;;  %v5078_v20 = vpop.f32.mrf.mxu0 }
 0x185   : > { %7025 = vst [vmem:[#allocation18_spill] sm:$0xff] %v6565_v61  ;;  %v6568_v63 = vadd.f32 %v5075_v19, %v1997_v1  ;;  %v1996_v0 = vadd.f32 %v1949_v22, %v6475_v3 }
 0x186   : > { %v5028_v25 = vpop.f32.mrf.mxu1  ;;  %v2346_v62 = vpop.f32.mrf.mxu0 }
 0x187   : > { %7026 = vst [vmem:[#allocation19_spill] sm:$0xff] %v6568_v63  ;;  %v6571_v26 = vadd.f32 %v2336_v27, %v1996_v0  ;;  %v1999_v39 = vadd.f32 %v5028_v25, %v6478_v56 }
 0x188   : > { %v1959_v34 = vpop.f32.mrf.mxu1  ;;  %v6574_v50 = vpop.f32.mrf.mxu0 }
 0x189   : > { %7027 = vst [vmem:[#allocation20_spill] sm:$0xff] %v6571_v26  ;;  %v6576_v14 = vadd.f32 %v5078_v20, %v1999_v39  ;;  %v1998_v5 = vadd.f32 %v1959_v34, %v6481_v57 }
 0x18a   : > { %v5083_v4 = vpop.f32.mrf.mxu1  ;;  %v6579_v6 = vpop.f32.mrf.mxu0 }
 0x18b   : > { %7028 = vst [vmem:[#allocation21_spill] sm:$0xff] %v6576_v14  ;;  %v6581_v58 = vadd.f32 %v2346_v62, %v1998_v5 }
 0x18c   : > { %v2583_v15 = vpop.f32.mrf.mxu1  ;;  %v6583_v3 = vpop.f32.mrf.mxu0 }
 0x18d   : > { %7029 = vst [vmem:[#allocation22_spill] sm:$0xff] %v6581_v58 }
 0x18e   : > { %v6585_v37 = vpop.f32.mrf.mxu1  ;;  %v6587_v60 = vpop.f32.mrf.mxu0 }
 0x190   : > { %v6589_v56 = vpop.f32.mrf.mxu1  ;;  %v6591_v44 = vpop.f32.mrf.mxu0 }
 0x192   : > { %v6593_v29 = vpop.f32.mrf.mxu1  ;;  %v6595_v2 = vpop.f32.mrf.mxu0 }
 0x194   : > { %v6597_v57 = vpop.f32.mrf.mxu1  ;;  %v6599_v35 = vpop.f32.mrf.mxu0 }
 0x196   : > { %v6601_v42 = vpop.f32.mrf.mxu1  ;;  %v6603_v38 = vpop.f32.mrf.mxu0 }
 0x198   : > { %v6605_v8 = vpop.f32.mrf.mxu1  ;;  %v6607_v11 = vpop.f32.mrf.mxu0 }
 0x19a   : > { %v6609_v53 = vpop.f32.mrf.mxu1  ;;  %v6611_v9 = vpop.f32.mrf.mxu0 }
 0x19c   : > { %v6613_v19 = vpop.f32.mrf.mxu1  ;;  %v6615_v24 = vpop.f32.mrf.mxu0 }
 0x19e   : > { %v6617_v30 = vpop.f32.mrf.mxu1  ;;  %v6619_v27 = vpop.f32.mrf.mxu0 }
 0x1a0   : > { %v6621_v1 = vpop.f32.mrf.mxu1  ;;  %v6623_v22 = vpop.f32.mrf.mxu0 }
 0x1a2   : > { %v6625_v20 = vpop.f32.mrf.mxu1  ;;  %v6627_v0 = vpop.f32.mrf.mxu0 }
 0x1a4   : > { %v6629_v25 = vpop.f32.mrf.mxu1  ;;  %v6631_v62 = vpop.f32.mrf.mxu0 }
 0x1a6   : > { %v6633_v39 = vpop.f32.mrf.mxu1  ;;  %v6635_v34 = vpop.f32.mrf.mxu0 }
 0x1a8   : > { %v6637_v5 = vpop.f32.mrf.mxu1  ;;  %v6639_v58 = vpop.f32.mrf.mxu0 }
 0x1aa   : > { %v6641_v14 = vpop.f32.mrf.mxu1  ;;  %v6643_v26 = vpop.f32.mrf.mxu0 }
 0x1ab   : > { %7030 = vst [vmem:[#allocation23_spill] sm:$0xff] %v6643_v26 }
 0x1ac   : > { %v6645_v63 = vpop.f32.mrf.mxu1  ;;  %v6647_v61 = vpop.f32.mrf.mxu0 }
 0x1ad   : > { %7031 = vst [vmem:[#allocation24_spill] sm:$0xff] %v6647_v61 }
 0x1ae   : > { %v6649_v43 = vpop.f32.mrf.mxu1  ;;  %v6651_v12 = vpop.f32.mrf.mxu0 }
 0x1af   : > { %7032 = vst [vmem:[#allocation25_spill] sm:$0xff] %v6649_v43  ;;  %7033 = vst [vmem:[#allocation26_spill] sm:$0xff] %v6651_v12 }
 0x1b0   : > { %v6653_v46 = vpop.f32.mrf.mxu1  ;;  %v6655_v40 = vpop.f32.mrf.mxu0 }
 0x1b1   : > { %7034 = vst [vmem:[#allocation27_spill] sm:$0xff] %v6653_v46  ;;  %7035 = vst [vmem:[#allocation28_spill] sm:$0xff] %v6655_v40 }
 0x1b2   : > { %v6657_v21 = vpop.f32.mrf.mxu1  ;;  %v6659_v47 = vpop.f32.mrf.mxu0 }
 0x1b3   : > { %7036 = vst [vmem:[#allocation29_spill] sm:$0xff] %v6657_v21  ;;  %7037 = vst [vmem:[#allocation30_spill] sm:$0xff] %v6659_v47 }
 0x1b4   : > { %v6661_v52 = vpop.f32.mrf.mxu1  ;;  %v6663_v49 = vpop.f32.mrf.mxu0 }
 0x1b5   : > { %7038 = vst [vmem:[#allocation31_spill] sm:$0xff] %v6661_v52  ;;  %7039 = vst [vmem:[#allocation4_spill] sm:$0xff] %v6663_v49 }
 0x1b6   : > { %v6665_v51 = vpop.f32.mrf.mxu1  ;;  %v6667_v26 = vpop.f32.mrf.mxu0 }
 0x1b7   : > { %7040 = vst [vmem:[#allocation3_spill] sm:$0xff] %v6665_v51  ;;  %7041 = vst [vmem:[#allocation5_spill] sm:$0xff] %v6667_v26 }
 0x1b8   : > { %v6669_v61 = vpop.f32.mrf.mxu1  ;;  %v6671_v43 = vpop.f32.mrf.mxu0 }
 0x1b9   : > { %7042 = vst [vmem:[#allocation6_spill] sm:$0xff] %v6669_v61  ;;  %7043 = vst [vmem:[#allocation7_spill] sm:$0xff] %v6671_v43 }
 0x1ba   : > { %v6673_v12 = vpop.f32.mrf.mxu1  ;;  %v6675_v46 = vpop.f32.mrf.mxu0 }
 0x1bb   : > { %7044 = vst [vmem:[#allocation8_spill] sm:$0xff] %v6673_v12  ;;  %7045 = vst [vmem:[#allocation32_spill] sm:$0xff] %v6675_v46  ;;  %v2743_v46 = vadd.f32 %v5083_v4, %v6484_v13  ;;  %v2744_v13 = vadd.f32 %v6589_v56, %v6493_v16 }
 0x1bc   : > { %v6677_v40 = vpop.f32.mrf.mxu1  ;;  %v6679_v21 = vpop.f32.mrf.mxu0 }
 0x1bd   : > { %7046 = vst [vmem:[#allocation33_spill] sm:$0xff] %v6677_v40  ;;  %7047 = vst [vmem:[#allocation34_spill] sm:$0xff] %v6679_v21 }
 0x1be   : > { %v6681_v47 = vpop.f32.mrf.mxu1  ;;  %v6683_v52 = vpop.f32.mrf.mxu0 }
 0x1bf   : > { %7048 = vst [vmem:[#allocation35_spill] sm:$0xff] %v6681_v47  ;;  %7049 = vst [vmem:[#allocation36_spill] sm:$0xff] %v6683_v52  ;;  %v2742_v52 = vadd.f32 %v2583_v15, %v6487_v54  ;;  %v6714_v54 = vld [vmem:[%s6886_s2] ss:$0 sm:$0xff] }
 0x1c0   : > { %v6685_v49 = vpop.f32.mrf.mxu1  ;;  %v6687_v51 = vpop.f32.mrf.mxu0 }
 0x1c1   : > { %7050 = vst [vmem:[#allocation37_spill] sm:$0xff] %v6685_v49  ;;  %7051 = vst [vmem:[#allocation38_spill] sm:$0xff] %v6687_v51  ;;  %v3131_v51 = vadd.f32 %v6574_v50, %v2743_v46 }
 0x1c2   : > { %v6689_v26 = vpop.f32.mrf.mxu1  ;;  %v6691_v61 = vpop.f32.mrf.mxu0 }
 0x1c3   : > { %7052 = vst [vmem:[#allocation39_spill] sm:$0xff] %v6689_v26  ;;  %7053 = vst [vmem:[#allocation40_spill] sm:$0xff] %v6691_v61  ;;  %v2745_v61 = vadd.f32 %v6585_v37, %v6490_v28  ;;  %v2747_v28 = vadd.f32 %v6593_v29, %v6496_v32 }
 0x1c4   : > { %v6693_v43 = vpop.f32.mrf.mxu1  ;;  %v6695_v12 = vpop.f32.mrf.mxu0 }
 0x1c5   : > { %7054 = vst [vmem:[#allocation41_spill] sm:$0xff] %v6693_v43  ;;  %7055 = vst [vmem:[#allocation42_spill] sm:$0xff] %v6695_v12  ;;  %v3130_v12 = vadd.f32 %v6579_v6, %v2742_v52  ;;  %v3133_v46 = vadd.f32 %v6583_v3, %v2745_v61  ;;  %v2746_v52 = vadd.f32 %v6597_v57, %v6499_v17 }
 0x1c6   : > { %v6698_v40 = vpop.f32.mrf.mxu1  ;;  %v6700_v21 = vpop.f32.mrf.mxu0  ;;  %v2749_v17 = vadd.f32 %v6601_v42, %v6502_v33  ;;  %v3135_v29 = vadd.f32 %v6591_v44, %v2747_v28 }
 0x1c7   : > { %7056 = vst [vmem:[#allocation43_spill] sm:$0xff] %v6700_v21  ;;  %v3134_v57 = vadd.f32 %v6595_v2, %v2746_v52 }
 0x1c8   : > { %v6703_v47 = vpop.f32.mrf.mxu1  ;;  %v5233_v49 = vpop.f32.mrf.mxu0 }
 0x1c9   : > { %7057 = vst [vmem:[#allocation44_spill] sm:$0xff] %v6703_v47 }
 0x1ca   : > { %v5183_v43 = vpop.f32.mrf.mxu1  ;;  %v3745_v26 = vpop.f32.mrf.mxu0 }
 0x1cb   : > { %v3518_v4 = vadd.f32 %v5183_v43, %v3131_v51  ;;  %v3132_v43 = vadd.f32 %v6587_v60, %v2744_v13 }
 0x1cc   : > { %v3358_v15 = vpop.f32.mrf.mxu1  ;;  %v5236_v21 = vpop.f32.mrf.mxu0 }
 0x1cd   : > { %v3905_v50 = vadd.f32 %v5233_v49, %v3518_v4  ;;  %v3517_v47 = vadd.f32 %v3358_v15, %v3130_v12 }
 0x1ce   : > { %v5186_v16 = vpop.f32.mrf.mxu1  ;;  %v3755_v51 = vpop.f32.mrf.mxu0 }
 0x1cf   : > { %v3944_v49 = vadd.f32 %v6714_v54, %v3905_v50  ;;  %v3904_v12 = vadd.f32 %v3745_v26, %v3517_v47  ;;  %v3520_v61 = vadd.f32 %v5186_v16, %v3133_v46  ;;  %v2748_v47 = vadd.f32 %v6605_v8, %v6505_v18 }
 0x1d0   : > { %v3368_v32 = vpop.f32.mrf.mxu1  ;;  %v5239_v6 = vpop.f32.mrf.mxu0  ;;  %v3137_v50 = vadd.f32 %v6599_v35, %v2749_v17  ;;  %v2750_v16 = vadd.f32 %v6613_v19, %v6511_v41 }
 0x1d1   : > { %4084 = vst [vmem:[%s6726_s14 + $0x8] sm:$0xff] %v3944_v49  ;;  %v3943_v3 = vadd.f32 %v6714_v54, %v3904_v12  ;;  %v3907_v37 = vadd.f32 %v5236_v21, %v3520_v61  ;;  %v3519_v56 = vadd.f32 %v3368_v32, %v3132_v43  ;;  %v4014_v26 = vmul.f32 %v3944_v49, %v3944_v49 }
 0x1d2   : > { %v5189_v60 = vpop.f32.mrf.mxu1  ;;  %v3765_v13 = vpop.f32.mrf.mxu0  ;;  %v2751_v21 = vadd.f32 %v6609_v53, %v6508_v48  ;;  %v3136_v52 = vadd.f32 %v6603_v38, %v2748_v47  ;;  %v2753_v32 = vadd.f32 %v6617_v30, %v6514_v36 }
 0x1d3   : > { %v3975_v4 = vadd.f32 %v3944_v49, %v3943_v3  ;;  %v4013_v15 = vmul.f32 %v3943_v3, %v3943_v3  ;;  %4083 = vst [vmem:[%s6726_s14] sm:$0xff] %v3943_v3  ;;  %v3946_v33 = vadd.f32 %v6714_v54, %v3907_v37  ;;  %v3906_v42 = vadd.f32 %v3755_v51, %v3519_v56 }
 0x1d4   : > { %v3522_v44 = vadd.f32 %v5189_v60, %v3135_v29  ;;  %v3378_v46 = vpop.f32.mrf.mxu1  ;;  %v5242_v2 = vpop.f32.mrf.mxu0  ;;  %v3139_v35 = vadd.f32 %v6607_v11, %v2751_v21  ;;  %v3138_v29 = vadd.f32 %v6611_v9, %v2750_v16  ;;  %v2755_v11 = vadd.f32 %v6625_v20, %v6520_v59 }
 0x1d5   : > { %v4045_v28 = vadd.f32 %v4014_v26, %v4013_v15  ;;  %4086 = vst [vmem:[%s6726_s14 + $0x18] sm:$0xff] %v3946_v33  ;;  %v3945_v18 = vadd.f32 %v6714_v54, %v3906_v42  ;;  %v3521_v8 = vadd.f32 %v3378_v46, %v3134_v57  ;;  %v4016_v17 = vmul.f32 %v3946_v33, %v3946_v33 }
 0x1d6   : > { %v3909_v51 = vadd.f32 %v5239_v6, %v3522_v44  ;;  %v5192_v43 = vpop.f32.mrf.mxu1  ;;  %v3775_v49 = vpop.f32.mrf.mxu0  ;;  %v2752_v57 = vadd.f32 %v6621_v1, %v6517_v55  ;;  %v3141_v15 = vadd.f32 %v6615_v24, %v2753_v32  ;;  %v2754_v9 = vadd.f32 %v6629_v25, %v6523_v23 }
 0x1d7   : > { %v3976_v48 = vadd.f32 %v3975_v4, %v3945_v18  ;;  %v4015_v53 = vmul.f32 %v3945_v18, %v3945_v18  ;;  %4085 = vst [vmem:[%s6726_s14 + $0x10] sm:$0xff] %v3945_v18  ;;  %v3908_v12 = vadd.f32 %v3765_v13, %v3521_v8  ;;  %v3524_v61 = vadd.f32 %v5192_v43, %v3137_v50 }
 0x1d8   : > { %v3948_v38 = vadd.f32 %v6714_v54, %v3909_v51  ;;  %v3388_v3 = vpop.f32.mrf.mxu1  ;;  %v5245_v41 = vpop.f32.mrf.mxu0  ;;  %v3140_v46 = vadd.f32 %v6619_v27, %v2752_v57  ;;  %v3143_v18 = vadd.f32 %v6623_v22, %v2755_v11 }
 0x1d9   : > { %v4046_v19 = vadd.f32 %v4045_v28, %v4015_v53  ;;  %v3947_v6 = vadd.f32 %v6714_v54, %v3908_v12  ;;  %v3977_v37 = vadd.f32 %v3976_v48, %v3946_v33  ;;  %v3911_v56 = vadd.f32 %v5242_v2, %v3524_v61 }
 0x1da   : > { %4088 = vst [vmem:[%s6726_s14 + $0x28] sm:$0xff] %v3948_v38  ;;  %v3523_v36 = vadd.f32 %v3388_v3, %v3136_v52  ;;  %v5195_v30 = vpop.f32.mrf.mxu1  ;;  %v3785_v47 = vpop.f32.mrf.mxu0  ;;  %v4018_v20 = vmul.f32 %v3948_v38, %v3948_v38  ;;  %v3142_v52 = vadd.f32 %v6627_v0, %v2754_v9  ;;  %v2757_v48 = vadd.f32 %v6633_v39, %v6526_v7 }
 0x1db   : > { %v3978_v26 = vadd.f32 %v3977_v37, %v3947_v6  ;;  %v4017_v60 = vmul.f32 %v3947_v6, %v3947_v6  ;;  %v4047_v13 = vadd.f32 %v4046_v19, %v4016_v17  ;;  %4087 = vst [vmem:[%s6726_s14 + $0x20] sm:$0xff] %v3947_v6  ;;  %v3950_v4 = vadd.f32 %v6714_v54, %v3911_v56 }
 0x1dc   : > { %v3910_v55 = vadd.f32 %v3775_v49, %v3523_v36  ;;  %v3526_v1 = vadd.f32 %v5195_v30, %v3139_v35  ;;  %v3398_v33 = vpop.f32.mrf.mxu1  ;;  %v5248_v59 = vpop.f32.mrf.mxu0  ;;  %v2756_v61 = vadd.f32 %v6637_v5, %v6529_v10  ;;  %v2759_v39 = vadd.f32 %v6641_v14, %v6532_v45 }
 0x1dd   : > { %v4048_v42 = vadd.f32 %v4047_v13, %v4017_v60  ;;  %4090 = vst [vmem:[%s6726_s14 + $0x38] sm:$0xff] %v3950_v4  ;;  %v3979_v21 = vadd.f32 %v3978_v26, %v3948_v38  ;;  %v3525_v44 = vadd.f32 %v3398_v33, %v3138_v29  ;;  %v4020_v35 = vmul.f32 %v3950_v4, %v3950_v4 }
 0x1de   : > { %v3949_v2 = vadd.f32 %v6714_v54, %v3910_v55  ;;  %v3913_v50 = vadd.f32 %v5245_v41, %v3526_v1  ;;  %v5198_v28 = vpop.f32.mrf.mxu1  ;;  %v3795_v24 = vpop.f32.mrf.mxu0  ;;  %v2758_v6 = vadd.f32 %v6645_v63, %v6535_v31  ;;  %v3145_v29 = vadd.f32 %v6631_v62, %v2757_v48  ;;  %v7065_v48 = vld [vmem:[#allocation12_spill] sm:$0xff] }
 0x1df   : > { %v4049_v23 = vadd.f32 %v4048_v42, %v4018_v20  ;;  %v3912_v25 = vadd.f32 %v3785_v47, %v3525_v44  ;;  %v3528_v8 = vadd.f32 %v5198_v28, %v3141_v15  ;;  %v3144_v30 = vadd.f32 %v6635_v34, %v2756_v61  ;;  %v7058_v15 = vld [vmem:[#allocation23_spill] sm:$0xff]  ;;  %v7060_v20 = vld [vmem:[#allocation25_spill] sm:$0xff] }
 0x1e0   : > { %v3980_v16 = vadd.f32 %v3979_v21, %v3949_v2  ;;  %v4019_v51 = vmul.f32 %v3949_v2, %v3949_v2  ;;  %4089 = vst [vmem:[%s6726_s14 + $0x30] sm:$0xff] %v3949_v2  ;;  %v3952_v43 = vadd.f32 %v6714_v54, %v3913_v50  ;;  %v3408_v27 = vpop.f32.mrf.mxu1  ;;  %v5251_v49 = vpop.f32.mrf.mxu0  ;;  %v3147_v62 = vadd.f32 %v6639_v58, %v2759_v39  ;;  %v7061_v2 = vld [vmem:[#allocation10_spill] sm:$0xff]  ;;  %v7062_v50 = vld [vmem:[#allocation27_spill] sm:$0xff] }
 0x1e1   : > { %v3951_v53 = vadd.f32 %v6714_v54, %v3912_v25  ;;  %v3915_v22 = vadd.f32 %v5248_v59, %v3528_v8  ;;  %v3527_v12 = vadd.f32 %v3408_v27, %v3140_v46  ;;  %v3146_v9 = vadd.f32 %v7058_v15, %v2758_v6  ;;  %v7059_v59 = vld [vmem:[#allocation9_spill] sm:$0xff] }
 0x1e2   : > { %v4050_v0 = vadd.f32 %v4049_v23, %v4019_v51  ;;  %4092 = vst [vmem:[%s6726_s14 + $0x48] sm:$0xff] %v3952_v43  ;;  %v3981_v32 = vadd.f32 %v3980_v16, %v3950_v4  ;;  %v5201_v17 = vpop.f32.mrf.mxu1  ;;  %v3805_v38 = vpop.f32.mrf.mxu0  ;;  %v4022_v47 = vmul.f32 %v3952_v43, %v3952_v43  ;;  %v2761_v42 = vadd.f32 %v7060_v20, %v7059_v59  ;;  %v7064_v27 = vld [vmem:[#allocation29_spill] sm:$0xff] }
 0x1e3   : > { %v4021_v3 = vmul.f32 %v3951_v53, %v3951_v53  ;;  %4091 = vst [vmem:[%s6726_s14 + $0x40] sm:$0xff] %v3951_v53  ;;  %v3954_v41 = vadd.f32 %v6714_v54, %v3915_v22  ;;  %v3914_v19 = vadd.f32 %v3795_v24, %v3527_v12  ;;  %v3530_v7 = vadd.f32 %v5201_v17, %v3143_v18 }
 0x1e4   : > { %v3982_v10 = vadd.f32 %v3981_v32, %v3951_v53  ;;  %v4051_v5 = vadd.f32 %v4050_v0, %v4020_v35  ;;  %v3418_v37 = vpop.f32.mrf.mxu1  ;;  %v5254_v56 = vpop.f32.mrf.mxu0  ;;  %v2760_v28 = vadd.f32 %v7062_v50, %v7061_v2  ;;  %v7066_v53 = vld [vmem:[#allocation31_spill] sm:$0xff]  ;;  %v7067_v32 = vld [vmem:[#allocation24_spill] sm:$0xff] }
 0x1e5   : > { %4094 = vst [vmem:[%s6726_s14 + $0x58] sm:$0xff] %v3954_v41  ;;  %v3953_v57 = vadd.f32 %v6714_v54, %v3914_v19  ;;  %v3917_v11 = vadd.f32 %v5251_v49, %v3530_v7  ;;  %v3529_v36 = vadd.f32 %v3418_v37, %v3142_v52  ;;  %v4024_v24 = vmul.f32 %v3954_v41, %v3954_v41  ;;  %v7068_v19 = vld [vmem:[#allocation26_spill] sm:$0xff] }
 0x1e6   : > { %v4052_v26 = vadd.f32 %v4051_v5, %v4021_v3  ;;  %v3983_v45 = vadd.f32 %v3982_v10, %v3952_v43  ;;  %v5204_v14 = vpop.f32.mrf.mxu1  ;;  %v3815_v31 = vpop.f32.mrf.mxu0  ;;  %v7063_v43 = vld [vmem:[#allocation11_spill] sm:$0xff]  ;;  %v2762_v22 = vadd.f32 %v7066_v53, %v7065_v48  ;;  %v3149_v17 = vadd.f32 %v7067_v32, %v2761_v42 }
 0x1e7   : > { %v4023_v63 = vmul.f32 %v3953_v57, %v3953_v57  ;;  %4093 = vst [vmem:[%s6726_s14 + $0x50] sm:$0xff] %v3953_v57  ;;  %v3956_v60 = vadd.f32 %v6714_v54, %v3917_v11  ;;  %v3916_v13 = vadd.f32 %v3805_v38, %v3529_v36  ;;  %v3532_v4 = vadd.f32 %v5204_v14, %v3145_v29  ;;  %v7069_v36 = vld [vmem:[#allocation28_spill] sm:$0xff] }
 0x1e8   : > { %v3984_v55 = vadd.f32 %v3983_v45, %v3953_v57  ;;  %v4053_v1 = vadd.f32 %v4052_v26, %v4022_v47  ;;  %v3428_v34 = vpop.f32.mrf.mxu1  ;;  %v5257_v33 = vpop.f32.mrf.mxu0  ;;  %v2763_v49 = vadd.f32 %v7064_v27, %v7063_v43  ;;  %v3148_v7 = vadd.f32 %v7068_v19, %v2760_v28  ;;  %v7070_v47 = vld [vmem:[#allocation30_spill] sm:$0xff]  ;;  %v7075_v28 = vld [vmem:[#allocation15_spill] sm:$0xff] }
 0x1e9   : > { %4096 = vst [vmem:[%s6726_s14 + $0x68] sm:$0xff] %v3956_v60  ;;  %v3955_v21 = vadd.f32 %v6714_v54, %v3916_v13  ;;  %v3919_v44 = vadd.f32 %v5254_v56, %v3532_v4  ;;  %v3531_v46 = vadd.f32 %v3428_v34, %v3144_v30  ;;  %v4026_v39 = vmul.f32 %v3956_v60, %v3956_v60  ;;  %v7071_v13 = vld [vmem:[#allocation13_spill] sm:$0xff]  ;;  %v7072_v4 = vld [vmem:[#allocation3_spill] sm:$0xff] }
 0x1ea   : > { %v4054_v58 = vadd.f32 %v4053_v1, %v4023_v63  ;;  %v3985_v18 = vadd.f32 %v3984_v55, %v3954_v41  ;;  %v5207_v23 = vpop.f32.mrf.mxu1  ;;  %v3825_v25 = vpop.f32.mrf.mxu0  ;;  %v3151_v30 = vadd.f32 %v7069_v36, %v2763_v49  ;;  %v3150_v26 = vadd.f32 %v7070_v47, %v2762_v22  ;;  %v7073_v55 = vld [vmem:[#allocation14_spill] sm:$0xff]  ;;  %v7080_v22 = vld [vmem:[#allocation5_spill] sm:$0xff]  ;;  %v7084_v36 = vld [vmem:[#allocation35_spill] sm:$0xff] }
 0x1eb   : > { %v4025_v8 = vmul.f32 %v3955_v21, %v3955_v21  ;;  %4095 = vst [vmem:[%s6726_s14 + $0x60] sm:$0xff] %v3955_v21  ;;  %v3958_v52 = vadd.f32 %v6714_v54, %v3919_v44  ;;  %v3918_v16 = vadd.f32 %v3815_v31, %v3531_v46  ;;  %v3534_v51 = vadd.f32 %v5207_v23, %v3147_v62  ;;  %v7074_v1 = vld [vmem:[#allocation6_spill] sm:$0xff]  ;;  %v7078_v23 = vld [vmem:[#allocation33_spill] sm:$0xff] }
 0x1ec   : > { %v3986_v12 = vadd.f32 %v3985_v18, %v3955_v21  ;;  %v4055_v61 = vadd.f32 %v4054_v58, %v4024_v24  ;;  %v3438_v35 = vpop.f32.mrf.mxu1  ;;  %v5260_v0 = vpop.f32.mrf.mxu0  ;;  %v2764_v34 = vadd.f32 %v7074_v1, %v7073_v55  ;;  %v7076_v24 = vld [vmem:[#allocation8_spill] sm:$0xff] }
 0x1ed   : > { %4098 = vst [vmem:[%s6726_s14 + $0x78] sm:$0xff] %v3958_v52  ;;  %v3957_v38 = vadd.f32 %v6714_v54, %v3918_v16  ;;  %v3921_v3 = vadd.f32 %v5257_v33, %v3534_v51  ;;  %v3533_v41 = vadd.f32 %v3438_v35, %v3146_v9  ;;  %v4028_v33 = vmul.f32 %v3958_v52, %v3958_v52  ;;  %v7077_v18 = vld [vmem:[#allocation16_spill] sm:$0xff] }
 0x1ee   : > { %v4056_v6 = vadd.f32 %v4055_v61, %v4025_v8  ;;  %v3987_v10 = vadd.f32 %v3986_v12, %v3956_v60  ;;  %v5210_v5 = vpop.f32.mrf.mxu1  ;;  %v3835_v37 = vpop.f32.mrf.mxu0  ;;  %v2765_v60 = vadd.f32 %v7072_v4, %v7071_v13  ;;  %v2767_v58 = vadd.f32 %v7076_v24, %v7075_v28 }
 0x1ef   : > { %v4027_v56 = vmul.f32 %v3957_v38, %v3957_v38  ;;  %4097 = vst [vmem:[%s6726_s14 + $0x70] sm:$0xff] %v3957_v38  ;;  %v3960_v29 = vadd.f32 %v6714_v54, %v3921_v3  ;;  %v3920_v57 = vadd.f32 %v3825_v25, %v3533_v41  ;;  %v3536_v11 = vadd.f32 %v5210_v5, %v3149_v17 }
 0x1f0   : > { %v3988_v45 = vadd.f32 %v3987_v10, %v3957_v38  ;;  %v4057_v14 = vadd.f32 %v4056_v6, %v4026_v39  ;;  %v3448_v31 = vpop.f32.mrf.mxu1  ;;  %v5263_v63 = vpop.f32.mrf.mxu0  ;;  %v2766_v25 = vadd.f32 %v7078_v23, %v7077_v18  ;;  %v3152_v12 = vadd.f32 %v7080_v22, %v2764_v34  ;;  %v7082_v6 = vld [vmem:[#allocation32_spill] sm:$0xff]  ;;  %v7087_v34 = vld [vmem:[#allocation19_spill] sm:$0xff] }
 0x1f1   : > { %4100 = vst [vmem:[%s6726_s14 + $0x88] sm:$0xff] %v3960_v29  ;;  %v3959_v62 = vadd.f32 %v6714_v54, %v3920_v57  ;;  %v3923_v15 = vadd.f32 %v5260_v0, %v3536_v11  ;;  %v3535_v9 = vadd.f32 %v3448_v31, %v3148_v7  ;;  %v4030_v61 = vmul.f32 %v3960_v29, %v3960_v29  ;;  %v7081_v7 = vld [vmem:[#allocation7_spill] sm:$0xff]  ;;  %v7083_v11 = vld [vmem:[#allocation17_spill] sm:$0xff] }
 0x1f2   : > { %v4058_v59 = vadd.f32 %v4057_v14, %v4027_v56  ;;  %v3989_v20 = vadd.f32 %v3988_v45, %v3958_v52  ;;  %v5213_v42 = vpop.f32.mrf.mxu1  ;;  %v3845_v21 = vpop.f32.mrf.mxu0  ;;  %v7079_v52 = vld [vmem:[#allocation4_spill] sm:$0xff]  ;;  %v3155_v39 = vadd.f32 %v7081_v7, %v2767_v58  ;;  %v3154_v10 = vadd.f32 %v7082_v6, %v2766_v25  ;;  %v7085_v45 = vld [vmem:[#allocation18_spill] sm:$0xff]  ;;  %v7086_v14 = vld [vmem:[#allocation37_spill] sm:$0xff] }
 0x1f3   : > { %v4029_v44 = vmul.f32 %v3959_v62, %v3959_v62  ;;  %4099 = vst [vmem:[%s6726_s14 + $0x80] sm:$0xff] %v3959_v62  ;;  %v3962_v46 = vadd.f32 %v6714_v54, %v3923_v15  ;;  %v3922_v2 = vadd.f32 %v3835_v37, %v3535_v9  ;;  %v3538_v50 = vadd.f32 %v5213_v42, %v3151_v30  ;;  %v7090_v42 = vld [vmem:[#allocation41_spill] sm:$0xff]  ;;  %v7092_v25 = vld [vmem:[#allocation36_spill] sm:$0xff] }
 0x1f4   : > { %v3990_v8 = vadd.f32 %v3989_v20, %v3959_v62  ;;  %v4059_v16 = vadd.f32 %v4058_v59, %v4028_v33  ;;  %v3458_v51 = vpop.f32.mrf.mxu1  ;;  %v5266_v43 = vpop.f32.mrf.mxu0  ;;  %v3153_v27 = vadd.f32 %v7079_v52, %v2765_v60  ;;  %v2768_v31 = vadd.f32 %v7086_v14, %v7085_v45  ;;  %v7088_v33 = vld [vmem:[#allocation39_spill] sm:$0xff]  ;;  %v7089_v20 = vld [vmem:[#allocation20_spill] sm:$0xff] }
 0x1f5   : > { %4102 = vst [vmem:[%s6726_s14 + $0x98] sm:$0xff] %v3962_v46  ;;  %v3961_v49 = vadd.f32 %v6714_v54, %v3922_v2  ;;  %v3925_v48 = vadd.f32 %v5263_v63, %v3538_v50  ;;  %v3537_v53 = vadd.f32 %v3458_v51, %v3150_v26  ;;  %v4032_v63 = vmul.f32 %v3962_v46, %v3962_v46 }
 0x1f6   : > { %v4060_v35 = vadd.f32 %v4059_v16, %v4029_v44  ;;  %v3991_v0 = vadd.f32 %v3990_v8, %v3960_v29  ;;  %v5216_v32 = vpop.f32.mrf.mxu1  ;;  %v3855_v17 = vpop.f32.mrf.mxu0  ;;  %v2769_v29 = vadd.f32 %v7084_v36, %v7083_v11  ;;  %v2771_v59 = vadd.f32 %v7088_v33, %v7087_v34 }
 0x1f7   : > { %v4031_v38 = vmul.f32 %v3961_v49, %v3961_v49  ;;  %4101 = vst [vmem:[%s6726_s14 + $0x90] sm:$0xff] %v3961_v49  ;;  %v3964_v3 = vadd.f32 %v6714_v54, %v3925_v48  ;;  %v3924_v41 = vadd.f32 %v3845_v21, %v3537_v53  ;;  %v3540_v19 = vadd.f32 %v5216_v32, %v3153_v27 }
 0x1f8   : > { %v3992_v5 = vadd.f32 %v3991_v0, %v3961_v49  ;;  %v4061_v37 = vadd.f32 %v4060_v35, %v4030_v61  ;;  %v3468_v56 = vpop.f32.mrf.mxu1  ;;  %v5269_v57 = vpop.f32.mrf.mxu0  ;;  %v2770_v21 = vadd.f32 %v7090_v42, %v7089_v20  ;;  %v3156_v8 = vadd.f32 %v7092_v25, %v2768_v31  ;;  %v7094_v35 = vld [vmem:[#allocation40_spill] sm:$0xff] }
 0x1f9   : > { %4104 = vst [vmem:[%s6726_s14 + $0xa8] sm:$0xff] %v3964_v3  ;;  %v3963_v30 = vadd.f32 %v6714_v54, %v3924_v41  ;;  %v3927_v47 = vadd.f32 %v5266_v43, %v3540_v19  ;;  %v3539_v26 = vadd.f32 %v3468_v56, %v3152_v12  ;;  %v4034_v16 = vmul.f32 %v3964_v3, %v3964_v3  ;;  %v7093_v12 = vld [vmem:[#allocation38_spill] sm:$0xff]  ;;  %v7095_v19 = vld [vmem:[#allocation21_spill] sm:$0xff] }
 0x1fa   : > { %v4062_v13 = vadd.f32 %v4061_v37, %v4031_v38  ;;  %v3993_v4 = vadd.f32 %v3992_v5, %v3962_v46  ;;  %v5219_v60 = vpop.f32.mrf.mxu1  ;;  %v3865_v62 = vpop.f32.mrf.mxu0  ;;  %v7091_v46 = vld [vmem:[#allocation34_spill] sm:$0xff]  ;;  %v3159_v61 = vadd.f32 %v7093_v12, %v2771_v59  ;;  %v3158_v0 = vadd.f32 %v7094_v35, %v2770_v21  ;;  %v7097_v5 = vld [vmem:[#allocation44_spill] sm:$0xff] }
 0x1fb   : > { %v4033_v15 = vmul.f32 %v3963_v30, %v3963_v30  ;;  %4103 = vst [vmem:[%s6726_s14 + $0xa0] sm:$0xff] %v3963_v30  ;;  %v3966_v9 = vadd.f32 %v6714_v54, %v3927_v47  ;;  %v3926_v55 = vadd.f32 %v3855_v17, %v3539_v26  ;;  %v3542_v1 = vadd.f32 %v5219_v60, %v3155_v39 }
 0x1fc   : > { %v3994_v44 = vadd.f32 %v3993_v4, %v3963_v30  ;;  %v4063_v2 = vadd.f32 %v4062_v13, %v4032_v63  ;;  %v3478_v50 = vpop.f32.mrf.mxu1  ;;  %v5272_v28 = vpop.f32.mrf.mxu0  ;;  %v3157_v24 = vadd.f32 %v7091_v46, %v2769_v29  ;;  %v7098_v63 = vld [vmem:[#allocation42_spill] sm:$0xff] }
 0x1fd   : > { %4106 = vst [vmem:[%s6726_s14 + $0xb8] sm:$0xff] %v3966_v9  ;;  %v3965_v58 = vadd.f32 %v6714_v54, %v3926_v55  ;;  %v3929_v18 = vadd.f32 %v5269_v57, %v3542_v1  ;;  %v3541_v23 = vadd.f32 %v3478_v50, %v3154_v10  ;;  %v7096_v10 = vld [vmem:[#allocation22_spill] sm:$0xff]  ;;  %v4036_v56 = vmul.f32 %v3966_v9, %v3966_v9 }
 0x1fe   : > { %v4064_v51 = vadd.f32 %v4063_v2, %v4033_v15  ;;  %v3995_v43 = vadd.f32 %v3994_v44, %v3964_v3  ;;  %v5222_v52 = vpop.f32.mrf.mxu1  ;;  %v3875_v27 = vpop.f32.mrf.mxu0  ;;  %v2773_v3 = vadd.f32 %v6698_v40, %v7095_v19  ;;  %v2772_v37 = vadd.f32 %v7097_v5, %v7096_v10  ;;  %v7099_v15 = vld [vmem:[#allocation43_spill] sm:$0xff] }
 0x1ff   : > { %v4035_v49 = vmul.f32 %v3965_v58, %v3965_v58  ;;  %4105 = vst [vmem:[%s6726_s14 + $0xb0] sm:$0xff] %v3965_v58  ;;  %v3968_v48 = vadd.f32 %v6714_v54, %v3929_v18  ;;  %v3928_v53 = vadd.f32 %v3865_v62, %v3541_v23  ;;  %v3544_v22 = vadd.f32 %v5222_v52, %v3157_v24 }
 0x200   : > { %v3996_v32 = vadd.f32 %v3995_v43, %v3965_v58  ;;  %v4065_v17 = vadd.f32 %v4064_v51, %v4034_v16  ;;  %v3488_v38 = vpop.f32.mrf.mxu1  ;;  %v5275_v41 = vpop.f32.mrf.mxu0  ;;  %v3161_v13 = vadd.f32 %v7098_v63, %v2773_v3 }
 0x201   : > { %4108 = vst [vmem:[%s6726_s14 + $0xc8] sm:$0xff] %v3968_v48  ;;  %v3967_v7 = vadd.f32 %v6714_v54, %v3928_v53  ;;  %v3931_v39 = vadd.f32 %v5272_v28, %v3544_v22  ;;  %v3543_v6 = vadd.f32 %v3488_v38, %v3156_v8  ;;  %v4038_v55 = vmul.f32 %v3968_v48, %v3968_v48 }
 0x202   : > { %v4066_v57 = vadd.f32 %v4065_v17, %v4035_v49  ;;  %v3997_v11 = vadd.f32 %v3996_v32, %v3966_v9  ;;  %v5225_v36 = vpop.f32.mrf.mxu1  ;;  %v3885_v29 = vpop.f32.mrf.mxu0  ;;  %v3160_v9 = vadd.f32 %v7099_v15, %v2772_v37 }
 0x203   : > { %v4037_v30 = vmul.f32 %v3967_v7, %v3967_v7  ;;  %4107 = vst [vmem:[%s6726_s14 + $0xc0] sm:$0xff] %v3967_v7  ;;  %v3970_v47 = vadd.f32 %v6714_v54, %v3931_v39  ;;  %v3930_v26 = vadd.f32 %v3875_v27, %v3543_v6  ;;  %v3546_v40 = vadd.f32 %v5225_v36, %v3159_v61 }
 0x204   : > { %v3998_v45 = vadd.f32 %v3997_v11, %v3967_v7  ;;  %v4067_v14 = vadd.f32 %v4066_v57, %v4036_v56  ;;  %v3498_v31 = vpop.f32.mrf.mxu1  ;;  %v5278_v59 = vpop.f32.mrf.mxu0 }
 0x205   : > { %4110 = vst [vmem:[%s6726_s14 + $0xd8] sm:$0xff] %v3970_v47  ;;  %v3969_v4 = vadd.f32 %v6714_v54, %v3930_v26  ;;  %v3933_v60 = vadd.f32 %v5275_v41, %v3546_v40  ;;  %v3545_v62 = vadd.f32 %v3498_v31, %v3158_v0  ;;  %v4040_v18 = vmul.f32 %v3970_v47, %v3970_v47 }
 0x206   : > { %v4068_v1 = vadd.f32 %v4067_v14, %v4037_v30  ;;  %v3999_v34 = vadd.f32 %v3998_v45, %v3968_v48  ;;  %v5228_v33 = vpop.f32.mrf.mxu1  ;;  %v3895_v8 = vpop.f32.mrf.mxu0 }
 0x207   : > { %v4039_v20 = vmul.f32 %v3969_v4, %v3969_v4  ;;  %4109 = vst [vmem:[%s6726_s14 + $0xd0] sm:$0xff] %v3969_v4  ;;  %v3972_v42 = vadd.f32 %v6714_v54, %v3933_v60  ;;  %v3932_v21 = vadd.f32 %v3885_v29, %v3545_v62  ;;  %v3548_v44 = vadd.f32 %v5228_v33, %v3161_v13 }
 0x208   : > { %v4000_v2 = vadd.f32 %v3999_v34, %v3969_v4  ;;  %v4069_v50 = vadd.f32 %v4068_v1, %v4038_v55  ;;  %v3508_v28 = vpop.f32.mrf.mxu1 }
 0x209   : > { %4112 = vst [vmem:[%s6726_s14 + $0xe8] sm:$0xff] %v3972_v42  ;;  %v3971_v46 = vadd.f32 %v6714_v54, %v3932_v21  ;;  %v3935_v24 = vadd.f32 %v5278_v59, %v3548_v44  ;;  %v3547_v58 = vadd.f32 %v3508_v28, %v3160_v9  ;;  %v4042_v48 = vmul.f32 %v3972_v42, %v3972_v42 }
 0x20a   : > { %v4070_v23 = vadd.f32 %v4069_v50, %v4039_v20  ;;  %v4001_v25 = vadd.f32 %v4000_v2, %v3970_v47 }
 0x20b   : > { %v4041_v16 = vmul.f32 %v3971_v46, %v3971_v46  ;;  %4111 = vst [vmem:[%s6726_s14 + $0xe0] sm:$0xff] %v3971_v46  ;;  %v3974_v51 = vadd.f32 %v6714_v54, %v3935_v24  ;;  %v3934_v43 = vadd.f32 %v3895_v8, %v3547_v58 }
 0x20c   : > { %v4002_v52 = vadd.f32 %v4001_v25, %v3971_v46  ;;  %v4071_v27 = vadd.f32 %v4070_v23, %v4040_v18 }
 0x20d   : > { %4114 = vst [vmem:[%s6726_s14 + $0xf8] sm:$0xff] %v3974_v51  ;;  %v3973_v49 = vadd.f32 %v6714_v54, %v3934_v43  ;;  %v4044_v0 = vmul.f32 %v3974_v51, %v3974_v51 }
 0x20e   : > { %v4072_v53 = vadd.f32 %v4071_v27, %v4041_v16  ;;  %v4003_v22 = vadd.f32 %v4002_v52, %v3972_v42 }
 0x20f   : > { %v4043_v12 = vmul.f32 %v3973_v49, %v3973_v49  ;;  %4113 = vst [vmem:[%s6726_s14 + $0xf0] sm:$0xff] %v3973_v49 }
 0x210   : > { %v4004_v61 = vadd.f32 %v4003_v22, %v3973_v49  ;;  %v4073_v35 = vadd.f32 %v4072_v53, %v4042_v48 }
 0x212   : > { %v4005_v32 = vadd.f32 %v4004_v61, %v3974_v51  ;;  %v4074_v17 = vadd.f32 %v4073_v35, %v4043_v12 }
 0x214   : > { %v4006_v38 = vrot.slane %v4005_v32, 4  ;;  %v4075_v41 = vadd.f32 %v4074_v17, %v4044_v0 }
 0x216   : > { %v4007_v19 = vadd.f32 %v4006_v38, %v4005_v32  ;;  %v4076_v3 = vrot.slane %v4075_v41, 4 }
 0x218   : > { %v4008_v7 = vrot.slane %v4007_v19, 2  ;;  %v4077_v39 = vadd.f32 %v4076_v3, %v4075_v41 }
 0x21a   : > { %v4009_v6 = vadd.f32 %v4008_v7, %v4007_v19  ;;  %v4078_v54 = vrot.slane %v4077_v39, 2 }
 0x21c   : > { %v4010_v10 = vrot.slane %v4009_v6, 1  ;;  %v4079_v5 = vadd.f32 %v4078_v54, %v4077_v39 }
 0x21e   : > { %v4011_v37 = vadd.f32 %v4010_v10, %v4009_v6  ;;  %v4080_v56 = vrot.slane %v4079_v5, 1 }
 0x220   : > { %4012 = vst [vmem:[%s292_s16] sm:$0x1] %v4011_v37  ;;  %v4081_v57 = vadd.f32 %v4080_v56, %v4079_v5 }
 0x222   : > { %4082 = vst [vmem:[%s295_s19] sm:$0x1] %v4081_v57 }
 0x223 PF: > { %s18_s24 = sadd.s32 1, %s5296_s24  }
 0x224   : > { %p15_p4 = scmp.ge.s32.totalorder %s18_s24, 4  }
 0x226   :  { %17 = sbr.rel (!%p15_p4) target bundleno = 1 (0x1), region = 105 }

</bundles_post_ra>
